<compile_context>
chip_gen: v6e
topology: v6e:2x2x1
jax: 0.10.0
libtpu: 0.0.40
codegen_flags: <defaults>
</compile_context>

<pallas_src>
import jax
import jax.numpy as jnp
import numpy as np
from jax.experimental import pallas as pl
from jax.experimental.pallas import tpu as pltpu

# ----------------------------- "config" --------------------------------------
EMB_DIM = 32          # config.emb_dim
HID_DIM = 32          # config.hidden_dim (must equal emb_dim, see note above)
VOCAB = 64            # config.vocab_size
N_EXTRA = 8           # size of extra_zeros (OOV extension)
RAND_UNIF_MAG = 0.05  # config.rand_unif_init_mag
NORM_STD = 0.1        # config.trunc_norm_init_std (scaled up for numerics)

SLAB_LANES = 128

_E, _H, _V = EMB_DIM, HID_DIM, VOCAB

# bf16 matrix slab: all MXU weights, fused/packed, 16-row aligned blocks.
WM_SHAPES = (
    ("xc_w",     (_H + _E, _E)),              # x_context
    ("w_lstm",   (_E + _H, 4 * _H)),          # [w_ih ; w_hh]
    ("ea_Wh",    (_E, 2 * _H)),               # encoder attention (hoisted, step 0)
    ("W_att",    (2 * _H + _E, 3 * _H)),      # fused [ea_Ws | da_Ws/da_Wt]
    ("da_Wprev", (_H, _H)),                   # intra-decoder attention over prev_s
    ("W_big",    (3 * _H + 2 * _E, _V + 1)),  # fused [V_w@V1_w | p_gen column]
)


def _build_mat_layout():
    layout, r = {}, 0
    for name, (rows, cols) in WM_SHAPES:
        assert cols <= SLAB_LANES and rows % 16 == 0   # bf16 sublane tile = 16 rows
        layout[name] = (r, rows, cols)
        r += rows
    return layout, r


WM_LAYOUT, WM_ROWS = _build_mat_layout()     # 448 x 128 bf16 (~114 KB, resident)

# f32 vector slab: biases and attention v-vectors, one row each.
WV_LAYOUT = {
    "xc_b":    (0, _E),
    "b_lstm":  (1, 4 * _H),        # b_ih + b_hh
    "W_att_b": (2, 3 * _H),        # [ea_Ws_b | da_Ws_b + da_Wt_b]
    "ea_v":    (3, 2 * _H),
    "da_v":    (4, _H),
    "b_big":   (5, _V + 1),        # [V_b@V1_w + V1_b | pgen_b]
}
WV_ROWS = 8


# -------------------- host-side weight fusion + packing ----------------------
def pack_weights(params):
    """Fuse and pack the parameter dict into (bf16 matrix slab, f32 vector slab)."""
    f32 = jnp.float32
    E, H, V = EMB_DIM, HID_DIM, VOCAB

    w_lstm = jnp.concatenate([params["w_ih"], params["w_hh"]], axis=0)
    b_lstm = params["b_ih"] + params["b_hh"]

    # fused ea_Ws (on st_hat=[dec_h,dec_c]) + da_Ws (dec_h) / da_Wt (sum_k_emb)
    W_att = jnp.zeros((2 * H + E, 3 * H), f32)
    W_att = W_att.at[0:2 * H, 0:2 * H].set(params["ea_Ws"])
    W_att = W_att.at[0:H, 2 * H:3 * H].set(params["da_Ws"])
    W_att = W_att.at[2 * H:2 * H + E, 2 * H:3 * H].set(params["da_Wt"])
    W_att_b = jnp.concatenate(
        [params["ea_Ws_b"], params["da_Ws_b"] + params["da_Wt_b"]], axis=1)

    # folded vocab projection (no nonlinearity between V and V1) + p_gen column
    W_fold = jnp.dot(params["V_w"], params["V1_w"])
    b_fold = jnp.dot(params["V_b"], params["V1_w"]) + params["V1_b"]
    pg = params["pgen_w"][0]                   # order: [ct_e, ct_d, dec_h, dec_c, x]
    pg_col = jnp.concatenate([pg[E + H:E + 2 * H],        # dec_h
                              pg[0:E],                     # ct_e
                              pg[E:E + H],                 # ct_d
                              pg[E + 2 * H:E + 3 * H],     # dec_c
                              pg[E + 3 * H:E + 3 * H + E]])  # x
    W_big = jnp.zeros((3 * H + 2 * E, V + 1), f32)
    W_big = W_big.at[0:2 * H + E, 0:V].set(W_fold)   # input order [dec_h, ct_e, ct_d]
    W_big = W_big.at[:, V].set(pg_col)
    b_big = jnp.concatenate([b_fold, params["pgen_b"]], axis=1)

    mats = {"xc_w": params["xc_w"], "w_lstm": w_lstm, "ea_Wh": params["ea_Wh"],
            "W_att": W_att, "da_Wprev": params["da_Wprev"], "W_big": W_big}
    w_mat = jnp.zeros((WM_ROWS, SLAB_LANES), f32)
    for name, (r0, nr, nc) in WM_LAYOUT.items():
        w_mat = w_mat.at[r0:r0 + nr, 0:nc].set(mats[name].astype(f32))

    vecs = {"xc_b": params["xc_b"], "b_lstm": b_lstm, "W_att_b": W_att_b,
            "ea_v": params["ea_v"], "da_v": params["da_v"], "b_big": b_big}
    w_vec = jnp.zeros((WV_ROWS, SLAB_LANES), f32)
    for name, (r0, nc) in WV_LAYOUT.items():
        w_vec = w_vec.at[r0, 0:nc].set(vecs[name].astype(f32).reshape(nc))

    return w_mat.astype(jnp.bfloat16), w_vec


# --------------------------------- kernel -------------------------------------
def decoder_kernel(x_ref, state0_ref, enc_out_ref, enc_mask_ref, enc_ids_ref,
                   prev_init_ref, key_x_ref, key_mask_ref, wm_ref, wv_ref,
                   out_ref, prev_ref,
                   state_sc, et_enc_sc, onehot_sc):
    f32 = jnp.float32
    bf16 = jnp.bfloat16
    E, H, V = EMB_DIM, HID_DIM, VOCAB
    B, S, _ = enc_out_ref.shape
    P0 = prev_init_ref.shape[0]
    Pmax = prev_ref.shape[0]
    Vt = onehot_sc.shape[2]

    t = pl.program_id(0)

    def wm(name):                                   # bf16 MXU weight block
        r0, nr, nc = WM_LAYOUT[name]
        return wm_ref[r0:r0 + nr, 0:nc]

    def wv(name):                                   # f32 bias / v-vector row
        r0, nc = WV_LAYOUT[name]
        return wv_ref[r0:r0 + 1, 0:nc]

    def bdot(a, w):                                 # single-pass bf16 MXU matmul
        return jnp.dot(a.astype(bf16), w, preferred_element_type=f32)

    # ---- step 0: hoist step-invariant work, init carried state / prev_s buffer ----
    @pl.when(t == 0)
    def _():
        sum_k_emb = jnp.sum(key_x_ref[...] * key_mask_ref[...][:, :, None], axis=1)
        state_sc[...] = jnp.concatenate([state0_ref[...], sum_k_emb], axis=1)
        et_enc_sc[...] = bdot(enc_out_ref[...].reshape(B * S, E),
                              wm("ea_Wh")).reshape(B, S, 2 * H)
        onehot_sc[...] = (enc_ids_ref[...][:, :, None]
                          == jax.lax.broadcasted_iota(jnp.int32, (B, S, Vt), 2)
                          ).astype(f32)
        prev_ref[...] = jnp.zeros_like(prev_ref)
        prev_ref[0:P0] = prev_init_ref[...]

    # ---------------- per-step recurrent math ----------------
    state = state_sc[...]
    h_prev = state[:, 0:H]
    c_prev = state[:, H:2 * H]
    ct_e = state[:, 2 * H:2 * H + E]
    sum_k = state[:, 2 * H + E:2 * H + 2 * E]
    x_t = x_ref[0]                                  # [B, E]

    # x = x_context(cat([x_t, ct_e]))
    x = bdot(jnp.concatenate([x_t, ct_e], axis=1), wm("xc_w")) + wv("xc_b")

    # LSTMCell (fused [w_ih ; w_hh]); gate order i, f, g, o
    gates = bdot(jnp.concatenate([x, h_prev], axis=1), wm("w_lstm")) + wv("b_lstm")
    i_g = jax.nn.sigmoid(gates[:, 0:H])
    f_g = jax.nn.sigmoid(gates[:, H:2 * H])
    g_g = jnp.tanh(gates[:, 2 * H:3 * H])
    o_g = jax.nn.sigmoid(gates[:, 3 * H:4 * H])
    dec_c = f_g * c_prev + i_g * g_g
    dec_h = o_g * jnp.tanh(dec_c)

    # one fused MXU pass: encoder dec_fea and intra-decoder W_s(dec_h)+W_t(sum_k)
    att = bdot(jnp.concatenate([dec_h, dec_c, sum_k], axis=1),
               wm("W_att")) + wv("W_att_b")                            # [B, 3H]
    dec_fea = att[:, 0:2 * H]
    dfd_kt = att[:, 2 * H:3 * H]

    # ---------------- encoder attention (W_h(enc_out) hoisted) ----------------
    et = jnp.tanh(et_enc_sc[...] + dec_fea[:, None, :])
    scores = jnp.sum(et * wv("ea_v")[None, :, :], axis=2)             # [B, S]
    scores = scores - jnp.max(scores, axis=1, keepdims=True)
    e = jnp.exp(scores)
    et1 = e * pl.reciprocal(jnp.sum(e, axis=1, keepdims=True), approx=True)
    at = et1 * enc_mask_ref[...]
    denom = jnp.maximum(jnp.sum(at, axis=1, keepdims=True), 1e-30)    # cheap NaN guard
    at = at * pl.reciprocal(denom, approx=True)
    ct_e_new = jnp.sum(at[:, :, None] * enc_out_ref[...], axis=1)     # [B, E]

    # ------ intra-decoder attention over the preallocated prev_s buffer ------
    prev = prev_ref[...]                                              # [Pmax, B, H]
    etd = bdot(prev.reshape(Pmax * B, H), wm("da_Wprev")).reshape(Pmax, B, H)
    etd = jnp.tanh(etd + dfd_kt[None, :, :])
    d_scores = jnp.sum(etd * wv("da_v")[None, :, :], axis=2)          # [Pmax, B]
    n_valid = P0 + t                                                  # filled entries
    live = jax.lax.broadcasted_iota(jnp.int32, (Pmax, B), 0) < n_valid
    d_scores = jnp.where(live, d_scores, -1e30)
    d_scores = d_scores - jnp.max(d_scores, axis=0, keepdims=True)
    de = jnp.exp(d_scores)
    at_d = de * pl.reciprocal(jnp.sum(de, axis=0, keepdims=True), approx=True)
    ct_d = jnp.sum(at_d[:, :, None] * prev, axis=0)                   # [B, H]

    # ------- fused vocab projection (V_w@V1_w) + p_gen column, one MXU pass -------
    big_in = jnp.concatenate([dec_h, ct_e_new, ct_d, dec_c, x], axis=1)   # [B, 3H+2E]
    big = bdot(big_in, wm("W_big")) + wv("b_big")                         # [B, V+1]
    p_gen = jax.nn.sigmoid(big[:, V:V + 1])
    logits = big[:, 0:V]
    logits = logits - jnp.max(logits, axis=1, keepdims=True)
    oe = jnp.exp(logits)
    vocab_dist = oe * pl.reciprocal(jnp.sum(oe, axis=1, keepdims=True), approx=True)
    vocab_dist = p_gen * vocab_dist
    attn_w = (1.0 - p_gen) * at

    # deterministic scatter_add over the extended vocab (hoisted one-hot)
    copy_dist = jnp.sum(attn_w[:, :, None] * onehot_sc[...], axis=1)      # [B, Vt]
    if Vt > V:
        vocab_dist = jnp.concatenate(
            [vocab_dist, jnp.zeros((B, Vt - V), f32)], axis=1)
    final = vocab_dist + copy_dist

    # lane-dense packed per-step output: [final | dec_h | dec_c | ct_e | pad]
    parts = [final, dec_h, dec_c, ct_e_new]
    pad = out_ref.shape[2] - (Vt + 2 * H + E)
    if pad > 0:
        parts.append(jnp.zeros((B, pad), f32))
    out_ref[0] = jnp.concatenate(parts, axis=1)

    # carry state to the next step; append dec_h (module: prev_s = cat([prev_s, s_t]))
    state_sc[...] = jnp.concatenate([dec_h, dec_c, ct_e_new, sum_k], axis=1)
    prev_ref[n_valid] = dec_h


# --------------------------------- wrappers ------------------------------------
@jax.jit
def decoder_decode(w_mat, w_vec, x_seq, s_t, enc_out, enc_padding_mask, ct_e,
                   extra_zeros, enc_batch_extend_vocab, sum_temporal_srcs,
                   prev_s, key_x, key_mask):
    """Run T decoder steps inside ONE Pallas kernel (grid over steps).

    x_seq: [T, B, 1, E] per-step inputs (teacher forcing).  Semantically
    equivalent to applying Decoder.forward T times while carrying
    (dec_h, dec_c), ct_e and prev_s between steps.
    """
    h0, c0 = s_t
    T = x_seq.shape[0]
    B, S, E = enc_out.shape
    H = h0.shape[1]
    V = VOCAB
    Vt = V + (extra_zeros.shape[1] if extra_zeros is not None else 0)
    P0 = prev_s.shape[1]
    Pmax = P0 + T
    out_w = max(128, -(-(Vt + 2 * H + E) // 128) * 128)   # lane-dense output slab

    f32 = jnp.float32
    x_steps = x_seq[:, :, 0, :].astype(f32)                        # [T, B, E]
    state0 = jnp.concatenate([h0, c0, ct_e], axis=1).astype(f32)   # [B, 2H+E]
    prev_init = jnp.transpose(prev_s, (1, 0, 2)).astype(f32)       # [P0, B, H]

    grid_spec = pltpu.PrefetchScalarGridSpec(
        num_scalar_prefetch=0,
        grid=(T,),
        in_specs=[
            pl.BlockSpec((1, B, E), lambda t: (t, 0, 0)),          # per-step x_t
            pl.BlockSpec((B, 2 * H + E), lambda t: (0, 0)),        # initial state (resident)
            pl.BlockSpec((B, S, E), lambda t: (0, 0, 0)),          # enc_out (resident)
            pl.BlockSpec((B, S), lambda t: (0, 0)),                # enc mask (resident)
            pl.BlockSpec((B, S), lambda t: (0, 0)),                # extend-vocab ids (resident)
            pl.BlockSpec((P0, B, H), lambda t: (0, 0, 0)),         # initial prev_s (resident)
            pl.BlockSpec(key_x.shape, lambda t: (0, 0, 0)),        # key_x (resident)
            pl.BlockSpec(key_mask.shape, lambda t: (0, 0)),        # key_mask (resident)
            pl.BlockSpec((WM_ROWS, SLAB_LANES), lambda t: (0, 0)),  # bf16 weight slab
            pl.BlockSpec((WV_ROWS, SLAB_LANES), lambda t: (0, 0)),  # f32 bias slab
        ],
        out_specs=[
            pl.BlockSpec((1, B, out_w), lambda t: (t, 0, 0)),      # per-step packed outputs
            pl.BlockSpec((Pmax, B, H), lambda t: (0, 0, 0)),       # grown prev_s (resident)
        ],
        scratch_shapes=[
            pltpu.VMEM((B, 2 * (H + E)), f32),       # carried h | c | ct_e | sum_k_emb
            pltpu.VMEM((B, S, 2 * H), f32),          # hoisted enc_out @ ea_Wh
            pltpu.VMEM((B, S, Vt), f32),             # hoisted one-hot(extend ids)
        ],
    )

    out_slab, prev_out = pl.pallas_call(
        decoder_kernel,
        out_shape=(jax.ShapeDtypeStruct((T, B, out_w), f32),
                   jax.ShapeDtypeStruct((Pmax, B, H), f32)),
        grid_spec=grid_spec,
        compiler_params=pltpu.CompilerParams(
            dimension_semantics=("arbitrary",),       # state carried across steps
            vmem_limit_bytes=8 * 1024 * 1024),        # resident footprint << 8 MiB (v7x-safe)
    )(x_steps, state0, enc_out.astype(f32), enc_padding_mask.astype(f32),
      enc_batch_extend_vocab.astype(jnp.int32), prev_init,
      key_x.astype(f32), key_mask.astype(f32), w_mat, w_vec)

    final_seq = out_slab[:, :, 0:Vt]                               # [T, B, Vt]
    h_seq = out_slab[:, :, Vt:Vt + H]
    c_seq = out_slab[:, :, Vt + H:Vt + 2 * H]
    cte_seq = out_slab[:, :, Vt + 2 * H:Vt + 2 * H + E]
    prev_s_new = jnp.transpose(prev_out, (1, 0, 2))                # [B, P0+T, H]
    return final_seq, (h_seq, c_seq), cte_seq, sum_temporal_srcs, prev_s_new


def decoder_forward(w_mat, w_vec, x_t, s_t, enc_out, enc_padding_mask, ct_e,
                    extra_zeros, enc_batch_extend_vocab, sum_temporal_srcs,
                    prev_s, key_x, key_mask):
    """Single-step entry mirroring Decoder.forward (T = 1)."""
    final_seq, (h_seq, c_seq), cte_seq, sts, prev_new = decoder_decode(
        w_mat, w_vec, x_t[None], s_t, enc_out, enc_padding_mask, ct_e,
        extra_zeros, enc_batch_extend_vocab, sum_temporal_srcs,
        prev_s, key_x, key_mask)
    return final_seq[0], (h_seq[-1], c_seq[-1]), cte_seq[-1], sts, prev_new


# --------------------- pure-JAX reference (original math) ---------------------
def reference_step(params, x_t, h_prev, c_prev, enc_out, enc_mask, ct_e,
                   enc_ext_ids, prev_s, key_x, key_mask, n_extra):
    f32 = jnp.float32
    w = params
    B, S, E = enc_out.shape
    H = h_prev.shape[1]
    P = prev_s.shape[1]
    V = w["V1_w"].shape[1]
    Vt = V + n_extra

    sum_k_emb = jnp.sum(key_x * key_mask[:, :, None], axis=1)
    x = jnp.dot(jnp.concatenate([x_t, ct_e], axis=1), w["xc_w"]) + w["xc_b"]
    gates = (jnp.dot(x, w["w_ih"]) + jnp.dot(h_prev, w["w_hh"])
             + w["b_ih"] + w["b_hh"])
    i_g = jax.nn.sigmoid(gates[:, 0:H])
    f_g = jax.nn.sigmoid(gates[:, H:2 * H])
    g_g = jnp.tanh(gates[:, 2 * H:3 * H])
    o_g = jax.nn.sigmoid(gates[:, 3 * H:4 * H])
    dec_c = f_g * c_prev + i_g * g_g
    dec_h = o_g * jnp.tanh(dec_c)
    st_hat = jnp.concatenate([dec_h, dec_c], axis=1)

    et = jnp.dot(enc_out.reshape(B * S, E), w["ea_Wh"]).reshape(B, S, 2 * H)
    dec_fea = jnp.dot(st_hat, w["ea_Ws"]) + w["ea_Ws_b"]
    et = jnp.tanh(et + dec_fea[:, None, :])
    scores = jnp.sum(et * w["ea_v"][None, :, :], axis=2)
    et1 = jax.nn.softmax(scores, axis=1)
    at = et1 * enc_mask
    at = at / jnp.sum(at, axis=1, keepdims=True)
    ct_e_new = jnp.sum(at[:, :, None] * enc_out, axis=1)
    attn_dist = at

    etd = jnp.dot(prev_s.reshape(B * P, H), w["da_Wprev"]).reshape(B, P, H)
    dfd = jnp.dot(dec_h, w["da_Ws"]) + w["da_Ws_b"]
    k_t = jnp.dot(sum_k_emb, w["da_Wt"]) + w["da_Wt_b"]
    etd = jnp.tanh(etd + dfd[:, None, :] + k_t[:, None, :])
    d_scores = jnp.sum(etd * w["da_v"][None, :, :], axis=2)
    at_d = jax.nn.softmax(d_scores, axis=1)
    ct_d = jnp.sum(at_d[:, :, None] * prev_s, axis=1)

    pg_in = jnp.concatenate([ct_e_new, ct_d, st_hat, x], axis=1)
    p_gen = jax.nn.sigmoid(jnp.dot(pg_in, w["pgen_w"].T) + w["pgen_b"])

    out = jnp.concatenate([dec_h, ct_e_new, ct_d], axis=1)
    out = jnp.dot(out, w["V_w"]) + w["V_b"]
    out = jnp.dot(out, w["V1_w"]) + w["V1_b"]
    vocab_dist = jax.nn.softmax(out, axis=1)
    vocab_dist = p_gen * vocab_dist
    attn_dist_ = (1.0 - p_gen) * attn_dist

    vocab_ext = jnp.concatenate([vocab_dist, jnp.zeros((B, Vt - V), f32)], axis=1)
    onehot = (enc_ext_ids[:, :, None]
              == jax.lax.broadcasted_iota(jnp.int32, (B, S, Vt), 2)).astype(f32)
    final = vocab_ext + jnp.sum(attn_dist_[:, :, None] * onehot, axis=1)
    prev_s_new = jnp.concatenate([prev_s, dec_h[:, None, :]], axis=1)
    return final, dec_h, dec_c, ct_e_new, prev_s_new


# ----------------------------- parameter init ---------------------------------
def make_params(key):
    E, H, V = EMB_DIM, HID_DIM, VOCAB
    ks = jax.random.split(key, 20)

    def bf16r(x):          # keep parameter values bf16-representable so the
        return x.astype(jnp.bfloat16).astype(jnp.float32)   # bf16 slab is lossless

    def nrm(k, shape, std=NORM_STD):
        return bf16r((std * jax.random.normal(k, shape)).astype(jnp.float32))

    def uni(k, shape, mag=RAND_UNIF_MAG):
        return bf16r(jax.random.uniform(k, shape, jnp.float32, -mag, mag))

    # init_lstm_wt: both bias_ih and bias_hh get forget-gate slice = 1 (so the
    # effective forget bias is 2.0, matching the torch init).
    b_lstm = jnp.zeros((1, 4 * H), jnp.float32).at[:, H:2 * H].set(1.0)

    return dict(
        xc_w=nrm(ks[0], (H + E, E)), xc_b=nrm(ks[1], (1, E)),
        w_ih=uni(ks[2], (E, 4 * H)), w_hh=uni(ks[3], (H, 4 * H)),
        b_ih=b_lstm, b_hh=b_lstm,
        pgen_w=nrm(ks[4], (1, 4 * E + E)), pgen_b=nrm(ks[5], (1, 1)),
        V_w=nrm(ks[6], (2 * H + E, H)), V_b=nrm(ks[7], (1, H)),
        V1_w=nrm(ks[8], (H, V)), V1_b=nrm(ks[9], (1, V)),
        ea_Wh=nrm(ks[10], (E, 2 * H)),
        ea_Ws=nrm(ks[11], (2 * H, 2 * H)), ea_Ws_b=nrm(ks[12], (1, 2 * H)),
        ea_v=nrm(ks[13], (1, 2 * H)),
        da_Wprev=nrm(ks[14], (H, H)),
        da_Ws=nrm(ks[15], (H, H)), da_Ws_b=nrm(ks[16], (1, H)),
        da_Wt=nrm(ks[17], (E, H)), da_Wt_b=nrm(ks[18], (1, H)),
        da_v=nrm(ks[19], (1, H)),
    )


# ----------------------------------- main --------------------------------------
if __name__ == "__main__":
    B, S, K, P0, T_STEPS = 8, 16, 4, 4, 4
    E, H = EMB_DIM, HID_DIM

    root = jax.random.PRNGKey(0)
    kp, kd = jax.random.split(root)
    params = make_params(kp)
    w_mat, w_vec = pack_weights(params)        # fuse + pack weights ONCE, outside jit
    ks = jax.random.split(kd, 10)

    x_seq = jax.random.normal(ks[0], (T_STEPS, B, 1, E), jnp.float32)
    h0 = 0.1 * jax.random.normal(ks[1], (B, H), jnp.float32)
    c0 = 0.1 * jax.random.normal(ks[2], (B, H), jnp.float32)
    enc_out = jax.random.normal(ks[3], (B, S, E), jnp.float32)
    enc_padding_mask = (jax.random.uniform(ks[4], (B, S)) > 0.2).astype(jnp.float32)
    enc_padding_mask = enc_padding_mask.at[:, 0].set(1.0)   # avoid all-zero rows
    ct_e0 = 0.1 * jax.random.normal(ks[5], (B, E), jnp.float32)
    extra_zeros = jnp.zeros((B, N_EXTRA), jnp.float32)
    enc_batch_extend_vocab = jax.random.randint(ks[6], (B, S), 0, VOCAB + N_EXTRA)
    prev_s0 = 0.1 * jax.random.normal(ks[7], (B, P0, H), jnp.float32)
    key_x = jax.random.normal(ks[8], (B, K, E), jnp.float32)
    key_mask = (jax.random.uniform(ks[9], (B, K)) > 0.3).astype(jnp.float32)

    # T decode steps in one Pallas call (weights resident, state carried in VMEM)
    outs = decoder_decode(w_mat, w_vec, x_seq, (h0, c0), enc_out,
                          enc_padding_mask, ct_e0, extra_zeros,
                          enc_batch_extend_vocab, None, prev_s0, key_x, key_mask)
    outs = jax.block_until_ready(outs)
    final_seq, (h_seq, c_seq), cte_seq, _, prev_new = outs

    # pure-JAX reference: the ORIGINAL (unfused, exact-divide, f32) math stepped T times
    h, c, cte, prev = h0, c0, ct_e0, prev_s0
    ref_f, ref_h, ref_c, ref_cte = [], [], [], []
    for t in range(T_STEPS):
        f_t, h, c, cte, prev = reference_step(
            params, x_seq[t, :, 0, :], h, c, enc_out, enc_padding_mask, cte,
            enc_batch_extend_vocab.astype(jnp.int32), prev, key_x, key_mask, N_EXTRA)
        ref_f.append(f_t); ref_h.append(h); ref_c.append(c); ref_cte.append(cte)

    tol = dict(rtol=5e-3, atol=5e-3)   # bf16 MXU operands + approx EUP reciprocals
    np.testing.assert_allclose(np.asarray(final_seq), np.asarray(jnp.stack(ref_f)), **tol)
    np.testing.assert_allclose(np.asarray(h_seq), np.asarray(jnp.stack(ref_h)), **tol)
    np.testing.assert_allclose(np.asarray(c_seq), np.asarray(jnp.stack(ref_c)), **tol)
    np.testing.assert_allclose(np.asarray(cte_seq), np.asarray(jnp.stack(ref_cte)), **tol)
    np.testing.assert_allclose(np.asarray(prev_new), np.asarray(prev), **tol)
    assert prev_new.shape == (B, P0 + T_STEPS, H)

    # single-step entry with the original module signature (T = 1)
    f1, (h1, c1), cte1, _, prev1 = decoder_forward(
        w_mat, w_vec, x_seq[0], (h0, c0), enc_out, enc_padding_mask, ct_e0,
        extra_zeros, enc_batch_extend_vocab, None, prev_s0, key_x, key_mask)
    jax.block_until_ready(f1)
    np.testing.assert_allclose(np.asarray(f1), np.asarray(ref_f[0]), **tol)
    assert prev1.shape == (B, P0 + 1, H)

    print("KERNEL_OK")
</pallas_src>

<mosaic_0001>
module attributes {stable_mosaic.version = 11 : i64} {
  func.func @decoder_kernel(%arg0: i32, %arg1: memref<1x8x32xf32, #tpu.memory_space<vmem>>, %arg2: memref<8x96xf32, #tpu.memory_space<vmem>>, %arg3: memref<8x16x32xf32, #tpu.memory_space<vmem>>, %arg4: memref<8x16xf32, #tpu.memory_space<vmem>>, %arg5: memref<8x16xi32, #tpu.memory_space<vmem>>, %arg6: memref<4x8x32xf32, #tpu.memory_space<vmem>>, %arg7: memref<8x4x32xf32, #tpu.memory_space<vmem>>, %arg8: memref<8x4xf32, #tpu.memory_space<vmem>>, %arg9: memref<448x128xbf16, #tpu.memory_space<vmem>>, %arg10: memref<8x128xf32, #tpu.memory_space<vmem>>, %arg11: memref<1x8x256xf32, #tpu.memory_space<vmem>>, %arg12: memref<8x8x32xf32, #tpu.memory_space<vmem>>, %arg13: memref<8x128xf32, #tpu.memory_space<vmem>>, %arg14: memref<8x16x64xf32, #tpu.memory_space<vmem>>, %arg15: memref<8x16x72xf32, #tpu.memory_space<vmem>>) attributes {dimension_semantics = [#tpu.dimension_semantics<arbitrary>], iteration_bounds = array<i64: 4>, scalar_prefetch = 0 : i64, scratch_operands = 3 : i64, tpu.core_type = #tpu.core_type<tc>, window_params = [{transform_indices = @transform_0, window_bounds = array<i64: 1, 8, 32>}, {pipeline_mode = #tpu.pipeline_mode<synchronous>, transform_indices = @transform_1, window_bounds = array<i64: 8, 96>}, {pipeline_mode = #tpu.pipeline_mode<synchronous>, transform_indices = @transform_2, window_bounds = array<i64: 8, 16, 32>}, {pipeline_mode = #tpu.pipeline_mode<synchronous>, transform_indices = @transform_3, window_bounds = array<i64: 8, 16>}, {pipeline_mode = #tpu.pipeline_mode<synchronous>, transform_indices = @transform_4, window_bounds = array<i64: 8, 16>}, {pipeline_mode = #tpu.pipeline_mode<synchronous>, transform_indices = @transform_5, window_bounds = array<i64: 4, 8, 32>}, {pipeline_mode = #tpu.pipeline_mode<synchronous>, transform_indices = @transform_6, window_bounds = array<i64: 8, 4, 32>}, {pipeline_mode = #tpu.pipeline_mode<synchronous>, transform_indices = @transform_7, window_bounds = array<i64: 8, 4>}, {pipeline_mode = #tpu.pipeline_mode<synchronous>, transform_indices = @transform_8, window_bounds = array<i64: 448, 128>}, {pipeline_mode = #tpu.pipeline_mode<synchronous>, transform_indices = @transform_9, window_bounds = array<i64: 8, 128>}, {transform_indices = @transform_10, window_bounds = array<i64: 1, 8, 256>}, {pipeline_mode = #tpu.pipeline_mode<synchronous>, transform_indices = @transform_11, window_bounds = array<i64: 8, 8, 32>}]} {
    %c0_i32 = arith.constant 0 : i32
    %0 = arith.cmpi eq, %arg0, %c0_i32 : i32
    %1 = arith.extui %0 : i1 to i32
    %c0_i32_0 = arith.constant 0 : i32
    %2 = arith.cmpi ne, %1, %c0_i32_0 : i32
    scf.if %2 {
      %c0_64 = arith.constant 0 : index
      %c0_65 = arith.constant 0 : index
      %c0_66 = arith.constant 0 : index
      %176 = vector.load %arg7[%c0_64, %c0_65, %c0_66] : memref<8x4x32xf32, #tpu.memory_space<vmem>>, vector<8x4x32xf32>
      %c0_67 = arith.constant 0 : index
      %c0_68 = arith.constant 0 : index
      %177 = vector.load %arg8[%c0_67, %c0_68] : memref<8x4xf32, #tpu.memory_space<vmem>>, vector<8x4xf32>
      %178 = vector.shape_cast %177 : vector<8x4xf32> to vector<8x4x1xf32>
      %179 = vector.broadcast %178 : vector<8x4x1xf32> to vector<8x4x32xf32>
      %180 = arith.mulf %176, %179 : vector<8x4x32xf32>
      %cst_69 = arith.constant dense<0.000000e+00> : vector<8x32xf32>
      %181 = vector.multi_reduction <add>, %180, %cst_69 [1] : vector<8x4x32xf32> to vector<8x32xf32>
      %c0_70 = arith.constant 0 : index
      %c0_71 = arith.constant 0 : index
      %182 = vector.load %arg2[%c0_70, %c0_71] : memref<8x96xf32, #tpu.memory_space<vmem>>, vector<8x96xf32>
      %183 = tpu.concatenate %182, %181 in 1 : vector<8x96xf32>, vector<8x32xf32> -> vector<8x128xf32>
      %c0_72 = arith.constant 0 : index
      %c0_73 = arith.constant 0 : index
      %184 = vector.load %arg13[%c0_72, %c0_73] : memref<8x128xf32, #tpu.memory_space<vmem>>, vector<8x128xf32>
      tpu.vector_store %arg13[%c0_72, %c0_73], %183 {strides = array<i32>} : memref<8x128xf32, #tpu.memory_space<vmem>>, vector<8x128xf32>,
      %c0_74 = arith.constant 0 : index
      %c0_75 = arith.constant 0 : index
      %c0_76 = arith.constant 0 : index
      %185 = vector.load %arg3[%c0_74, %c0_75, %c0_76] : memref<8x16x32xf32, #tpu.memory_space<vmem>>, vector<8x16x32xf32>
      %186 = vector.shape_cast %185 : vector<8x16x32xf32> to vector<128x32xf32>
      %c128 = arith.constant 128 : index
      %c0_77 = arith.constant 0 : index
      %187 = vector.load %arg9[%c128, %c0_77] : memref<448x128xbf16, #tpu.memory_space<vmem>>, vector<32x64xbf16>
      %188 = arith.truncf %186 : vector<128x32xf32> to vector<128x32xbf16>
      %cst_78 = arith.constant dense<0.000000e+00> : vector<128x64xf32>
      %189 = tpu.matmul %188, %187, %cst_78 {dimension_numbers = #tpu.dot_dimension_numbers<[1], [0], [0], [1], [0, 0, 1, 1], [], []>} : vector<128x32xbf16>, vector<32x64xbf16>, vector<128x64xf32> -> vector<128x64xf32>
      %190 = vector.shape_cast %189 : vector<128x64xf32> to vector<8x16x64xf32>
      %c0_79 = arith.constant 0 : index
      %c0_80 = arith.constant 0 : index
      %c0_81 = arith.constant 0 : index
      %191 = vector.load %arg14[%c0_79, %c0_80, %c0_81] : memref<8x16x64xf32, #tpu.memory_space<vmem>>, vector<8x16x64xf32>
      tpu.vector_store %arg14[%c0_79, %c0_80, %c0_81], %190 {strides = array<i32>} : memref<8x16x64xf32, #tpu.memory_space<vmem>>, vector<8x16x64xf32>,
      %c0_82 = arith.constant 0 : index
      %c0_83 = arith.constant 0 : index
      %192 = vector.load %arg5[%c0_82, %c0_83] : memref<8x16xi32, #tpu.memory_space<vmem>>, vector<8x16xi32>
      %193 = vector.shape_cast %192 : vector<8x16xi32> to vector<8x16x1xi32>
      %194 = tpu.iota {dimensions = array<i32: 2>} : vector<8x16x72xi32>
      %195 = vector.broadcast %193 : vector<8x16x1xi32> to vector<8x16x72xi32>
      %196 = arith.cmpi eq, %195, %194 : vector<8x16x72xi32>
      %197 = arith.extui %196 : vector<8x16x72xi1> to vector<8x16x72xi32>
      %198 = arith.sitofp %197 : vector<8x16x72xi32> to vector<8x16x72xf32>
      %c0_84 = arith.constant 0 : index
      %c0_85 = arith.constant 0 : index
      %c0_86 = arith.constant 0 : index
      %199 = vector.load %arg15[%c0_84, %c0_85, %c0_86] : memref<8x16x72xf32, #tpu.memory_space<vmem>>, vector<8x16x72xf32>
      tpu.vector_store %arg15[%c0_84, %c0_85, %c0_86], %198 {strides = array<i32>} : memref<8x16x72xf32, #tpu.memory_space<vmem>>, vector<8x16x72xf32>,
      %cst_87 = arith.constant 0.000000e+00 : f32
      %200 = vector.broadcast %cst_87 : f32 to vector<8x8x32xf32>
      %c0_88 = arith.constant 0 : index
      %c0_89 = arith.constant 0 : index
      %c0_90 = arith.constant 0 : index
      %201 = vector.load %arg12[%c0_88, %c0_89, %c0_90] : memref<8x8x32xf32, #tpu.memory_space<vmem>>, vector<8x8x32xf32>
      tpu.vector_store %arg12[%c0_88, %c0_89, %c0_90], %200 {strides = array<i32>} : memref<8x8x32xf32, #tpu.memory_space<vmem>>, vector<8x8x32xf32>,
      %c0_91 = arith.constant 0 : index
      %c0_92 = arith.constant 0 : index
      %c0_93 = arith.constant 0 : index
      %202 = vector.load %arg6[%c0_91, %c0_92, %c0_93] : memref<4x8x32xf32, #tpu.memory_space<vmem>>, vector<4x8x32xf32>
      %c0_94 = arith.constant 0 : index
      %c0_95 = arith.constant 0 : index
      %c0_96 = arith.constant 0 : index
      %203 = vector.load %arg12[%c0_94, %c0_95, %c0_96] : memref<8x8x32xf32, #tpu.memory_space<vmem>>, vector<4x8x32xf32>
      tpu.vector_store %arg12[%c0_94, %c0_95, %c0_96], %202 {strides = array<i32>} : memref<8x8x32xf32, #tpu.memory_space<vmem>>, vector<4x8x32xf32>,
    } else {
    }
    %c0 = arith.constant 0 : index
    %c0_1 = arith.constant 0 : index
    %3 = vector.load %arg13[%c0, %c0_1] : memref<8x128xf32, #tpu.memory_space<vmem>>, vector<8x128xf32>
    %4 = vector.extract_strided_slice %3 {offsets = [0, 0], sizes = [8, 32], strides = [1, 1]} : vector<8x128xf32> to vector<8x32xf32>
    %5 = vector.extract_strided_slice %3 {offsets = [0, 32], sizes = [8, 32], strides = [1, 1]} : vector<8x128xf32> to vector<8x32xf32>
    %6 = vector.extract_strided_slice %3 {offsets = [0, 64], sizes = [8, 32], strides = [1, 1]} : vector<8x128xf32> to vector<8x32xf32>
    %7 = vector.extract_strided_slice %3 {offsets = [0, 96], sizes = [8, 32], strides = [1, 1]} : vector<8x128xf32> to vector<8x32xf32>
    %c0_2 = arith.constant 0 : index
    %c0_3 = arith.constant 0 : index
    %c0_4 = arith.constant 0 : index
    %8 = vector.load %arg1[%c0_2, %c0_3, %c0_4] : memref<1x8x32xf32, #tpu.memory_space<vmem>>, vector<1x8x32xf32>
    %9 = vector.shape_cast %8 : vector<1x8x32xf32> to vector<8x32xf32>
    %10 = tpu.concatenate %9, %6 in 1 : vector<8x32xf32>, vector<8x32xf32> -> vector<8x64xf32>
    %c0_5 = arith.constant 0 : index
    %c0_6 = arith.constant 0 : index
    %11 = vector.load %arg9[%c0_5, %c0_6] : memref<448x128xbf16, #tpu.memory_space<vmem>>, vector<64x32xbf16>
    %12 = arith.truncf %10 : vector<8x64xf32> to vector<8x64xbf16>
    %cst = arith.constant dense<0.000000e+00> : vector<8x32xf32>
    %13 = tpu.matmul %12, %11, %cst {dimension_numbers = #tpu.dot_dimension_numbers<[1], [0], [0], [1], [0, 0, 1, 1], [], []>} : vector<8x64xbf16>, vector<64x32xbf16>, vector<8x32xf32> -> vector<8x32xf32>
    %c0_7 = arith.constant 0 : index
    %c0_8 = arith.constant 0 : index
    %14 = vector.load %arg10[%c0_7, %c0_8] : memref<8x128xf32, #tpu.memory_space<vmem>>, vector<1x32xf32>
    %15 = vector.broadcast %14 : vector<1x32xf32> to vector<8x32xf32>
    %16 = arith.addf %13, %15 : vector<8x32xf32>
    %17 = tpu.concatenate %16, %4 in 1 : vector<8x32xf32>, vector<8x32xf32> -> vector<8x64xf32>
    %c64 = arith.constant 64 : index
    %c0_9 = arith.constant 0 : index
    %18 = vector.load %arg9[%c64, %c0_9] : memref<448x128xbf16, #tpu.memory_space<vmem>>, vector<64x128xbf16>
    %19 = arith.truncf %17 : vector<8x64xf32> to vector<8x64xbf16>
    %cst_10 = arith.constant dense<0.000000e+00> : vector<8x128xf32>
    %20 = tpu.matmul %19, %18, %cst_10 {dimension_numbers = #tpu.dot_dimension_numbers<[1], [0], [0], [1], [0, 0, 1, 1], [], []>} : vector<8x64xbf16>, vector<64x128xbf16>, vector<8x128xf32> -> vector<8x128xf32>
    %c1 = arith.constant 1 : index
    %c0_11 = arith.constant 0 : index
    %21 = vector.load %arg10[%c1, %c0_11] : memref<8x128xf32, #tpu.memory_space<vmem>>, vector<1x128xf32>
    %22 = vector.broadcast %21 : vector<1x128xf32> to vector<8x128xf32>
    %23 = arith.addf %20, %22 : vector<8x128xf32>
    %24 = vector.extract_strided_slice %23 {offsets = [0, 0], sizes = [8, 32], strides = [1, 1]} : vector<8x128xf32> to vector<8x32xf32>
    %25 = arith.negf %24 : vector<8x32xf32>
    %26 = math.exp %25 : vector<8x32xf32>
    %cst_12 = arith.constant 1.000000e+00 : f32
    %27 = vector.broadcast %cst_12 : f32 to vector<8x32xf32>
    %28 = arith.addf %27, %26 : vector<8x32xf32>
    %29 = arith.divf %27, %28 : vector<8x32xf32>
    %30 = vector.extract_strided_slice %23 {offsets = [0, 32], sizes = [8, 32], strides = [1, 1]} : vector<8x128xf32> to vector<8x32xf32>
    %31 = arith.negf %30 : vector<8x32xf32>
    %32 = math.exp %31 : vector<8x32xf32>
    %cst_13 = arith.constant 1.000000e+00 : f32
    %33 = vector.broadcast %cst_13 : f32 to vector<8x32xf32>
    %34 = arith.addf %33, %32 : vector<8x32xf32>
    %35 = arith.divf %33, %34 : vector<8x32xf32>
    %36 = vector.extract_strided_slice %23 {offsets = [0, 64], sizes = [8, 32], strides = [1, 1]} : vector<8x128xf32> to vector<8x32xf32>
    %37 = math.tanh %36 : vector<8x32xf32>
    %38 = vector.extract_strided_slice %23 {offsets = [0, 96], sizes = [8, 32], strides = [1, 1]} : vector<8x128xf32> to vector<8x32xf32>
    %39 = arith.negf %38 : vector<8x32xf32>
    %40 = math.exp %39 : vector<8x32xf32>
    %cst_14 = arith.constant 1.000000e+00 : f32
    %41 = vector.broadcast %cst_14 : f32 to vector<8x32xf32>
    %42 = arith.addf %41, %40 : vector<8x32xf32>
    %43 = arith.divf %41, %42 : vector<8x32xf32>
    %44 = arith.mulf %35, %5 : vector<8x32xf32>
    %45 = arith.mulf %29, %37 : vector<8x32xf32>
    %46 = arith.addf %44, %45 : vector<8x32xf32>
    %47 = math.tanh %46 : vector<8x32xf32>
    %48 = arith.mulf %43, %47 : vector<8x32xf32>
    %49 = tpu.concatenate %48, %46, %7 in 1 : vector<8x32xf32>, vector<8x32xf32>, vector<8x32xf32> -> vector<8x96xf32>
    %c160 = arith.constant 160 : index
    %c0_15 = arith.constant 0 : index
    %50 = vector.load %arg9[%c160, %c0_15] : memref<448x128xbf16, #tpu.memory_space<vmem>>, vector<96x96xbf16>
    %51 = arith.truncf %49 : vector<8x96xf32> to vector<8x96xbf16>
    %cst_16 = arith.constant dense<0.000000e+00> : vector<8x96xf32>
    %52 = tpu.matmul %51, %50, %cst_16 {dimension_numbers = #tpu.dot_dimension_numbers<[1], [0], [0], [1], [0, 0, 1, 1], [], []>} : vector<8x96xbf16>, vector<96x96xbf16>, vector<8x96xf32> -> vector<8x96xf32>
    %c2 = arith.constant 2 : index
    %c0_17 = arith.constant 0 : index
    %53 = vector.load %arg10[%c2, %c0_17] : memref<8x128xf32, #tpu.memory_space<vmem>>, vector<1x96xf32>
    %54 = vector.broadcast %53 : vector<1x96xf32> to vector<8x96xf32>
    %55 = arith.addf %52, %54 : vector<8x96xf32>
    %56 = vector.extract_strided_slice %55 {offsets = [0, 0], sizes = [8, 64], strides = [1, 1]} : vector<8x96xf32> to vector<8x64xf32>
    %57 = vector.extract_strided_slice %55 {offsets = [0, 64], sizes = [8, 32], strides = [1, 1]} : vector<8x96xf32> to vector<8x32xf32>
    %c0_18 = arith.constant 0 : index
    %c0_19 = arith.constant 0 : index
    %c0_20 = arith.constant 0 : index
    %58 = vector.load %arg14[%c0_18, %c0_19, %c0_20] : memref<8x16x64xf32, #tpu.memory_space<vmem>>, vector<8x16x64xf32>
    %59 = vector.shape_cast %56 : vector<8x64xf32> to vector<8x1x64xf32>
    %60 = vector.broadcast %59 : vector<8x1x64xf32> to vector<8x16x64xf32>
    %61 = arith.addf %58, %60 : vector<8x16x64xf32>
    %62 = math.tanh %61 : vector<8x16x64xf32>
    %c3 = arith.constant 3 : index
    %c0_21 = arith.constant 0 : index
    %63 = vector.load %arg10[%c3, %c0_21] : memref<8x128xf32, #tpu.memory_space<vmem>>, vector<1x64xf32>
    %64 = vector.shape_cast %63 : vector<1x64xf32> to vector<1x1x64xf32>
    %65 = vector.broadcast %64 : vector<1x1x64xf32> to vector<8x16x64xf32>
    %66 = arith.mulf %62, %65 : vector<8x16x64xf32>
    %cst_22 = arith.constant dense<0.000000e+00> : vector<8x16xf32>
    %67 = vector.multi_reduction <add>, %66, %cst_22 [2] : vector<8x16x64xf32> to vector<8x16xf32>
    %cst_23 = arith.constant dense<0xFF800000> : vector<8xf32>
    %68 = vector.multi_reduction <maximumf>, %67, %cst_23 [1] : vector<8x16xf32> to vector<8xf32>
    %69 = vector.shape_cast %68 : vector<8xf32> to vector<8x1xf32>
    %70 = vector.broadcast %69 : vector<8x1xf32> to vector<8x16xf32>
    %71 = arith.subf %67, %70 : vector<8x16xf32>
    %72 = math.exp %71 : vector<8x16xf32>
    %cst_24 = arith.constant dense<0.000000e+00> : vector<8xf32>
    %73 = vector.multi_reduction <add>, %72, %cst_24 [1] : vector<8x16xf32> to vector<8xf32>
    %74 = vector.shape_cast %73 : vector<8xf32> to vector<8x1xf32>
    %75 = tpu.reciprocal %74 {approx = true} : vector<8x1xf32> -> vector<8x1xf32>
    %76 = vector.broadcast %75 : vector<8x1xf32> to vector<8x16xf32>
    %77 = arith.mulf %72, %76 : vector<8x16xf32>
    %c0_25 = arith.constant 0 : index
    %c0_26 = arith.constant 0 : index
    %78 = vector.load %arg4[%c0_25, %c0_26] : memref<8x16xf32, #tpu.memory_space<vmem>>, vector<8x16xf32>
    %79 = arith.mulf %77, %78 : vector<8x16xf32>
    %cst_27 = arith.constant dense<0.000000e+00> : vector<8xf32>
    %80 = vector.multi_reduction <add>, %79, %cst_27 [1] : vector<8x16xf32> to vector<8xf32>
    %81 = vector.shape_cast %80 : vector<8xf32> to vector<8x1xf32>
    %cst_28 = arith.constant 1.000000e-30 : f32
    %82 = vector.broadcast %cst_28 : f32 to vector<8x1xf32>
    %83 = arith.maximumf %81, %82 : vector<8x1xf32>
    %84 = tpu.reciprocal %83 {approx = true} : vector<8x1xf32> -> vector<8x1xf32>
    %85 = vector.broadcast %84 : vector<8x1xf32> to vector<8x16xf32>
    %86 = arith.mulf %79, %85 : vector<8x16xf32>
    %87 = vector.shape_cast %86 : vector<8x16xf32> to vector<8x16x1xf32>
    %c0_29 = arith.constant 0 : index
    %c0_30 = arith.constant 0 : index
    %c0_31 = arith.constant 0 : index
    %88 = vector.load %arg3[%c0_29, %c0_30, %c0_31] : memref<8x16x32xf32, #tpu.memory_space<vmem>>, vector<8x16x32xf32>
    %89 = vector.broadcast %87 : vector<8x16x1xf32> to vector<8x16x32xf32>
    %90 = arith.mulf %89, %88 : vector<8x16x32xf32>
    %cst_32 = arith.constant dense<0.000000e+00> : vector<8x32xf32>
    %91 = vector.multi_reduction <add>, %90, %cst_32 [1] : vector<8x16x32xf32> to vector<8x32xf32>
    %c0_33 = arith.constant 0 : index
    %c0_34 = arith.constant 0 : index
    %c0_35 = arith.constant 0 : index
    %92 = vector.load %arg12[%c0_33, %c0_34, %c0_35] : memref<8x8x32xf32, #tpu.memory_space<vmem>>, vector<8x8x32xf32>
    %93 = vector.shape_cast %92 : vector<8x8x32xf32> to vector<64x32xf32>
    %c256 = arith.constant 256 : index
    %c0_36 = arith.constant 0 : index
    %94 = vector.load %arg9[%c256, %c0_36] : memref<448x128xbf16, #tpu.memory_space<vmem>>, vector<32x32xbf16>
    %95 = arith.truncf %93 : vector<64x32xf32> to vector<64x32xbf16>
    %cst_37 = arith.constant dense<0.000000e+00> : vector<64x32xf32>
    %96 = tpu.matmul %95, %94, %cst_37 {dimension_numbers = #tpu.dot_dimension_numbers<[1], [0], [0], [1], [0, 0, 1, 1], [], []>} : vector<64x32xbf16>, vector<32x32xbf16>, vector<64x32xf32> -> vector<64x32xf32>
    %97 = vector.shape_cast %96 : vector<64x32xf32> to vector<8x8x32xf32>
    %98 = vector.shape_cast %57 : vector<8x32xf32> to vector<1x8x32xf32>
    %99 = vector.broadcast %98 : vector<1x8x32xf32> to vector<8x8x32xf32>
    %100 = arith.addf %97, %99 : vector<8x8x32xf32>
    %101 = math.tanh %100 : vector<8x8x32xf32>
    %c4 = arith.constant 4 : index
    %c0_38 = arith.constant 0 : index
    %102 = vector.load %arg10[%c4, %c0_38] : memref<8x128xf32, #tpu.memory_space<vmem>>, vector<1x32xf32>
    %103 = vector.shape_cast %102 : vector<1x32xf32> to vector<1x1x32xf32>
    %104 = vector.broadcast %103 : vector<1x1x32xf32> to vector<8x8x32xf32>
    %105 = arith.mulf %101, %104 : vector<8x8x32xf32>
    %cst_39 = arith.constant dense<0.000000e+00> : vector<8x8xf32>
    %106 = vector.multi_reduction <add>, %105, %cst_39 [2] : vector<8x8x32xf32> to vector<8x8xf32>
    %c4_i32 = arith.constant 4 : i32
    %107 = arith.addi %c4_i32, %arg0 : i32
    %108 = tpu.iota {dimensions = array<i32: 0>} : vector<8x8xi32>
    %109 = vector.broadcast %107 : i32 to vector<8x8xi32>
    %110 = arith.cmpi slt, %108, %109 : vector<8x8xi32>
    %cst_40 = arith.constant -1.000000e+30 : f32
    %111 = vector.broadcast %cst_40 : f32 to vector<8x8xf32>
    %112 = arith.select %110, %106, %111 : vector<8x8xi1>, vector<8x8xf32>
    %cst_41 = arith.constant dense<0xFF800000> : vector<8xf32>
    %113 = vector.multi_reduction <maximumf>, %112, %cst_41 [0] : vector<8x8xf32> to vector<8xf32>
    %114 = vector.shape_cast %113 : vector<8xf32> to vector<1x8xf32>
    %115 = vector.broadcast %114 : vector<1x8xf32> to vector<8x8xf32>
    %116 = arith.subf %112, %115 : vector<8x8xf32>
    %117 = math.exp %116 : vector<8x8xf32>
    %cst_42 = arith.constant dense<0.000000e+00> : vector<8xf32>
    %118 = vector.multi_reduction <add>, %117, %cst_42 [0] : vector<8x8xf32> to vector<8xf32>
    %119 = vector.shape_cast %118 : vector<8xf32> to vector<1x8xf32>
    %120 = tpu.reciprocal %119 {approx = true} : vector<1x8xf32> -> vector<1x8xf32>
    %121 = vector.broadcast %120 : vector<1x8xf32> to vector<8x8xf32>
    %122 = arith.mulf %117, %121 : vector<8x8xf32>
    %123 = vector.shape_cast %122 : vector<8x8xf32> to vector<8x8x1xf32>
    %124 = vector.broadcast %123 : vector<8x8x1xf32> to vector<8x8x32xf32>
    %125 = arith.mulf %124, %92 : vector<8x8x32xf32>
    %cst_43 = arith.constant dense<0.000000e+00> : vector<8x32xf32>
    %126 = vector.multi_reduction <add>, %125, %cst_43 [0] : vector<8x8x32xf32> to vector<8x32xf32>
    %127 = tpu.concatenate %48, %91, %126, %46, %16 in 1 : vector<8x32xf32>, vector<8x32xf32>, vector<8x32xf32>, vector<8x32xf32>, vector<8x32xf32> -> vector<8x160xf32>
    %c288 = arith.constant 288 : index
    %c0_44 = arith.constant 0 : index
    %128 = vector.load %arg9[%c288, %c0_44] : memref<448x128xbf16, #tpu.memory_space<vmem>>, vector<160x65xbf16>
    %129 = arith.truncf %127 : vector<8x160xf32> to vector<8x160xbf16>
    %cst_45 = arith.constant dense<0.000000e+00> : vector<8x65xf32>
    %130 = tpu.matmul %129, %128, %cst_45 {dimension_numbers = #tpu.dot_dimension_numbers<[1], [0], [0], [1], [0, 0, 1, 1], [], []>} : vector<8x160xbf16>, vector<160x65xbf16>, vector<8x65xf32> -> vector<8x65xf32>
    %c5 = arith.constant 5 : index
    %c0_46 = arith.constant 0 : index
    %131 = vector.load %arg10[%c5, %c0_46] : memref<8x128xf32, #tpu.memory_space<vmem>>, vector<1x65xf32>
    %132 = vector.broadcast %131 : vector<1x65xf32> to vector<8x65xf32>
    %133 = arith.addf %130, %132 : vector<8x65xf32>
    %134 = vector.extract_strided_slice %133 {offsets = [0, 64], sizes = [8, 1], strides = [1, 1]} : vector<8x65xf32> to vector<8x1xf32>
    %135 = arith.negf %134 : vector<8x1xf32>
    %136 = math.exp %135 : vector<8x1xf32>
    %cst_47 = arith.constant 1.000000e+00 : f32
    %137 = vector.broadcast %cst_47 : f32 to vector<8x1xf32>
    %138 = arith.addf %137, %136 : vector<8x1xf32>
    %139 = arith.divf %137, %138 : vector<8x1xf32>
    %140 = vector.extract_strided_slice %133 {offsets = [0, 0], sizes = [8, 64], strides = [1, 1]} : vector<8x65xf32> to vector<8x64xf32>
    %cst_48 = arith.constant dense<0xFF800000> : vector<8xf32>
    %141 = vector.multi_reduction <maximumf>, %140, %cst_48 [1] : vector<8x64xf32> to vector<8xf32>
    %142 = vector.shape_cast %141 : vector<8xf32> to vector<8x1xf32>
    %143 = vector.broadcast %142 : vector<8x1xf32> to vector<8x64xf32>
    %144 = arith.subf %140, %143 : vector<8x64xf32>
    %145 = math.exp %144 : vector<8x64xf32>
    %cst_49 = arith.constant dense<0.000000e+00> : vector<8xf32>
    %146 = vector.multi_reduction <add>, %145, %cst_49 [1] : vector<8x64xf32> to vector<8xf32>
    %147 = vector.shape_cast %146 : vector<8xf32> to vector<8x1xf32>
    %148 = tpu.reciprocal %147 {approx = true} : vector<8x1xf32> -> vector<8x1xf32>
    %149 = vector.broadcast %148 : vector<8x1xf32> to vector<8x64xf32>
    %150 = arith.mulf %145, %149 : vector<8x64xf32>
    %151 = vector.broadcast %139 : vector<8x1xf32> to vector<8x64xf32>
    %152 = arith.mulf %151, %150 : vector<8x64xf32>
    %cst_50 = arith.constant 1.000000e+00 : f32
    %153 = vector.broadcast %cst_50 : f32 to vector<8x1xf32>
    %154 = arith.subf %153, %139 : vector<8x1xf32>
    %155 = vector.broadcast %154 : vector<8x1xf32> to vector<8x16xf32>
    %156 = arith.mulf %155, %86 : vector<8x16xf32>
    %157 = vector.shape_cast %156 : vector<8x16xf32> to vector<8x16x1xf32>
    %c0_51 = arith.constant 0 : index
    %c0_52 = arith.constant 0 : index
    %c0_53 = arith.constant 0 : index
    %158 = vector.load %arg15[%c0_51, %c0_52, %c0_53] : memref<8x16x72xf32, #tpu.memory_space<vmem>>, vector<8x16x72xf32>
    %159 = vector.broadcast %157 : vector<8x16x1xf32> to vector<8x16x72xf32>
    %160 = arith.mulf %159, %158 : vector<8x16x72xf32>
    %cst_54 = arith.constant dense<0.000000e+00> : vector<8x72xf32>
    %161 = vector.multi_reduction <add>, %160, %cst_54 [1] : vector<8x16x72xf32> to vector<8x72xf32>
    %cst_55 = arith.constant 0.000000e+00 : f32
    %162 = vector.broadcast %cst_55 : f32 to vector<8x8xf32>
    %163 = tpu.concatenate %152, %162 in 1 : vector<8x64xf32>, vector<8x8xf32> -> vector<8x72xf32>
    %164 = arith.addf %163, %161 : vector<8x72xf32>
    %cst_56 = arith.constant 0.000000e+00 : f32
    %165 = vector.broadcast %cst_56 : f32 to vector<8x88xf32>
    %166 = tpu.concatenate %164, %48, %46, %91, %165 in 1 : vector<8x72xf32>, vector<8x32xf32>, vector<8x32xf32>, vector<8x32xf32>, vector<8x88xf32> -> vector<8x256xf32>
    %c0_57 = arith.constant 0 : index
    %c0_58 = arith.constant 0 : index
    %c0_59 = arith.constant 0 : index
    %167 = vector.load %arg11[%c0_57, %c0_58, %c0_59] : memref<1x8x256xf32, #tpu.memory_space<vmem>>, vector<1x8x256xf32>
    %168 = vector.shape_cast %167 : vector<1x8x256xf32> to vector<8x256xf32>
    %169 = vector.shape_cast %166 : vector<8x256xf32> to vector<1x8x256xf32>
    tpu.vector_store %arg11[%c0_57, %c0_58, %c0_59], %169 {strides = array<i32>} : memref<1x8x256xf32, #tpu.memory_space<vmem>>, vector<1x8x256xf32>,
    %170 = tpu.concatenate %48, %46, %91, %7 in 1 : vector<8x32xf32>, vector<8x32xf32>, vector<8x32xf32>, vector<8x32xf32> -> vector<8x128xf32>
    %c0_60 = arith.constant 0 : index
    %c0_61 = arith.constant 0 : index
    %171 = vector.load %arg13[%c0_60, %c0_61] : memref<8x128xf32, #tpu.memory_space<vmem>>, vector<8x128xf32>
    tpu.vector_store %arg13[%c0_60, %c0_61], %170 {strides = array<i32>} : memref<8x128xf32, #tpu.memory_space<vmem>>, vector<8x128xf32>,
    %172 = arith.index_cast %107 : i32 to index
    %c0_62 = arith.constant 0 : index
    %c0_63 = arith.constant 0 : index
    %173 = vector.load %arg12[%172, %c0_62, %c0_63] : memref<8x8x32xf32, #tpu.memory_space<vmem>>, vector<1x8x32xf32>
    %174 = vector.shape_cast %173 : vector<1x8x32xf32> to vector<8x32xf32>
    %175 = vector.shape_cast %48 : vector<8x32xf32> to vector<1x8x32xf32>
    tpu.vector_store %arg12[%172, %c0_62, %c0_63], %175 {strides = array<i32>} : memref<8x8x32xf32, #tpu.memory_space<vmem>>, vector<1x8x32xf32>,
    return
  }
  func.func @transform_0(%arg0: i32) -> (i32, i32, i32) {
    %c0_i32 = arith.constant 0 : i32
    %c0_i32_0 = arith.constant 0 : i32
    %c0_i32_1 = arith.constant 0 : i32
    return %arg0, %c0_i32, %c0_i32_0 : i32, i32, i32
  }
  func.func @transform_1(%arg0: i32) -> (i32, i32) {
    %c0_i32 = arith.constant 0 : i32
    %c0_i32_0 = arith.constant 0 : i32
    %c0_i32_1 = arith.constant 0 : i32
    return %c0_i32, %c0_i32_0 : i32, i32
  }
  func.func @transform_2(%arg0: i32) -> (i32, i32, i32) {
    %c0_i32 = arith.constant 0 : i32
    %c0_i32_0 = arith.constant 0 : i32
    %c0_i32_1 = arith.constant 0 : i32
    %c0_i32_2 = arith.constant 0 : i32
    return %c0_i32, %c0_i32_0, %c0_i32_1 : i32, i32, i32
  }
  func.func @transform_3(%arg0: i32) -> (i32, i32) {
    %c0_i32 = arith.constant 0 : i32
    %c0_i32_0 = arith.constant 0 : i32
    %c0_i32_1 = arith.constant 0 : i32
    return %c0_i32, %c0_i32_0 : i32, i32
  }
  func.func @transform_4(%arg0: i32) -> (i32, i32) {
    %c0_i32 = arith.constant 0 : i32
    %c0_i32_0 = arith.constant 0 : i32
    %c0_i32_1 = arith.constant 0 : i32
    return %c0_i32, %c0_i32_0 : i32, i32
  }
  func.func @transform_5(%arg0: i32) -> (i32, i32, i32) {
    %c0_i32 = arith.constant 0 : i32
    %c0_i32_0 = arith.constant 0 : i32
    %c0_i32_1 = arith.constant 0 : i32
    %c0_i32_2 = arith.constant 0 : i32
    return %c0_i32, %c0_i32_0, %c0_i32_1 : i32, i32, i32
  }
  func.func @transform_6(%arg0: i32) -> (i32, i32, i32) {
    %c0_i32 = arith.constant 0 : i32
    %c0_i32_0 = arith.constant 0 : i32
    %c0_i32_1 = arith.constant 0 : i32
    %c0_i32_2 = arith.constant 0 : i32
    return %c0_i32, %c0_i32_0, %c0_i32_1 : i32, i32, i32
  }
  func.func @transform_7(%arg0: i32) -> (i32, i32) {
    %c0_i32 = arith.constant 0 : i32
    %c0_i32_0 = arith.constant 0 : i32
    %c0_i32_1 = arith.constant 0 : i32
    return %c0_i32, %c0_i32_0 : i32, i32
  }
  func.func @transform_8(%arg0: i32) -> (i32, i32) {
    %c0_i32 = arith.constant 0 : i32
    %c0_i32_0 = arith.constant 0 : i32
    %c0_i32_1 = arith.constant 0 : i32
    return %c0_i32, %c0_i32_0 : i32, i32
  }
  func.func @transform_9(%arg0: i32) -> (i32, i32) {
    %c0_i32 = arith.constant 0 : i32
    %c0_i32_0 = arith.constant 0 : i32
    %c0_i32_1 = arith.constant 0 : i32
    return %c0_i32, %c0_i32_0 : i32, i32
  }
  func.func @transform_10(%arg0: i32) -> (i32, i32, i32) {
    %c0_i32 = arith.constant 0 : i32
    %c0_i32_0 = arith.constant 0 : i32
    %c0_i32_1 = arith.constant 0 : i32
    return %arg0, %c0_i32, %c0_i32_0 : i32, i32, i32
  }
  func.func @transform_11(%arg0: i32) -> (i32, i32, i32) {
    %c0_i32 = arith.constant 0 : i32
    %c0_i32_0 = arith.constant 0 : i32
    %c0_i32_1 = arith.constant 0 : i32
    %c0_i32_2 = arith.constant 0 : i32
    return %c0_i32, %c0_i32_0, %c0_i32_1 : i32, i32, i32
  }
}

</mosaic_0001>

<bundles_post_ra>
// kernel: decoder_decode.1
= control target key start
LH: loop header
LB: loop body
LE: loop exit
PB: predicated region body
PF: predicated region fallthrough
CT: control target
= control target key end

     0   :  { %17 = vsyncpa [#allocation6], 0  ;;  %s4796_s0 = inlined_call_operand.vmem [shape: f32[4,8,32], index: 0, kind: input, shape index: {}]   ;;  %s4797_s1 = inlined_call_operand.vmem [shape: f32[8,96], index: 1, kind: input, shape index: {}]   ;;  %s4798_s2 = inlined_call_operand.hbm [shape: f32[8,16,32], index: 2, kind: input, shape index: {}]   ;;  %s4799_s3 = inlined_call_operand.vmem [shape: f32[8,16], index: 3, kind: input, shape index: {}]   ;;  %s4800_s4 = inlined_call_operand.vmem [shape: s32[8,16], index: 4, kind: input, shape index: {}]   ;;  %s4801_s5 = inlined_call_operand.vmem [shape: f32[4,8,32], index: 5, kind: input, shape index: {}]   ;;  %s4802_s6 = inlined_call_operand.vmem [shape: f32[8,4,32], index: 6, kind: input, shape index: {}]   ;;  %s4803_s7 = inlined_call_operand.vmem [shape: f32[8,4], index: 7, kind: input, shape index: {}]   ;;  %s4804_s8 = inlined_call_operand.hbm [shape: bf16[448,128], index: 8, kind: input, shape index: {}]   ;;  %s4805_s9 = inlined_call_operand.vmem [shape: f32[8,128], index: 9, kind: input, shape index: {}]   ;;  %s4806_s10 = inlined_call_operand.vmem [shape: f32[4,8,256], index: 10, kind: output, shape index: {0}]   ;;  %s4807_s11 = inlined_call_operand.vmem [shape: f32[8,8,32], index: 11, kind: output, shape index: {1}]  }
   0x1   :  { %18 = vsyncpa [#allocation8], 0  ;;  %s3790_s17 = smov 0  }
   0x2 LB: > { %s3711_s18 = smov [#allocation5]   ;;  %s3796_s20 = sadd.s32 4294967295, %s3709_s17   ;;  %s3709_s17 = sphi %s3790_s17, %s24_s17  }
   0x3   : > { %s306_s19 = sshll.u32 %s3711_s18, 4  ;;  %p3262_p0 = scmp.ge.s32.totalorder %s3709_s17, 1  ;;  %s307_s19 = int_to_ptr.vmem [resolvable:$true] %s306_s19 }
   0x4   : > { %p291_p1 = scmp.lt.s32.totalorder %s3709_s17, 5  ;;  %p3470_p4 = scmp.eq.s32.totalorder %s3796_s20, 0 }
   0x5   : > { %s3712_s22 = smov [#allocation7]   ;;  %s3654_s25 = scalar_lea.vmem %s307_s19, 2048 }
   0x6   : > { %p3801_p3 = pnand %p3262_p0, %p291_p1  ;;  %s334_s23 = sshll.u32 %s3712_s22, 4  ;;  %s335_s23 = int_to_ptr.vmem [resolvable:$true] %s334_s23 }
   0x7   : > { %p3655_p8 = scmp.ne.s32.totalorder %s307_s19, %s3654_s25  ;;  %p3662_p11 = scmp.lt.s32.totalorder %s307_s19, %s307_s19 }
   0x8   : > { %p3463_p5 = pneg %p3801_p3  ;;  %p3663_p12 = scmp.lt.s32.totalorder %s3654_s25, %s3654_s25 }
   0xa   : > { %p3810_p6 = pnand %p3470_p4, %p3463_p5  ;;  %p3664_p13 = por %p3663_p12, %p3662_p11 }
   0xc   : > { %p3645_p7 = pneg %p3810_p6 }
   0xe   : > { %p3657_p9 = pnand %p3655_p8, %p3645_p7 }
  0x10   : > { %p3658_p10 = pneg %p3657_p9 }
  0x12   : > { %p3665_p0 = pnand %p3664_p13, %p3658_p10 }
  0x14   : > { %3668 = shalt.err (!%p3665_p0)
}
  0x15   : > { %s3713_s26 = smov 128   ;;  %s3714_s27 = smov 8  }
  0x16   : > { %3466 = dma.hbm_to_vmem [thread:$0]  (!%p3810_p6), %s4798_s2, 2048, %s307_s19, [#allocation6], %s3713_s26, %s3713_s26, %s3714_s27  }
  0x17   : > { %s3680_s30 = scalar_lea.vmem %s335_s23, 3584  ;;  %p3688_p9 = scmp.lt.s32.totalorder %s335_s23, %s335_s23 }
  0x18   : > { %p3681_p1 = scmp.ne.s32.totalorder %s335_s23, %s3680_s30  ;;  %p3689_p2 = scmp.lt.s32.totalorder %s3680_s30, %s3680_s30 }
  0x1a   : > { %p3683_p5 = pnand %p3681_p1, %p3645_p7  ;;  %p3690_p11 = por %p3689_p2, %p3688_p9 }
  0x1c   : > { %p3684_p8 = pneg %p3683_p5 }
  0x1e   : > { %p3691_p10 = pnand %p3690_p11, %p3684_p8 }
  0x20   : > { %3694 = shalt.err (!%p3691_p10)
}
  0x21   : > { %s3715_s12 = smov 64   ;;  %s3716_s13 = smov 4  }
  0x22   : > { %3469 = dma.hbm_to_vmem [thread:$0]  (!%p3810_p6), %s4804_s8, 3584, %s335_s23, [#allocation8], %s3715_s12, %s3715_s12, %s3716_s13  }
  0x23   : > { %360 = sbr.rel (%p3801_p3) target bundleno = 3376 (0xd30), region = 60 }
  0x28   : > { %3700 = dma.done.wait (%p3470_p4), [#allocation6], 2048  }
  0x29   : > { %3702 = vsyncadd (%p3470_p4), [#allocation6], 4294965248 }
  0x2a   : > { %3704 = dma.done.wait (%p3470_p4), [#allocation8], 3584  }
  0x2b   : > { %3706 = vsyncadd (%p3470_p4), [#allocation8], 4294963712  ;;  %p403_p2 = scmp.lt.s32.totalorder %s3796_s20, 3  ;;  %p4813_p3 = scmp.ne.s32.totalorder %s3796_s20, 0 }
  0x2c   : > { %s3718_s15 = smov (!%p4813_p3), 96  }
  0x2d   : > { %s404_s16 = scalar_select %p403_p2, %s3796_s20, 3 }
  0x2e   : > { %416 = sbr.rel (%p4813_p3) target bundleno = 320 (0x140), region = 72 }
  0x2f   : > { %s3269_s18 = sshll.u32 %s404_s16, 3  ;;  %s3345_s19 = sshll.u32 %s404_s16, 4 }
  0x30   : > { %s3847_s23 = scalar_lea.vmem %s4796_s0, %s3269_s18  ;;  %s3852_s26 = scalar_lea.vmem %s4806_s10, %s3345_s19 }
  0x33   : > { %v426_v0 = vlaneseq  ;;  %v3501_v1 = vld [vmem:[#allocation7 + $0x48] sm:$0xff]   ;;  %v3502_v3 = vld [vmem:[#allocation7 + $0x40] sm:$0xff]   ;;  %v425_v6 = vld [vmem:[%s4803_s7] sm:$0xff]  ;;  %vm616_vm0 = vcmask 261120   ;;  %v3717_v50 = vmov 0.0   ;;  %vm490_vm1 = vcmask 257024  }
  0x34   : > { %v576_v4 = vld [vmem:[#allocation5] sm:$0xff]  ;;  %v577_v5 = vld [vmem:[#allocation5 + $0x8] sm:$0xff]  ;;  %3379 = vmatprep.subr.bf16.mxu0 %v3501_v1  ;;  %3451 = vmatprep.subr.bf16.mxu1 %v3501_v1  ;;  %v578_v14 = vld [vmem:[#allocation5 + $0x10] sm:$0xff]  ;;  %911 = vst.msk [vmem:[%s4807_s11] sm:$0xff] %vm616_vm0, %v3717_v50  ;;  %vm556_vm2 = vcmask 1041409   ;;  %vm558_vm3 = vcmask 1042434  }
  0x35   : > { %v3857_v2 = vshrl.u32 %v426_v0, 7  ;;  %v596_v7 = vpack.c.bf16 %v577_v5, %v576_v4  ;;  %3380 = vmatpush3.bf16.msra.mxu0 %v3501_v1  ;;  %3453 = vmatpush3.bf16.msra.mxu1 %v3501_v1  ;;  %v584_v12 = vld [vmem:[#allocation5 + $0x40] sm:$0xff]  ;;  %v585_v13 = vld [vmem:[#allocation5 + $0x48] sm:$0xff]  ;;  %v579_v15 = vld [vmem:[#allocation5 + $0x18] sm:$0xff]  ;;  %912 = vst.msk [vmem:[%s4807_s11 + $0x8] sm:$0xff] %vm616_vm0, %v3717_v50  ;;  %vm560_vm4 = vcmask 1043459  }
  0x36   : > { %3381 = vmatprep.subr.bf16.mxu0 %v3502_v3  ;;  %3452 = vmatprep.subr.bf16.mxu1 %v3502_v3  ;;  %v586_v18 = vld [vmem:[#allocation5 + $0x50] sm:$0xff]  ;;  %v587_v19 = vld [vmem:[#allocation5 + $0x58] sm:$0xff]  ;;  %v580_v20 = vld [vmem:[#allocation5 + $0x20] sm:$0xff]  ;;  %v600_v28 = vpack.c.bf16 %v585_v13, %v584_v12  ;;  %v597_v29 = vpack.c.bf16 %v579_v15, %v578_v14  ;;  %913 = vst.msk [vmem:[%s4807_s11 + $0x10] sm:$0xff] %vm616_vm0, %v3717_v50  ;;  %vm894_vm5 = vcmask 588800   ;;  %vm562_vm6 = vcmask 1044484  }
  0x37   : > { %v442_v8 = vsub.s32 2, %v3857_v2  ;;  %v428_v9 = vsub.s32 0, %v3857_v2  ;;  %v449_v10 = vsub.s32 3, %v3857_v2  ;;  %v435_v11 = vsub.s32 1, %v3857_v2  ;;  %3383 = vmatprep.mubr.msk.bf16.mxu0 %vm616_vm0, %v596_v7  ;;  %v581_v22 = vld [vmem:[#allocation5 + $0x28] sm:$0xff]  ;;  %v588_v23 = vld [vmem:[#allocation5 + $0x60] sm:$0xff] }
  0x38   : > { %v463_v21 = vsub.s32 5, %v3857_v2  ;;  %v589_v24 = vld [vmem:[#allocation5 + $0x68] sm:$0xff]  ;;  %v456_v27 = vsub.s32 4, %v3857_v2  ;;  %v601_v30 = vpack.c.bf16 %v587_v19, %v586_v18  ;;  %3391 = vmatprep.mubr.msk.bf16.mxu1 %vm616_vm0, %v600_v28  ;;  %v598_v31 = vpack.c.bf16 %v581_v22, %v580_v20  ;;  %v582_v37 = vld [vmem:[#allocation5 + $0x30] sm:$0xff]  ;;  %v583_v38 = vld [vmem:[#allocation5 + $0x38] sm:$0xff]  ;;  %914 = vst.msk [vmem:[%s4807_s11 + $0x18] sm:$0xff] %vm616_vm0, %v3717_v50 }
  0x39   : > { %v443_v16 = vrot.slane %v425_v6, %v442_v8  ;;  %v429_v17 = vrot.slane %v425_v6, %v428_v9  ;;  %v450_v25 = vrot.slane %v425_v6, %v449_v10  ;;  %v436_v26 = vrot.slane %v425_v6, %v435_v11  ;;  %3382 = vmatpush3.bf16.msra.mxu0 %v3502_v3  ;;  %v590_v39 = vld [vmem:[#allocation5 + $0x70] sm:$0xff]  ;;  %v591_v40 = vld [vmem:[#allocation5 + $0x78] sm:$0xff]  ;;  %v920_v49 = vld [vmem:[%s4801_s5 + $0x8] sm:$0xff] }
  0x3a   : > { %3454 = vmatpush3.bf16.msra.mxu1 %v3502_v3  ;;  %v602_v32 = vpack.c.bf16 %v589_v24, %v588_v23  ;;  %v464_v33 = vrot.slane %v425_v6, %v463_v21  ;;  %v457_v34 = vrot.slane %v425_v6, %v456_v27  ;;  %v477_v35 = vsub.s32 7, %v3857_v2  ;;  %v755_v45 = vld [vmem:[%s4800_s4] sm:$0xff]  ;;  %915 = vst.msk [vmem:[%s4807_s11 + $0x20] sm:$0xff] %vm616_vm0, %v3717_v50  ;;  %v921_v51 = vld [vmem:[%s4801_s5 + $0x10] sm:$0xff]  ;;  %v922_v52 = vld [vmem:[%s4801_s5 + $0x18] sm:$0xff] }
  0x3b   : > { %445 = vbcast.lane.b32.xlu1 %v443_v16, 256  ;;  %431 = vbcast.lane.b32.xlu0 %v429_v17, 256  ;;  %v470_v36 = vsub.s32 6, %v3857_v2  ;;  %v599_v43 = vpack.c.bf16 %v583_v38, %v582_v37  ;;  %v603_v44 = vpack.c.bf16 %v591_v40, %v590_v39  ;;  %v759_v46 = vrot.slane %v755_v45, %v428_v9  ;;  %v919_v48 = vld [vmem:[%s4801_s5] sm:$0xff]  ;;  %v419_v59 = vld [vmem:[%s4802_s6 + $0x8] sm:$0xf] }
  0x3c   : > { %3384 = vmatmul.mubr.msk.bf16.vlgmr.msra.gmra.mxu0 %vm616_vm0, %v597_v29  ;;  %v478_v41 = vrot.slane %v425_v6, %v477_v35  ;;  %v770_v47 = vrot.slane %v755_v45, %v435_v11  ;;  %916 = vst.msk [vmem:[%s4807_s11 + $0x28] sm:$0xff] %vm616_vm0, %v3717_v50  ;;  %917 = vst.msk [vmem:[%s4807_s11 + $0x30] sm:$0xff] %vm616_vm0, %v3717_v50  ;;  %v781_v53 = vrot.slane %v755_v45, %v442_v8  ;;  %v417_v60 = vld [vmem:[%s4802_s6] sm:$0xf]  ;;  %v420_v2 = vld [vmem:[%s4802_s6 + $0xc] sm:$0xf] }
  0x3d   : > { %3392 = vmatmul.mubr.msk.bf16.vlgmr.msra.gmra.mxu1 %vm616_vm0, %v601_v30  ;;  %3387 = vmatprep.mubr.msk.bf16.mxu0 %vm616_vm0, %v598_v31  ;;  %v471_v42 = vrot.slane %v425_v6, %v470_v36  ;;  %918 = vst.msk [vmem:[%s4807_s11 + $0x38] sm:$0xff] %vm616_vm0, %v3717_v50  ;;  %923 = vst.msk [vmem:[%s4807_s11] sm:$0xff] %vm616_vm0, %v919_v48  ;;  %v792_v54 = vrot.slane %v755_v45, %v449_v10  ;;  %v418_v3 = vld [vmem:[%s4802_s6 + $0x4] sm:$0xf]  ;;  %v422_v14 = vld [vmem:[%s4802_s6 + $0x14] sm:$0xf] }
  0x3e   : > { %3395 = vmatprep.mubr.msk.bf16.mxu1 %vm616_vm0, %v602_v32  ;;  %924 = vst.msk [vmem:[%s4807_s11 + $0x8] sm:$0xff] %vm616_vm0, %v920_v49  ;;  %925 = vst.msk [vmem:[%s4807_s11 + $0x10] sm:$0xff] %vm616_vm0, %v921_v51  ;;  %v803_v55 = vrot.slane %v755_v45, %v456_v27  ;;  %v814_v56 = vrot.slane %v755_v45, %v463_v21  ;;  %v825_v57 = vrot.slane %v755_v45, %v470_v36  ;;  %v421_v15 = vld [vmem:[%s4802_s6 + $0x10] sm:$0xf]  ;;  %v424_v31 = vld [vmem:[%s4802_s6 + $0x1c] sm:$0xf] }
  0x3f   : > { %452 = vbcast.lane.b32.xlu1 %v450_v25, 256  ;;  %438 = vbcast.lane.b32.xlu0 %v436_v26, 256  ;;  %926 = vst.msk [vmem:[%s4807_s11 + $0x18] sm:$0xff] %vm616_vm0, %v922_v52  ;;  %v836_v58 = vrot.slane %v755_v45, %v477_v35  ;;  %v3988_v24 = vand.u32 127, %v426_v0  ;;  %v423_v32 = vld [vmem:[%s4802_s6 + $0x18] sm:$0xf] }
  0x40   : > { %vm564_vm11 = vcmask 1045509   ;;  %vm566_vm12 = vcmask 1046534   ;;  %vm568_vm15 = vcmask 1047559  }
  0x43   : > { %466 = vbcast.lane.b32.xlu1 %v464_v33, 256  ;;  %459 = vbcast.lane.b32.xlu0 %v457_v34, 256 }
  0x44   : > { %3388 = vmatmul.mubr.msk.bf16.gmra.mxu0 %vm616_vm0, %v599_v43 }
  0x45   : > { %3396 = vmatmul.mubr.msk.bf16.gmra.mxu1 %vm616_vm0, %v603_v44 }
  0x47   : > { %480 = vbcast.lane.b32.xlu1 %v478_v41, 256  ;;  %473 = vbcast.lane.b32.xlu0 %v471_v42, 256 }
  0x4b   : > { %761 = vbcast.lane.b32.xlu0 %v759_v46, 256  ;;  %765 = vbcast.lane.b32.xlu1 %v759_v46, 264 }
  0x4f   : > { %772 = vbcast.lane.b32.xlu0 %v770_v47, 256  ;;  %776 = vbcast.lane.b32.xlu1 %v770_v47, 264 }
  0x53   : > { %783 = vbcast.lane.b32.xlu0 %v781_v53, 256  ;;  %787 = vbcast.lane.b32.xlu1 %v781_v53, 264 }
  0x57   : > { %794 = vbcast.lane.b32.xlu0 %v792_v54, 256  ;;  %798 = vbcast.lane.b32.xlu1 %v792_v54, 264 }
  0x5b   : > { %805 = vbcast.lane.b32.xlu0 %v803_v55, 256  ;;  %809 = vbcast.lane.b32.xlu1 %v803_v55, 264 }
  0x5f   : > { %816 = vbcast.lane.b32.xlu0 %v814_v56, 256  ;;  %820 = vbcast.lane.b32.xlu1 %v814_v56, 264 }
  0x63   : > { %827 = vbcast.lane.b32.xlu0 %v825_v57, 256  ;;  %831 = vbcast.lane.b32.xlu1 %v825_v57, 264 }
  0x67   : > { %838 = vbcast.lane.b32.xlu0 %v836_v58, 256  ;;  %842 = vbcast.lane.b32.xlu1 %v836_v58, 264 }
  0xad   : > { %v446_v61 = vpop.permute.xlu1 %445  ;;  %v432_v62 = vpop.permute.xlu0 %431 }
  0xae   : > { %v484_v63 = vmul.f32 %v446_v61, %v419_v59  ;;  %v482_v1 = vmul.f32 %v432_v62, %v417_v60 }
  0xb0   : > { %v505_v4 = vsel %vm490_vm1, %v484_v63, 0.0  ;;  %v491_v5 = vsel %vm490_vm1, %v482_v1, 0.0 }
  0xb1   : > { %v506_v6 = vrot.slane %v505_v4, 4  ;;  %v492_v7 = vrot.slane %v491_v5, 4  ;;  %v453_v8 = vpop.permute.xlu1 %452  ;;  %v439_v9 = vpop.permute.xlu0 %438 }
  0xb2   : > { %v485_v10 = vmul.f32 %v453_v8, %v420_v2  ;;  %v483_v11 = vmul.f32 %v439_v9, %v418_v3 }
  0xb3   : > { %v507_v12 = vadd.f32 %v506_v6, %v505_v4  ;;  %v493_v13 = vadd.f32 %v492_v7, %v491_v5 }
  0xb4   : > { %v512_v16 = vsel %vm490_vm1, %v485_v10, 0.0  ;;  %v498_v17 = vsel %vm490_vm1, %v483_v11, 0.0 }
  0xb5   : > { %v508_v18 = vrot.slane %v507_v12, 2  ;;  %v494_v19 = vrot.slane %v493_v13, 2  ;;  %v513_v20 = vrot.slane %v512_v16, 4  ;;  %v499_v21 = vrot.slane %v498_v17, 4  ;;  %v467_v22 = vpop.permute.xlu1 %466  ;;  %v460_v23 = vpop.permute.xlu0 %459 }
  0xb6   : > { %v487_v25 = vmul.f32 %v467_v22, %v422_v14  ;;  %v486_v26 = vmul.f32 %v460_v23, %v421_v15 }
  0xb7   : > { %v509_v27 = vadd.f32 %v508_v18, %v507_v12  ;;  %v495_v28 = vadd.f32 %v494_v19, %v493_v13  ;;  %v514_v29 = vadd.f32 %v513_v20, %v512_v16  ;;  %v500_v30 = vadd.f32 %v499_v21, %v498_v17 }
  0xb8   : > { %v526_v33 = vsel %vm490_vm1, %v487_v25, 0.0  ;;  %v519_v0 = vsel %vm490_vm1, %v486_v26, 0.0 }
  0xb9   : > { %v510_v34 = vrot.slane %v509_v27, 1  ;;  %v515_v35 = vrot.slane %v514_v29, 2  ;;  %v501_v36 = vrot.slane %v500_v30, 2  ;;  %v481_v37 = vpop.permute.xlu1 %480  ;;  %v474_v38 = vpop.permute.xlu0 %473  ;;  %v527_v39 = vrot.slane %v526_v33, 4 }
  0xba   : > { %v520_v40 = vrot.slane %v519_v0, 4  ;;  %v489_v41 = vmul.f32 %v481_v37, %v424_v31  ;;  %v488_v42 = vmul.f32 %v474_v38, %v423_v32  ;;  %v496_v44 = vrot.slane %v495_v28, 1 }
  0xbb   : > { %v511_v43 = vadd.f32 %v510_v34, %v509_v27  ;;  %v516_v45 = vadd.f32 %v515_v35, %v514_v29  ;;  %v502_v46 = vadd.f32 %v501_v36, %v500_v30  ;;  %v528_v47 = vadd.f32 %v527_v39, %v526_v33 }
  0xbc   : > { %v521_v48 = vadd.f32 %v520_v40, %v519_v0  ;;  %v540_v49 = vsel %vm490_vm1, %v489_v41, 0.0  ;;  %v533_v51 = vsel %vm490_vm1, %v488_v42, 0.0  ;;  %v497_v60 = vadd.f32 %v496_v44, %v495_v28 }
  0xbd   : > { %v517_v52 = vrot.slane %v516_v45, 1  ;;  %v503_v53 = vrot.slane %v502_v46, 1  ;;  %v541_v54 = vrot.slane %v540_v49, 4  ;;  %v534_v55 = vrot.slane %v533_v51, 4  ;;  %v762_v56 = vpop.permute.xlu0 %761  ;;  %v766_v57 = vpop.permute.xlu1 %765 }
  0xbe   : > { %v529_v58 = vrot.slane %v528_v47, 2  ;;  %v522_v59 = vrot.slane %v521_v48, 2  ;;  %vm846_vm7 = vcmp.eq.s32.totalorder %v762_v56, %v3988_v24  ;;  %vm847_vm8 = vcmp.eq.s32.totalorder %v766_v57, %v3988_v24 }
  0xbf   : > { %v504_v61 = vadd.f32 %v503_v53, %v502_v46  ;;  %v542_v62 = vadd.f32 %v541_v54, %v540_v49  ;;  %v535_v63 = vadd.f32 %v534_v55, %v533_v51  ;;  %v3283_v3 = vsel %vm846_vm7, 1.0, %v3717_v50 }
  0xc0   : > { %v530_v1 = vadd.f32 %v529_v58, %v528_v47  ;;  %v523_v2 = vadd.f32 %v522_v59, %v521_v48  ;;  %v3284_v4 = vsel %vm847_vm8, 1.0, %v3717_v50  ;;  %v518_v5 = vadd.f32 %v517_v52, %v516_v45  ;;  %895 = vst.msk [vmem:[#allocation4] sm:$0xff] %vm894_vm5, %v3283_v3 }
  0xc1   : > { %v557_v6 = vsel %vm556_vm2, %v504_v61, %v497_v60  ;;  %v543_v7 = vrot.slane %v542_v62, 2  ;;  %v536_v8 = vrot.slane %v535_v63, 2  ;;  %896 = vst.msk [vmem:[#allocation4 + $0x8] sm:$0xff] %vm894_vm5, %v3284_v4  ;;  %v773_v9 = vpop.permute.xlu0 %772  ;;  %v777_v10 = vpop.permute.xlu1 %776 }
  0xc2   : > { %v531_v11 = vrot.slane %v530_v1, 1  ;;  %v524_v12 = vrot.slane %v523_v2, 1  ;;  %v559_v13 = vsel %vm558_vm3, %v511_v43, %v557_v6  ;;  %vm848_vm9 = vcmp.eq.s32.totalorder %v773_v9, %v3988_v24 }
  0xc3   : > { %v544_v14 = vadd.f32 %v543_v7, %v542_v62  ;;  %v537_v15 = vadd.f32 %v536_v8, %v535_v63  ;;  %v561_v16 = vsel %vm560_vm4, %v518_v5, %v559_v13  ;;  %v3285_v17 = vsel %vm848_vm9, 1.0, %v3717_v50  ;;  %v547_v5 = vld [vmem:[%s4797_s1] sm:$0xff] }
  0xc4   : > { %v532_v18 = vadd.f32 %v531_v11, %v530_v1  ;;  %v525_v19 = vadd.f32 %v524_v12, %v523_v2  ;;  %897 = vst.msk [vmem:[#allocation4 + $0x10] sm:$0xff] %vm894_vm5, %v3285_v17  ;;  %vm849_vm10 = vcmp.eq.s32.totalorder %v777_v10, %v3988_v24 }
  0xc5   : > { %v545_v20 = vrot.slane %v544_v14, 1  ;;  %v538_v21 = vrot.slane %v537_v15, 1  ;;  %v3286_v22 = vsel %vm849_vm10, 1.0, %v3717_v50  ;;  %v784_v23 = vpop.permute.xlu0 %783  ;;  %v788_v25 = vpop.permute.xlu1 %787 }
  0xc6   : > { %v563_v26 = vsel %vm562_vm6, %v525_v19, %v561_v16  ;;  %898 = vst.msk [vmem:[#allocation4 + $0x18] sm:$0xff] %vm894_vm5, %v3286_v22  ;;  %vm850_vm13 = vcmp.eq.s32.totalorder %v784_v23, %v3988_v24  ;;  %vm851_vm14 = vcmp.eq.s32.totalorder %v788_v25, %v3988_v24 }
  0xc7   : > { %v539_v27 = vadd.f32 %v538_v21, %v537_v15  ;;  %v546_v28 = vadd.f32 %v545_v20, %v544_v14  ;;  %v3287_v29 = vsel %vm850_vm13, 1.0, %v3717_v50  ;;  %v565_v30 = vsel %vm564_vm11, %v532_v18, %v563_v26 }
  0xc8   : > { %899 = vst.msk [vmem:[#allocation4 + $0x20] sm:$0xff] %vm894_vm5, %v3287_v29  ;;  %v3288_v31 = vsel %vm851_vm14, 1.0, %v3717_v50  ;;  %vm738_vm11 = vcmask 523264  }
  0xc9   : > { %v567_v32 = vsel %vm566_vm12, %v539_v27, %v565_v30  ;;  %900 = vst.msk [vmem:[#allocation4 + $0x28] sm:$0xff] %vm894_vm5, %v3288_v31  ;;  %v795_v33 = vpop.permute.xlu0 %794  ;;  %v799_v0 = vpop.permute.xlu1 %798 }
  0xca   : > { %v569_v34 = vsel %vm568_vm15, %v546_v28, %v567_v32  ;;  %vm852_vm0 = vcmp.eq.s32.totalorder %v795_v33, %v3988_v24  ;;  %vm853_vm1 = vcmp.eq.s32.totalorder %v799_v0, %v3988_v24 }
  0xcb   : > { %570 = vrot.lane.b32.xlu0 %v569_v34, %s3718_s15  ;;  %v3289_v35 = vsel %vm852_vm0, 1.0, %v3717_v50  ;;  %v3290_v36 = vsel %vm853_vm1, 1.0, %v3717_v50 }
  0xcc   : > { %901 = vst.msk [vmem:[#allocation4 + $0x30] sm:$0xff] %vm894_vm5, %v3289_v35  ;;  %902 = vst.msk [vmem:[#allocation4 + $0x38] sm:$0xff] %vm894_vm5, %v3290_v36 }
  0xcd   : > { %v806_v37 = vpop.permute.xlu0 %805  ;;  %v810_v38 = vpop.permute.xlu1 %809 }
  0xce   : > { %vm854_vm2 = vcmp.eq.s32.totalorder %v806_v37, %v3988_v24  ;;  %vm855_vm3 = vcmp.eq.s32.totalorder %v810_v38, %v3988_v24 }
  0xcf   : > { %v3291_v39 = vsel %vm854_vm2, 1.0, %v3717_v50  ;;  %v3292_v40 = vsel %vm855_vm3, 1.0, %v3717_v50 }
  0xd0   : > { %903 = vst.msk [vmem:[#allocation4 + $0x40] sm:$0xff] %vm894_vm5, %v3291_v39  ;;  %904 = vst.msk [vmem:[#allocation4 + $0x48] sm:$0xff] %vm894_vm5, %v3292_v40 }
  0xd1   : > { %v817_v41 = vpop.permute.xlu0 %816  ;;  %v821_v42 = vpop.permute.xlu1 %820 }
  0xd2   : > { %vm856_vm4 = vcmp.eq.s32.totalorder %v817_v41, %v3988_v24  ;;  %vm857_vm6 = vcmp.eq.s32.totalorder %v821_v42, %v3988_v24 }
  0xd3   : > { %v3293_v43 = vsel %vm856_vm4, 1.0, %v3717_v50  ;;  %v3294_v44 = vsel %vm857_vm6, 1.0, %v3717_v50 }
  0xd4   : > { %905 = vst.msk [vmem:[#allocation4 + $0x50] sm:$0xff] %vm894_vm5, %v3293_v43  ;;  %906 = vst.msk [vmem:[#allocation4 + $0x58] sm:$0xff] %vm894_vm5, %v3294_v44 }
  0xd5   : > { %v828_v45 = vpop.permute.xlu0 %827  ;;  %v832_v46 = vpop.permute.xlu1 %831 }
  0xd6   : > { %vm858_vm7 = vcmp.eq.s32.totalorder %v828_v45, %v3988_v24  ;;  %vm859_vm8 = vcmp.eq.s32.totalorder %v832_v46, %v3988_v24 }
  0xd7   : > { %v3295_v47 = vsel %vm858_vm7, 1.0, %v3717_v50  ;;  %v3296_v48 = vsel %vm859_vm8, 1.0, %v3717_v50 }
  0xd8   : > { %907 = vst.msk [vmem:[#allocation4 + $0x60] sm:$0xff] %vm894_vm5, %v3295_v47  ;;  %908 = vst.msk [vmem:[#allocation4 + $0x68] sm:$0xff] %vm894_vm5, %v3296_v48 }
  0xd9   : > { %v839_v49 = vpop.permute.xlu0 %838  ;;  %v843_v51 = vpop.permute.xlu1 %842 }
  0xda   : > { %vm860_vm9 = vcmp.eq.s32.totalorder %v839_v49, %v3988_v24  ;;  %vm861_vm10 = vcmp.eq.s32.totalorder %v843_v51, %v3988_v24 }
  0xdb   : > { %v3297_v52 = vsel %vm860_vm9, 1.0, %v3717_v50  ;;  %v3298_v53 = vsel %vm861_vm10, 1.0, %v3717_v50 }
  0xdc   : > { %909 = vst.msk [vmem:[#allocation4 + $0x70] sm:$0xff] %vm894_vm5, %v3297_v52  ;;  %910 = vst.msk [vmem:[#allocation4 + $0x78] sm:$0xff] %vm894_vm5, %v3298_v53  ;;  %vm573_vm5 = vcmask 785408  }
  0xfc   : > { %v3385_v54 = vpop.f32.mrf.mxu0 }
  0xfd   : > { %v3393_v55 = vpop.f32.mrf.mxu1  ;;  %741 = vst.msk [vmem:[#allocation3 + $0x10] sm:$0xff] %vm738_vm11, %v3385_v54 }
  0xfe   : > { %749 = vst.msk [vmem:[#allocation3 + $0x50] sm:$0xff] %vm738_vm11, %v3393_v55  ;;  %v675_v56 = vpop.f32.mrf.mxu0 }
  0xff   : > { %v707_v57 = vpop.f32.mrf.mxu1  ;;  %739 = vst.msk [vmem:[#allocation3] sm:$0xff] %vm738_vm11, %v675_v56 }
 0x100   : > { %747 = vst.msk [vmem:[#allocation3 + $0x40] sm:$0xff] %vm738_vm11, %v707_v57  ;;  %v3386_v24 = vpop.f32.mrf.mxu0 }
 0x101   : > { %v3394_v58 = vpop.f32.mrf.mxu1  ;;  %742 = vst.msk [vmem:[#allocation3 + $0x18] sm:$0xff] %vm738_vm11, %v3386_v24 }
 0x102   : > { %750 = vst.msk [vmem:[#allocation3 + $0x58] sm:$0xff] %vm738_vm11, %v3394_v58  ;;  %v678_v50 = vpop.f32.mrf.mxu0 }
 0x103   : > { %v710_v59 = vpop.f32.mrf.mxu1  ;;  %740 = vst.msk [vmem:[#allocation3 + $0x8] sm:$0xff] %vm738_vm11, %v678_v50 }
 0x104   : > { %748 = vst.msk [vmem:[#allocation3 + $0x48] sm:$0xff] %vm738_vm11, %v710_v59  ;;  %v3389_v60 = vpop.f32.mrf.mxu0 }
 0x105   : > { %v3397_v61 = vpop.f32.mrf.mxu1  ;;  %745 = vst.msk [vmem:[#allocation3 + $0x30] sm:$0xff] %vm738_vm11, %v3389_v60 }
 0x106   : > { %753 = vst.msk [vmem:[#allocation3 + $0x70] sm:$0xff] %vm738_vm11, %v3397_v61  ;;  %v691_v62 = vpop.f32.mrf.mxu0 }
 0x107   : > { %v723_v63 = vpop.f32.mrf.mxu1  ;;  %743 = vst.msk [vmem:[#allocation3 + $0x20] sm:$0xff] %vm738_vm11, %v691_v62 }
 0x108   : > { %751 = vst.msk [vmem:[#allocation3 + $0x60] sm:$0xff] %vm738_vm11, %v723_v63  ;;  %v3390_v1 = vpop.f32.mrf.mxu0 }
 0x109   : > { %v3398_v2 = vpop.f32.mrf.mxu1  ;;  %746 = vst.msk [vmem:[#allocation3 + $0x38] sm:$0xff] %vm738_vm11, %v3390_v1 }
 0x10a   : > { %754 = vst.msk [vmem:[#allocation3 + $0x78] sm:$0xff] %vm738_vm11, %v3398_v2  ;;  %v694_v3 = vpop.f32.mrf.mxu0 }
 0x10b   : > { %v726_v4 = vpop.f32.mrf.mxu1  ;;  %744 = vst.msk [vmem:[#allocation3 + $0x28] sm:$0xff] %vm738_vm11, %v694_v3 }
 0x10c   : > { %752 = vst.msk [vmem:[#allocation3 + $0x68] sm:$0xff] %vm738_vm11, %v726_v4 }
 0x13d   : > { %v571_v6 = vpop.permute.xlu0 %570 }
 0x13e   : > { %v574_v7 = vsel %vm573_vm5, %v547_v5, %v571_v6 }
 0x13f   : > { %575 = vst [vmem:[#allocation2] sm:$0xff] %v574_v7 }
 0x140 PF: > { %v3512_v9 = vld [vmem:[#allocation7 + $0x18] sm:$0xff]   ;;  %s3719_s19 = smov 96   ;;  %v3720_v10 = vmov 0.0   ;;  %v3513_v11 = vld [vmem:[#allocation7 + $0x10] sm:$0xff]   ;;  %vm3721_vm12 = vmmov 0   ;;  %s3722_s21 = smov 32  }
 0x141   : > { %3399 = vmatprep.subr.bf16.mxu0 %v3720_v10  ;;  %3407 = vmatprep.mubr.msk.bf16.mxu0 %vm3721_vm12, %v3720_v10  ;;  %v3516_v12 = vld [vmem:[#allocation7 + $0x88] sm:$0xff]   ;;  %v3518_v14 = vld [vmem:[#allocation7 + $0x80] sm:$0xff]   ;;  %v4084_v15 = vld [vmem:[%s4807_s11] sm:$0xff]  ;;  %vm933_vm13 = vcmask 261120   ;;  %vm973_vm14 = vcmask 523264   ;;  %s3723_s29 = smov 64  }
 0x142   : > { %3400 = vmatpush3.bf16.msra.mxu0 %v3512_v9  ;;  %v3514_v13 = vld [vmem:[#allocation7 + $0x8] sm:$0xff]   ;;  %3439 = vmatprep.subr.bf16.mxu1 %v3516_v12  ;;  %v4089_v16 = vld [vmem:[%s4807_s11 + $0x8] sm:$0xff]  ;;  %v4099_v18 = vld [vmem:[%s4807_s11 + $0x18] sm:$0xff]  ;;  %s3341_s30 = sshll.u32 %s3796_s20, 3  ;;  %vm1186_vm15 = vcmask 785408   ;;  %vm1464_vm0 = vcmask 130112  }
 0x143   : > { %3401 = vmatprep.subr.bf16.mxu0 %v3720_v10  ;;  %3440 = vmatpush3.bf16.msra.mxu1 %v3516_v12  ;;  %v4094_v17 = vld [vmem:[%s4807_s11 + $0x10] sm:$0xff]  ;;  %v3515_v19 = vld [vmem:[#allocation7] sm:$0xff]   ;;  %v2366_v20 = vpack.c.bf16 %v4089_v16, %v4084_v15  ;;  %v928_v22 = vld [vmem:[%s3847_s23] sm:$0xff]  ;;  %s3216_s13 = scalar_lea.vmem %s4807_s11, %s3341_s30  ;;  %vm1529_vm1 = vcmask 1041409   ;;  %vm1531_vm2 = vcmask 1042434   ;;  %vm1533_vm3 = vcmask 1043459  }
 0x144   : > { %3441 = vmatprep.subr.bf16.mxu1 %v3518_v14  ;;  %v2367_v21 = vpack.c.bf16 %v4099_v18, %v4094_v17  ;;  %v3517_v26 = vld [vmem:[#allocation7 + $0x38] sm:$0xff]   ;;  %v3519_v28 = vld [vmem:[#allocation7 + $0x30] sm:$0xff]   ;;  %v3520_v29 = vld [vmem:[#allocation7 + $0x28] sm:$0xff]   ;;  %vm1535_vm4 = vcmask 1044484   ;;  %vm1537_vm6 = vcmask 1045509   ;;  %vm1539_vm7 = vcmask 1046534  }
 0x145   : > { %3443 = vmatprep.mubr.msk.bf16.mxu1 %vm933_vm13, %v2366_v20  ;;  %v4123_v30 = vld [vmem:[%s4807_s11 + $0x20] sm:$0xff]  ;;  %v4128_v31 = vld [vmem:[%s4807_s11 + $0x28] sm:$0xff]  ;;  %v4135_v0 = vld [vmem:[%s4807_s11 + $0x30] sm:$0xff]  ;;  %vm1541_vm8 = vcmask 1047559   ;;  %vm1544_vm9 = vcmask 130048   ;;  %s2515_s27 = sadd.s32 4, %s3796_s20 }
 0x146   : > { %v4071_v8 = vld [vmem:[#allocation2] sm:$0xff]  ;;  %3402 = vmatpush3.bf16.msra.mxu0 %v3513_v11  ;;  %v3521_v32 = vld [vmem:[#allocation7 + $0x20] sm:$0xff]   ;;  %v2368_v33 = vpack.c.bf16 %v4128_v31, %v4123_v30  ;;  %v4140_v34 = vld [vmem:[%s4807_s11 + $0x38] sm:$0xff]  ;;  %v3724_v11 = vmov 1966171168   ;;  %vm2569_vm11 = vcmask 64512  }
 0x147   : > { %930 = vrot.lane.b32.xlu0 %v4071_v8, %s3719_s19  ;;  %3403 = vmatprep.subr.bf16.mxu0 %v3720_v10  ;;  %v2369_v35 = vpack.c.bf16 %v4140_v34, %v4135_v0  ;;  %v3299_v36 = vld [vmem:[%s4805_s9] ss:$0 sm:$0xff]  ;;  %v3305_v46 = vld [vmem:[%s4805_s9 + $0x1] ss:$0 sm:$0xff]  ;;  %v3523_v62 = vld [vmem:[#allocation7 + $0x70] sm:$0xff]   ;;  %v1249_v12 = vunpack.c.l.s4 %v3724_v11  ;;  %s3727_s28 = smov 72  }
 0x148   : > { %3442 = vmatpush3.bf16.msra.mxu1 %v3518_v14  ;;  %v3522_v61 = vld [vmem:[#allocation7 + $0x78] sm:$0xff]   ;;  %v3524_v63 = vld [vmem:[#allocation7 + $0x68] sm:$0xff]   ;;  %v3525_v2 = vld [vmem:[#allocation7 + $0x60] sm:$0xff]   ;;  %s3728_s30 = smov 104   ;;  %s3729_s12 = smov 8   ;;  %vm3057_vm5 = vcmask 588800  }
 0x149   : > { %v3526_v3 = vld [vmem:[#allocation7 + $0x58] sm:$0xff]   ;;  %v3527_v4 = vld [vmem:[#allocation7 + $0x50] sm:$0xff]   ;;  %v1250_v14 = vunpack.c.0.s8 %v1249_v12 }
 0x14a   : > { %3404 = vmatpush3.bf16.msra.mxu0 %v3514_v13  ;;  %v1251_v13 = vlaneseq  ;;  %v3312_v20 = vld [vmem:[%s4805_s9 + $0x2] ss:$0 sm:$0xff] }
 0x14b   : > { %1017 = vrot.lane.b32.xlu0 %v4071_v8, %s3722_s21  ;;  %3405 = vmatprep.subr.bf16.mxu0 %v3720_v10 }
 0x14c   : > { %3444 = vmatmul.mubr.msk.bf16.vlgmr.msra.gmra.mxu1 %vm933_vm13, %v2367_v21 }
 0x14d   : > { %3447 = vmatprep.mubr.msk.bf16.mxu1 %vm933_vm13, %v2368_v33 }
 0x14e   : > { %3406 = vmatpush3.bf16.msra.mxu0 %v3515_v19  ;;  %v4192_v19 = vshrl.u32 %v1251_v13, 7 }
 0x14f   : > { %3411 = vmatprep.subr.bf16.mxu0 %v3720_v10 }
 0x150   : > { %v1253_v21 = vsub.s32 %v1250_v14, %v4192_v19  ;;  %v1242_v14 = vld [vmem:[#allocation3 + $0x60] sm:$0xff] }
 0x154   : > { %3448 = vmatmul.mubr.msk.bf16.gmra.mxu1 %vm933_vm13, %v2369_v35 }
 0x1b9   : > { %v4110_v23 = vpop.permute.xlu0 %930 }
 0x1ba   : > { %v934_v25 = vsel %vm933_vm13, %v928_v22, %v4110_v23 }
 0x1bb   : > { %v943_v27 = vpack.c.bf16 %v934_v25, %v934_v25 }
 0x1bd   : > { %3408 = vmatmul.mubr.msk.bf16.vlgmr.msra.gmra.mxu0 %vm973_vm14, %v943_v27  ;;  %v1018_v38 = vpop.permute.xlu0 %1017 }
 0x1be   : > { %3412 = vmatpush3.bf16.msra.mxu0 %v3517_v26  ;;  %3419 = vmatprep.mubr.msk.bf16.mxu0 %vm3721_vm12, %v3720_v10 }
 0x1bf   : > { %3413 = vmatprep.subr.bf16.mxu0 %v3720_v10 }
 0x1c2   : > { %3414 = vmatpush3.bf16.msra.mxu0 %v3519_v28  ;;  %v4204_v28 = vsub.s32 0, %v4192_v19 }
 0x1c3   : > { %3415 = vmatprep.subr.bf16.mxu0 %v3720_v10 }
 0x1c6   : > { %3416 = vmatpush3.bf16.msra.mxu0 %v3520_v29 }
 0x1c7   : > { %3417 = vmatprep.subr.bf16.mxu0 %v3720_v10 }
 0x1ca   : > { %3418 = vmatpush3.bf16.msra.mxu0 %v3521_v32 }
 0x1cb   : > { %3423 = vmatprep.subr.bf16.mxu0 %v3720_v10 }
 0x27d   : > { %v1011_v37 = vpop.f32.mrf.mxu0 }
 0x27e   : > { %v1012_v39 = vadd.f32 %v3299_v36, %v1011_v37 }
 0x27f   : > { %v3409_v40 = vpop.f32.mrf.mxu0 }
 0x280   : > { %v2718_v41 = vpack.c.bf16 %v1012_v39, %v1012_v39  ;;  %v1020_v42 = vsel %vm933_vm13, %v1012_v39, %v1018_v38  ;;  %v1230_v39 = vld [vmem:[#allocation3] sm:$0xff] }
 0x281   : > { %v1029_v43 = vpack.c.bf16 %v1020_v42, %v1020_v42  ;;  %v1014_v44 = vpop.f32.mrf.mxu0 }
 0x282   : > { %3339 = vmatprep.mubr.msk.bf16.mxu1 %vm933_vm13, %v2718_v41  ;;  %v1231_v41 = vld [vmem:[#allocation3 + $0x8] sm:$0xff]  ;;  %v1233_v44 = vld [vmem:[#allocation3 + $0x18] sm:$0xff] }
 0x283   : > { %v3410_v45 = vpop.f32.mrf.mxu0  ;;  %3420 = vmatmul.mubr.msk.bf16.vlgmr.msra.gmra.mxu0 %vm973_vm14, %v1029_v43  ;;  %v1232_v43 = vld [vmem:[#allocation3 + $0x10] sm:$0xff] }
 0x284   : > { %3435 = vmatprep.mubr.msk.bf16.mxu0 %vm3721_vm12, %v3720_v10  ;;  %3424 = vmatpush3.bf16.msra.mxu0 %v3522_v61  ;;  %vm3161_vm12 = vcmask 326656  }
 0x285   : > { %3425 = vmatprep.subr.bf16.mxu0 %v3720_v10 }
 0x288   : > { %3426 = vmatpush3.bf16.msra.mxu0 %v3523_v62 }
 0x289   : > { %3427 = vmatprep.subr.bf16.mxu0 %v3720_v10 }
 0x28c   : > { %3428 = vmatpush3.bf16.msra.mxu0 %v3524_v63  ;;  %v1239_v63 = vld [vmem:[#allocation3 + $0x48] sm:$0xff] }
 0x28d   : > { %3429 = vmatprep.subr.bf16.mxu0 %v3720_v10 }
 0x290   : > { %3430 = vmatpush3.bf16.msra.mxu0 %v3525_v2 }
 0x291   : > { %3431 = vmatprep.subr.bf16.mxu0 %v3720_v10 }
 0x294   : > { %3432 = vmatpush3.bf16.msra.mxu0 %v3526_v3 }
 0x295   : > { %3433 = vmatprep.subr.bf16.mxu0 %v3720_v10 }
 0x298   : > { %3434 = vmatpush3.bf16.msra.mxu0 %v3527_v4  ;;  %v1240_v4 = vld [vmem:[#allocation3 + $0x50] sm:$0xff] }
 0x343   : > { %v1096_v47 = vpop.f32.mrf.mxu0 }
 0x344   : > { %v1097_v48 = vadd.f32 %v3305_v46, %v1096_v47 }
 0x345   : > { %v3421_v49 = vpop.f32.mrf.mxu0 }
 0x346   : > { %3538 = vtanh.f32 %v1097_v48  ;;  %v3311_v54 = vmul.f32 -1.442695, %v1097_v48  ;;  %v1234_v48 = vld [vmem:[#allocation3 + $0x20] sm:$0xff] }
 0x347   : > { %v1099_v51 = vpop.f32.mrf.mxu0 }
 0x348   : > { %3540 = vpow2.f32 %v3311_v54 }
 0x349   : > { %v3422_v52 = vpop.f32.mrf.mxu0 }
 0x353   : > { %v3539_v53 = vpop.eup %3538 }
 0x354   : > { %1111 = vrot.lane.b32.xlu1 %v3539_v53, %s3723_s29 }
 0x355   : > { %v3541_v55 = vpop.eup %3540 }
 0x356   : > { %v1105_v56 = vadd.f32 1.0, %v3541_v55  ;;  %v1235_v55 = vld [vmem:[#allocation3 + $0x28] sm:$0xff] }
 0x358   : > { %3542 = vrcp.f32 %v1105_v56 }
 0x365   : > { %v3543_v57 = vpop.eup %3542 }
 0x366   : > { %v1109_v50 = vmul.f32 %v3543_v57, %v4071_v8 }
 0x3c6   : > { %v1112_v24 = vpop.permute.xlu1 %1111 }
 0x3c7   : > { %v1114_v58 = vmul.f32 %v3543_v57, %v1112_v24  ;;  %v1238_v24 = vld [vmem:[#allocation3 + $0x40] sm:$0xff] }
 0x3c9   : > { %1116 = vrot.lane.b32.xlu1 %v1114_v58, %s3722_s21 }
 0x43b   : > { %v1117_v59 = vpop.permute.xlu1 %1116 }
 0x43c   : > { %v4161_v60 = vadd.f32 %v1117_v59, %v1109_v50  ;;  %v1236_v59 = vld [vmem:[#allocation3 + $0x30] sm:$0xff] }
 0x43e   : > { %3544 = vtanh.f32 %v4161_v60 }
 0x44b   : > { %v3545_v1 = vpop.eup %3544 }
 0x44c   : > { %1122 = vrot.lane.b32.xlu0 %v3545_v1, %s3723_s29 }
 0x4be   : > { %v1123_v5 = vpop.permute.xlu0 %1122 }
 0x4bf   : > { %v4170_v6 = vmul.f32 %v3543_v57, %v1123_v5 }
 0x4c1   : > { %1127 = vrot.lane.b32.xlu1 %v4170_v6, %s3722_s21 }
 0x533   : > { %v4178_v7 = vpop.permute.xlu1 %1127 }
 0x534   : > { %v4183_v8 = vsel %vm933_vm13, %v4178_v7, %v4161_v60  ;;  %3342 = vst.msk [vmem:[%s3216_s13 + $0x20] sm:$0xff] %vm933_vm13, %v4178_v7 }
 0x535   : > { %4814 = vst [vmem:[#allocation11_spill] sm:$0xff] %v4183_v8  ;;  %v1131_v9 = vsel %vm973_vm14, %v4183_v8, %v4110_v23 }
 0x536   : > { %v1144_v10 = vpack.c.bf16 %v1131_v9, %v1131_v9  ;;  %v1237_v9 = vld [vmem:[#allocation3 + $0x38] sm:$0xff] }
 0x538   : > { %3436 = vmatmul.mubr.msk.bf16.vlgmr.msra.gmra.mxu0 %vm1186_vm15, %v1144_v10 }
 0x5f8   : > { %v1224_v22 = vpop.f32.mrf.mxu0 }
 0x5f9   : > { %v4198_v25 = vadd.f32 %v3312_v20, %v1224_v22  ;;  %v4216_v20 = vld [vmem:[%s4805_s9 + $0x3] ss:$0 sm:$0xff] }
 0x5fa   : > { %v3437_v23 = vpop.f32.mrf.mxu0 }
 0x5fb   : > { %v1247_v26 = vcombine.high %v4198_v25, %v4198_v25  ;;  %v1254_v27 = vrot.slane %v4198_v25, %v1253_v21  ;;  %v1241_v23 = vld [vmem:[#allocation3 + $0x58] sm:$0xff] }
 0x5fc   : > { %v1227_v29 = vpop.f32.mrf.mxu0 }
 0x5fd   : > { %v1262_v32 = vcombine.high %v1254_v27, %v1254_v27  ;;  %v1270_v33 = vrot.slane %v1254_v27, %v1253_v21  ;;  %v1261_v36 = vrot.slane %v1247_v26, %v1253_v21 }
 0x5fe   : > { %v3438_v35 = vpop.f32.mrf.mxu0 }
 0x5ff   : > { %v1284_v37 = vrot.slane %v1262_v32, %v1253_v21  ;;  %v1292_v38 = vcombine.high %v1270_v33, %v1270_v33  ;;  %v1299_v40 = vrot.slane %v1270_v33, %v4204_v28  ;;  %v1277_v45 = vrot.slane %v1261_v36, %v1253_v21  ;;  %v1244_v33 = vld [vmem:[#allocation3 + $0x70] sm:$0xff] }
 0x600   : > { %v1263_v49 = vcombine.high %v1261_v36, %v1261_v36 }
 0x601   : > { %v1303_v42 = vrot.slane %v1284_v37, %v4204_v28  ;;  %v1307_v46 = vrot.slane %v1292_v38, %v4204_v28  ;;  %v1336_v47 = vadd.f32 %v1299_v40, %v1230_v39  ;;  %v1294_v51 = vcombine.high %v1284_v37, %v1284_v37 }
 0x602   : > { %v1337_v52 = vadd.f32 %v1299_v40, %v1231_v41  ;;  %v1315_v56 = vrot.slane %v1277_v45, %v4204_v28  ;;  %v1291_v58 = vrot.slane %v1263_v49, %v1253_v21  ;;  %v1293_v1 = vcombine.high %v1277_v45, %v1277_v45 }
 0x603   : > { %v1338_v53 = vadd.f32 %v1303_v42, %v1232_v43  ;;  %v1339_v54 = vadd.f32 %v1303_v42, %v1233_v44  ;;  %v1340_v57 = vadd.f32 %v1307_v46, %v1234_v48  ;;  %3546 = vtanh.f32 %v1336_v47  ;;  %v1243_v42 = vld [vmem:[#allocation3 + $0x68] sm:$0xff] }
 0x604   : > { %v1311_v50 = vrot.slane %v1294_v51, %v4204_v28  ;;  %3548 = vtanh.f32 %v1337_v52  ;;  %v1341_v61 = vadd.f32 %v1307_v46, %v1235_v55  ;;  %v1344_v62 = vadd.f32 %v1315_v56, %v1238_v24 }
 0x605   : > { %3550 = vtanh.f32 %v1338_v53  ;;  %v1319_v2 = vrot.slane %v1291_v58, %v4204_v28  ;;  %v1345_v5 = vadd.f32 %v1315_v56, %v1239_v63  ;;  %v1295_v10 = vcombine.high %v1291_v58, %v1291_v58  ;;  %v1245_v53 = vld [vmem:[#allocation3 + $0x78] sm:$0xff] }
 0x606   : > { %3552 = vtanh.f32 %v1339_v54  ;;  %v1342_v3 = vadd.f32 %v1311_v50, %v1236_v59  ;;  %v1323_v11 = vrot.slane %v1293_v1, %v4204_v28  ;;  %v1343_v21 = vadd.f32 %v1311_v50, %v1237_v9 }
 0x607   : > { %3554 = vtanh.f32 %v1340_v57  ;;  %v1346_v12 = vadd.f32 %v1319_v2, %v1240_v4  ;;  %v1327_v26 = vrot.slane %v1295_v10, %v4204_v28  ;;  %v1347_v38 = vadd.f32 %v1319_v2, %v1241_v23 }
 0x608   : > { %3556 = vtanh.f32 %v1341_v61  ;;  %v1348_v27 = vadd.f32 %v1323_v11, %v1242_v14  ;;  %v1349_v47 = vadd.f32 %v1323_v11, %v1243_v42 }
 0x609   : > { %3558 = vtanh.f32 %v1344_v62  ;;  %v1350_v44 = vadd.f32 %v1327_v26, %v1244_v33  ;;  %v1351_v24 = vadd.f32 %v1327_v26, %v1245_v53 }
 0x60a   : > { %3560 = vtanh.f32 %v1342_v3 }
 0x60b   : > { %3562 = vtanh.f32 %v1345_v5 }
 0x60c   : > { %3564 = vtanh.f32 %v1346_v12 }
 0x60d   : > { %3566 = vtanh.f32 %v1343_v21 }
 0x60e   : > { %3568 = vtanh.f32 %v1348_v27 }
 0x60f   : > { %3570 = vtanh.f32 %v1347_v38 }
 0x610   : > { %v3547_v22 = vpop.eup %3546  ;;  %3572 = vtanh.f32 %v1350_v44 }
 0x611   : > { %v3549_v29 = vpop.eup %3548  ;;  %v1373_v32 = vmul.f32 %v3547_v22, %v4216_v20  ;;  %3574 = vtanh.f32 %v1349_v47 }
 0x612   : > { %v3551_v35 = vpop.eup %3550  ;;  %v1374_v36 = vmul.f32 %v3549_v29, %v4216_v20  ;;  %3576 = vtanh.f32 %v1351_v24 }
 0x613   : > { %v3553_v37 = vpop.eup %3552  ;;  %v1389_v39 = vsel %vm973_vm14, %v1373_v32, 0.0  ;;  %v1375_v40 = vmul.f32 %v3551_v35, %v4216_v20 }
 0x614   : > { %v3555_v41 = vpop.eup %3554  ;;  %v1392_v43 = vsel %vm973_vm14, %v1374_v36, 0.0  ;;  %1390 = vadd.xlane.f32.xlu0 %v1389_v39  ;;  %v1376_v49 = vmul.f32 %v3553_v37, %v4216_v20 }
 0x615   : > { %1393 = vadd.xlane.f32.xlu1 %v1392_v43  ;;  %v1377_v45 = vmul.f32 %v3555_v41, %v4216_v20  ;;  %v3557_v46 = vpop.eup %3556  ;;  %v1395_v48 = vsel %vm973_vm14, %v1375_v40, 0.0 }
 0x616   : > { %v3559_v51 = vpop.eup %3558  ;;  %v1398_v56 = vsel %vm973_vm14, %v1376_v49, 0.0  ;;  %v1378_v57 = vmul.f32 %v3557_v46, %v4216_v20 }
 0x617   : > { %v1401_v52 = vsel %vm973_vm14, %v1377_v45, 0.0  ;;  %v3561_v54 = vpop.eup %3560  ;;  %v1381_v55 = vmul.f32 %v3559_v51, %v4216_v20  ;;  %v1454_v45 = vand.u32 127, %v1251_v13 }
 0x618   : > { %1396 = vadd.xlane.f32.xlu0 %v1395_v48  ;;  %v3563_v58 = vpop.eup %3562  ;;  %v1379_v59 = vmul.f32 %v3561_v54, %v4216_v20  ;;  %v1404_v62 = vsel %vm973_vm14, %v1378_v57, 0.0 }
 0x619   : > { %1402 = vadd.xlane.f32.xlu1 %v1401_v52  ;;  %v1413_v50 = vsel %vm973_vm14, %v1381_v55, 0.0  ;;  %v3565_v61 = vpop.eup %3564  ;;  %v1382_v63 = vmul.f32 %v3563_v58, %v4216_v20  ;;  %v1459_v47 = vadd.s32 4294967288, %v1454_v45  ;;  %v4273_v51 = vsub.s32 %v1454_v45, %v4192_v19 }
 0x61a   : > { %v3567_v1 = vpop.eup %3566  ;;  %v1407_v2 = vsel %vm973_vm14, %v1379_v59, 0.0  ;;  %v1383_v3 = vmul.f32 %v3565_v61, %v4216_v20 }
 0x61b   : > { %v3569_v4 = vpop.eup %3568  ;;  %v1416_v5 = vsel %vm973_vm14, %v1382_v63, 0.0  ;;  %v1380_v9 = vmul.f32 %v3567_v1, %v4216_v20  ;;  %v4276_v52 = vsub.s32 %v1459_v47, %v4192_v19 }
 0x61c   : > { %1399 = vadd.xlane.f32.xlu0 %v1398_v56  ;;  %v3571_v10 = vpop.eup %3570  ;;  %v1419_v11 = vsel %vm973_vm14, %v1383_v3, 0.0  ;;  %v1385_v12 = vmul.f32 %v3569_v4, %v4216_v20 }
 0x61d   : > { %1414 = vadd.xlane.f32.xlu1 %v1413_v50  ;;  %v3573_v14 = vpop.eup %3572  ;;  %v1410_v21 = vsel %vm973_vm14, %v1380_v9, 0.0  ;;  %v1384_v22 = vmul.f32 %v3571_v10, %v4216_v20 }
 0x61e   : > { %v3575_v23 = vpop.eup %3574  ;;  %v1425_v26 = vsel %vm973_vm14, %v1385_v12, 0.0  ;;  %v1387_v27 = vmul.f32 %v3573_v14, %v4216_v20 }
 0x61f   : > { %v1422_v29 = vsel %vm973_vm14, %v1384_v22, 0.0  ;;  %v1386_v32 = vmul.f32 %v3575_v23, %v4216_v20  ;;  %v3577_v33 = vpop.eup %3576 }
 0x620   : > { %1405 = vadd.xlane.f32.xlu0 %v1404_v62  ;;  %v1431_v35 = vsel %vm973_vm14, %v1387_v27, 0.0  ;;  %v1388_v37 = vmul.f32 %v3577_v33, %v4216_v20 }
 0x621   : > { %1408 = vadd.xlane.f32.xlu1 %v1407_v2  ;;  %v1428_v36 = vsel %vm973_vm14, %v1386_v32, 0.0 }
 0x622   : > { %v1434_v38 = vsel %vm973_vm14, %v1388_v37, 0.0 }
 0x624   : > { %1417 = vadd.xlane.f32.xlu0 %v1416_v5 }
 0x625   : > { %1420 = vadd.xlane.f32.xlu1 %v1419_v11 }
 0x628   : > { %1411 = vadd.xlane.f32.xlu0 %v1410_v21 }
 0x629   : > { %1426 = vadd.xlane.f32.xlu1 %v1425_v26 }
 0x62c   : > { %1423 = vadd.xlane.f32.xlu0 %v1422_v29 }
 0x62d   : > { %1432 = vadd.xlane.f32.xlu1 %v1431_v35 }
 0x630   : > { %1429 = vadd.xlane.f32.xlu0 %v1428_v36 }
 0x634   : > { %1435 = vadd.xlane.f32.xlu0 %v1434_v38 }
 0x69d   : > { %v4251_v39 = vpop.xlane.xlu0 %1390 }
 0x69e   : > { %v4253_v40 = vpop.xlane.xlu1 %1393  ;;  %v1458_v56 = vrot.slane %v4251_v39, %v4273_v51 }
 0x69f   : > { %v1463_v55 = vrot.slane %v4253_v40, %v4276_v52 }
 0x6a1   : > { %v4255_v41 = vpop.xlane.xlu0 %1396  ;;  %v1465_v1 = vsel %vm1464_vm0, %v1463_v55, %v1458_v56  ;;  %v4342_v55 = vsub.s32 1, %v4192_v19 }
 0x6a2   : > { %v4257_v42 = vpop.xlane.xlu1 %1402  ;;  %v1469_v57 = vrot.slane %v4255_v41, %v4273_v51 }
 0x6a3   : > { %v1478_v58 = vrot.slane %v4257_v42, %v4273_v51 }
 0x6a5   : > { %v4259_v43 = vpop.xlane.xlu0 %1399 }
 0x6a6   : > { %v4261_v44 = vpop.xlane.xlu1 %1414  ;;  %v1473_v13 = vrot.slane %v4259_v43, %v4276_v52 }
 0x6a7   : > { %v1496_v14 = vrot.slane %v4261_v44, %v4273_v51 }
 0x6a8   : > { %v1474_v61 = vsel %vm1464_vm0, %v1473_v13, %v1469_v57 }
 0x6a9   : > { %v4264_v46 = vpop.xlane.xlu0 %1405  ;;  %v1530_v4 = vsel %vm1529_vm1, %v1474_v61, %v1465_v1  ;;  %v4355_v1 = vsub.s32 5, %v4192_v19 }
 0x6aa   : > { %v4266_v20 = vpop.xlane.xlu1 %1408  ;;  %v1482_v54 = vrot.slane %v4264_v46, %v4276_v52 }
 0x6ab   : > { %v1487_v62 = vrot.slane %v4266_v20, %v4273_v51 }
 0x6ac   : > { %v1483_v63 = vsel %vm1464_vm0, %v1482_v54, %v1478_v58  ;;  %v4808_v54 = vmov 0  }
 0x6ad   : > { %v4268_v48 = vpop.xlane.xlu0 %1417  ;;  %v1532_v10 = vsel %vm1531_vm2, %v1483_v63, %v1530_v4  ;;  %3504 = vset.pattern.permute.xlu1 %v4808_v54  ;;  %3503 = vset.pattern.permute.xlu0 %v4808_v54  ;;  %v4352_v63 = vsub.s32 2, %v4192_v19 }
 0x6ae   : > { %v4270_v49 = vpop.xlane.xlu1 %1420  ;;  %v1500_v5 = vrot.slane %v4268_v48, %v4276_v52  ;;  %2787 = vmatprep.subr.bf16.mxu1 %v4808_v54 }
 0x6af   : > { %v1505_v11 = vrot.slane %v4270_v49, %v4273_v51 }
 0x6b0   : > { %v1501_v27 = vsel %vm1464_vm0, %v1500_v5, %v1496_v14 }
 0x6b1   : > { %v4278_v53 = vpop.xlane.xlu0 %1411 }
 0x6b2   : > { %v1491_v24 = vrot.slane %v4278_v53, %v4276_v52  ;;  %v4294_v50 = vpop.xlane.xlu1 %1426 }
 0x6b3   : > { %v1514_v22 = vrot.slane %v4294_v50, %v4273_v51 }
 0x6b4   : > { %v1492_v2 = vsel %vm1464_vm0, %v1491_v24, %v1487_v62  ;;  %v4346_v24 = vsub.s32 4, %v4192_v19 }
 0x6b5   : > { %v4296_v59 = vpop.xlane.xlu0 %1423  ;;  %v1534_v21 = vsel %vm1533_vm3, %v1492_v2, %v1532_v10  ;;  %v4360_v10 = vsub.s32 6, %v4192_v19 }
 0x6b6   : > { %v1509_v3 = vrot.slane %v4296_v59, %v4276_v52  ;;  %v4321_v23 = vpop.xlane.xlu1 %1432  ;;  %v1536_v36 = vsel %vm1535_vm4, %v1501_v27, %v1534_v21  ;;  %v4367_v21 = vsub.s32 3, %v4192_v19 }
 0x6b7   : > { %v1523_v33 = vrot.slane %v4321_v23, %v4273_v51 }
 0x6b8   : > { %v1510_v26 = vsel %vm1464_vm0, %v1509_v3, %v1505_v11 }
 0x6b9   : > { %v4309_v9 = vpop.xlane.xlu0 %1429  ;;  %v1538_v37 = vsel %vm1537_vm6, %v1510_v26, %v1536_v36 }
 0x6ba   : > { %v1518_v12 = vrot.slane %v4309_v9, %v4276_v52 }
 0x6bc   : > { %v1519_v32 = vsel %vm1464_vm0, %v1518_v12, %v1514_v22 }
 0x6bd   : > { %v4325_v29 = vpop.xlane.xlu0 %1435  ;;  %v1540_v45 = vsel %vm1539_vm7, %v1519_v32, %v1538_v37 }
 0x6be   : > { %v1527_v35 = vrot.slane %v4325_v29, %v4276_v52 }
 0x6c0   : > { %v1528_v38 = vsel %vm1464_vm0, %v1527_v35, %v1523_v33 }
 0x6c1   : > { %v1542_v47 = vsel %vm1541_vm8, %v1528_v38, %v1540_v45 }
 0x6c2   : > { %v1545_v13 = vsel %vm1544_vm9, %v1542_v47, -inf }
 0x6c3   : > { %1546 = vmax.xlane.f32.xlu1 %v1545_v13 }
 0x74c   : > { %v1547_v56 = vpop.xlane.xlu1 %1546 }
 0x74d   : > { %v1552_v57 = vrot.slane %v1547_v56, %v4204_v28  ;;  %v1556_v58 = vrot.slane %v1547_v56, %v4342_v55  ;;  %v1568_v2 = vrot.slane %v1547_v56, %v4346_v24  ;;  %v1560_v11 = vrot.slane %v1547_v56, %v4352_v63 }
 0x74e   : > { %v1576_v27 = vrot.slane %v1547_v56, %v4360_v10  ;;  %v1564_v33 = vrot.slane %v1547_v56, %v4367_v21 }
 0x74f   : > { %v1589_v61 = vsub.f32 %v4251_v39, %v1552_v57  ;;  %v1590_v62 = vsub.f32 %v4253_v40, %v1552_v57  ;;  %v1591_v3 = vsub.f32 %v4255_v41, %v1556_v58  ;;  %v1592_v39 = vsub.f32 %v4259_v43, %v1556_v58 }
 0x750   : > { %v1572_v40 = vrot.slane %v1547_v56, %v4355_v1  ;;  %v1598_v12 = vsub.f32 %v4268_v48, %v1568_v2  ;;  %v4370_v41 = vsub.s32 7, %v4192_v19  ;;  %v1593_v22 = vsub.f32 %v4257_v42, %v1560_v11 }
 0x751   : > { %v1605_v4 = vmul.f32 1.442695, %v1589_v61  ;;  %v1607_v5 = vmul.f32 1.442695, %v1590_v62  ;;  %v1609_v14 = vmul.f32 1.442695, %v1591_v3  ;;  %v1594_v48 = vsub.f32 %v4264_v46, %v1560_v11 }
 0x752   : > { %v1611_v26 = vmul.f32 1.442695, %v1592_v39  ;;  %v1600_v43 = vsub.f32 %v4296_v59, %v1572_v40  ;;  %v1623_v32 = vmul.f32 1.442695, %v1598_v12  ;;  %v1613_v35 = vmul.f32 1.442695, %v1593_v22 }
 0x753   : > { %3578 = vpow2.f32 %v1605_v4  ;;  %v1580_v36 = vrot.slane %v1547_v56, %v4370_v41  ;;  %v1602_v37 = vsub.f32 %v4309_v9, %v1576_v27  ;;  %v1595_v42 = vsub.f32 %v4266_v20, %v1564_v33 }
 0x754   : > { %3580 = vpow2.f32 %v1607_v5  ;;  %v1627_v38 = vmul.f32 1.442695, %v1600_v43  ;;  %v1615_v45 = vmul.f32 1.442695, %v1594_v48  ;;  %v1596_v9 = vsub.f32 %v4278_v53, %v1564_v33 }
 0x755   : > { %3582 = vpow2.f32 %v1609_v14  ;;  %v1604_v59 = vsub.f32 %v4325_v29, %v1580_v36  ;;  %v1631_v13 = vmul.f32 1.442695, %v1602_v37  ;;  %v1617_v46 = vmul.f32 1.442695, %v1595_v42 }
 0x756   : > { %3584 = vpow2.f32 %v1611_v26  ;;  %v1597_v58 = vsub.f32 %v4261_v44, %v1568_v2  ;;  %v1619_v61 = vmul.f32 1.442695, %v1596_v9  ;;  %v1599_v3 = vsub.f32 %v4270_v49, %v1572_v40 }
 0x757   : > { %3586 = vpow2.f32 %v1623_v32  ;;  %v1635_v20 = vmul.f32 1.442695, %v1604_v59  ;;  %v1601_v2 = vsub.f32 %v4294_v50, %v1576_v27  ;;  %v1603_v40 = vsub.f32 %v4321_v23, %v1580_v36  ;;  %v1842_v23 = vld [vmem:[%s4799_s3] sm:$0xff] }
 0x758   : > { %3588 = vpow2.f32 %v1613_v35  ;;  %v1621_v4 = vmul.f32 1.442695, %v1597_v58  ;;  %v1625_v11 = vmul.f32 1.442695, %v1599_v3  ;;  %v1847_v27 = vrot.slane %v1842_v23, %v4204_v28 }
 0x759   : > { %3590 = vpow2.f32 %v1627_v38  ;;  %v1629_v12 = vmul.f32 1.442695, %v1601_v2  ;;  %v1633_v50 = vmul.f32 1.442695, %v1603_v40  ;;  %v1858_v33 = vrot.slane %v1842_v23, %v4342_v55 }
 0x75a   : > { %3592 = vpow2.f32 %v1615_v45  ;;  %v1891_v35 = vrot.slane %v1842_v23, %v4346_v24  ;;  %v1869_v36 = vrot.slane %v1842_v23, %v4352_v63  ;;  %v1880_v37 = vrot.slane %v1842_v23, %v4367_v21 }
 0x75b   : > { %3594 = vpow2.f32 %v1631_v13  ;;  %v1902_v38 = vrot.slane %v1842_v23, %v4355_v1  ;;  %v1913_v42 = vrot.slane %v1842_v23, %v4360_v10  ;;  %v1924_v45 = vrot.slane %v1842_v23, %v4370_v41 }
 0x75c   : > { %3596 = vpow2.f32 %v1617_v46 }
 0x75d   : > { %3598 = vpow2.f32 %v1635_v20 }
 0x75e   : > { %3600 = vpow2.f32 %v1619_v61 }
 0x75f   : > { %3602 = vpow2.f32 %v1621_v4 }
 0x760   : > { %v4380_v47 = vpop.eup %3578  ;;  %3604 = vpow2.f32 %v1625_v11 }
 0x761   : > { %v4383_v57 = vpop.eup %3580  ;;  %1654 = vperm.xlu0 %3503, %v4380_v47   ;;  %3606 = vpow2.f32 %v1629_v12 }
 0x762   : > { %1657 = vperm.xlu1 %3504, %v4383_v57   ;;  %v4388_v56 = vpop.eup %3582  ;;  %3608 = vpow2.f32 %v1633_v50 }
 0x763   : > { %v4391_v29 = vpop.eup %3584 }
 0x764   : > { %v4394_v62 = vpop.eup %3586 }
 0x765   : > { %1681 = vperm.xlu0 %3503, %v4394_v62   ;;  %v4398_v53 = vpop.eup %3588 }
 0x766   : > { %1660 = vperm.xlu1 %3504, %v4388_v56   ;;  %v4401_v5 = vpop.eup %3590 }
 0x767   : > { %v4405_v44 = vpop.eup %3592 }
 0x768   : > { %v4408_v39 = vpop.eup %3594 }
 0x769   : > { %1687 = vperm.xlu0 %3503, %v4401_v5   ;;  %v4412_v49 = vpop.eup %3596 }
 0x76a   : > { %1663 = vperm.xlu1 %3504, %v4391_v29   ;;  %v4415_v14 = vpop.eup %3598 }
 0x76b   : > { %v4419_v22 = vpop.eup %3600 }
 0x76c   : > { %v4422_v26 = vpop.eup %3602 }
 0x76d   : > { %1693 = vperm.xlu0 %3503, %v4408_v39   ;;  %v4429_v43 = vpop.eup %3604 }
 0x76e   : > { %1666 = vperm.xlu1 %3504, %v4398_v53   ;;  %v4432_v32 = vpop.eup %3606 }
 0x76f   : > { %v4436_v48 = vpop.eup %3608 }
 0x771   : > { %1699 = vperm.xlu0 %3503, %v4415_v14  }
 0x772   : > { %1669 = vperm.xlu1 %3504, %v4405_v44  }
 0x775   : > { %1849 = vbcast.lane.b32.xlu0 %v1847_v27, 256 }
 0x776   : > { %1672 = vperm.xlu1 %3504, %v4412_v49  }
 0x779   : > { %1853 = vbcast.lane.b32.xlu0 %v1847_v27, 264 }
 0x77a   : > { %1675 = vperm.xlu1 %3504, %v4419_v22  }
 0x77d   : > { %1860 = vbcast.lane.b32.xlu0 %v1858_v33, 256 }
 0x77e   : > { %1678 = vperm.xlu1 %3504, %v4422_v26  }
 0x781   : > { %1864 = vbcast.lane.b32.xlu0 %v1858_v33, 264 }
 0x782   : > { %1684 = vperm.xlu1 %3504, %v4429_v43  }
 0x785   : > { %1871 = vbcast.lane.b32.xlu0 %v1869_v36, 256 }
 0x786   : > { %1690 = vperm.xlu1 %3504, %v4432_v32  }
 0x789   : > { %1875 = vbcast.lane.b32.xlu0 %v1869_v36, 264 }
 0x78a   : > { %1696 = vperm.xlu1 %3504, %v4436_v48  }
 0x78d   : > { %1882 = vbcast.lane.b32.xlu0 %v1880_v37, 256 }
 0x78e   : > { %1897 = vbcast.lane.b32.xlu1 %v1891_v35, 264 }
 0x791   : > { %1886 = vbcast.lane.b32.xlu0 %v1880_v37, 264 }
 0x795   : > { %1893 = vbcast.lane.b32.xlu0 %v1891_v35, 256 }
 0x799   : > { %1904 = vbcast.lane.b32.xlu0 %v1902_v38, 256 }
 0x79d   : > { %1908 = vbcast.lane.b32.xlu0 %v1902_v38, 264 }
 0x7a1   : > { %1915 = vbcast.lane.b32.xlu0 %v1913_v42, 256 }
 0x7a5   : > { %1919 = vbcast.lane.b32.xlu0 %v1913_v42, 264 }
 0x7a9   : > { %1930 = vbcast.lane.b32.xlu0 %v1924_v45, 264 }
 0x7dc   : > { %v1655_v20 = vpop.permute.xlu0 %1654 }
 0x7dd   : > { %v1658_v59 = vpop.permute.xlu1 %1657  ;;  %v1704_v33 = vrot.slane %v1655_v20, %v4273_v51 }
 0x7de   : > { %v1708_v23 = vrot.slane %v1658_v59, %v4276_v52 }
 0x7e0   : > { %v1682_v61 = vpop.permute.xlu0 %1681  ;;  %v1709_v20 = vsel %vm1464_vm0, %v1708_v23, %v1704_v33 }
 0x7e1   : > { %v1661_v13 = vpop.permute.xlu1 %1660 }
 0x7e2   : > { %v1713_v35 = vrot.slane %v1661_v13, %v4273_v51 }
 0x7e4   : > { %v1688_v2 = vpop.permute.xlu0 %1687 }
 0x7e5   : > { %v1664_v46 = vpop.permute.xlu1 %1663  ;;  %v1753_v13 = vrot.slane %v1688_v2, %v4276_v52 }
 0x7e6   : > { %v1717_v40 = vrot.slane %v1664_v46, %v4276_v52 }
 0x7e8   : > { %v1694_v12 = vpop.permute.xlu0 %1693  ;;  %v1718_v42 = vsel %vm1464_vm0, %v1717_v40, %v1713_v35 }
 0x7e9   : > { %v1667_v9 = vpop.permute.xlu1 %1666  ;;  %v1762_v40 = vrot.slane %v1694_v12, %v4276_v52 }
 0x7ea   : > { %v1722_v37 = vrot.slane %v1667_v9, %v4273_v51 }
 0x7ed   : > { %v1670_v58 = vpop.permute.xlu1 %1669 }
 0x7ee   : > { %v1726_v50 = vrot.slane %v1670_v58, %v4276_v52  ;;  %v1744_v58 = vrot.slane %v1682_v61, %v4276_v52 }
 0x7f0   : > { %v1727_v59 = vsel %vm1464_vm0, %v1726_v50, %v1722_v37 }
 0x7f1   : > { %v1673_v3 = vpop.permute.xlu1 %1672 }
 0x7f2   : > { %v1731_v46 = vrot.slane %v1673_v3, %v4273_v51  ;;  %v1700_v3 = vpop.permute.xlu0 %1699 }
 0x7f3   : > { %v1771_v33 = vrot.slane %v1700_v3, %v4276_v52 }
 0x7f5   : > { %v1676_v4 = vpop.permute.xlu1 %1675 }
 0x7f6   : > { %v1735_v36 = vrot.slane %v1676_v4, %v4276_v52 }
 0x7f8   : > { %v1736_v4 = vsel %vm1464_vm0, %v1735_v36, %v1731_v46  ;;  %v1850_v46 = vpop.permute.xlu0 %1849 }
 0x7f9   : > { %v1679_v11 = vpop.permute.xlu1 %1678 }
 0x7fa   : > { %v1740_v38 = vrot.slane %v1679_v11, %v4273_v51  ;;  %v1773_v11 = vsel %vm1529_vm1, %v1718_v42, %v1709_v20 }
 0x7fb   : > { %v1774_v61 = vsel %vm1531_vm2, %v1727_v59, %v1773_v11 }
 0x7fc   : > { %v1775_v35 = vsel %vm1533_vm3, %v1736_v4, %v1774_v61 }
 0x7fd   : > { %v1685_v27 = vpop.permute.xlu1 %1684 }
 0x7fe   : > { %v1749_v54 = vrot.slane %v1685_v27, %v4273_v51  ;;  %v1745_v27 = vsel %vm1464_vm0, %v1744_v58, %v1740_v38  ;;  %v1854_v58 = vpop.permute.xlu0 %1853 }
 0x800   : > { %v1754_v50 = vsel %vm1464_vm0, %v1753_v13, %v1749_v54 }
 0x801   : > { %v1691_v8 = vpop.permute.xlu1 %1690 }
 0x802   : > { %v1758_v9 = vrot.slane %v1691_v8, %v4273_v51  ;;  %v1776_v8 = vsel %vm1535_vm4, %v1745_v27, %v1775_v35  ;;  %v1861_v59 = vpop.permute.xlu0 %1860 }
 0x803   : > { %v1777_v12 = vsel %vm1537_vm6, %v1754_v50, %v1776_v8 }
 0x804   : > { %v1763_v23 = vsel %vm1464_vm0, %v1762_v40, %v1758_v9 }
 0x805   : > { %v1697_v2 = vpop.permute.xlu1 %1696  ;;  %v1778_v38 = vsel %vm1539_vm7, %v1763_v23, %v1777_v12 }
 0x806   : > { %v1767_v36 = vrot.slane %v1697_v2, %v4273_v51  ;;  %v1865_v20 = vpop.permute.xlu0 %1864 }
 0x808   : > { %v1772_v37 = vsel %vm1464_vm0, %v1771_v33, %v1767_v36 }
 0x809   : > { %v1779_v42 = vsel %vm1541_vm8, %v1772_v37, %v1778_v38  ;;  %v1898_v4 = vpop.permute.xlu1 %1897 }
 0x80a   : > { %v1781_v54 = vsel %vm1544_vm9, %v1779_v42, 0.0  ;;  %v1872_v13 = vpop.permute.xlu0 %1871 }
 0x80b   : > { %1782 = vadd.xlane.f32.xlu1 %v1781_v54 }
 0x80e   : > { %v1876_v9 = vpop.permute.xlu0 %1875 }
 0x812   : > { %v1883_v40 = vpop.permute.xlu0 %1882 }
 0x816   : > { %v1887_v3 = vpop.permute.xlu0 %1886 }
 0x81a   : > { %v1894_v61 = vpop.permute.xlu0 %1893 }
 0x81c   : > { %1926 = vbcast.lane.b32.xlu1 %v1924_v45, 256 }
 0x81e   : > { %v1905_v8 = vpop.permute.xlu0 %1904 }
 0x820   : > { %2459 = vrot.lane.b32.xlu1 %v4198_v25, %s3723_s29 }
 0x894   : > { %v1783_v11 = vpop.xlane.xlu1 %1782 }
 0x895   : > { %3610 = vrcp.f32 %v1783_v11 }
 0x8a2   : > { %v3611_v27 = vpop.eup %3610 }
 0x8a3   : > { %v1789_v50 = vrot.slane %v3611_v27, %v4204_v28  ;;  %v1793_v45 = vrot.slane %v3611_v27, %v4342_v55  ;;  %v1797_v33 = vrot.slane %v3611_v27, %v4352_v63  ;;  %v1801_v37 = vrot.slane %v3611_v27, %v4367_v21 }
 0x8a5   : > { %v1826_v35 = vmul.f32 %v4380_v47, %v1789_v50  ;;  %v1827_v25 = vmul.f32 %v4383_v57, %v1789_v50  ;;  %v1828_v36 = vmul.f32 %v4388_v56, %v1793_v45  ;;  %v1829_v12 = vmul.f32 %v4391_v29, %v1793_v45  ;;  %v1909_v56 = vpop.permute.xlu0 %1908  ;;  %v3445_v50 = vpop.f32.mrf.mxu1 }
 0x8a6   : > { %v1830_v38 = vmul.f32 %v4398_v53, %v1797_v33  ;;  %v1831_v42 = vmul.f32 %v4405_v44, %v1797_v33  ;;  %v1805_v29 = vrot.slane %v3611_v27, %v4346_v24  ;;  %v1809_v53 = vrot.slane %v3611_v27, %v4355_v1 }
 0x8a7   : > { %v4483_v23 = vmul.f32 %v1850_v46, %v1826_v35  ;;  %v4485_v2 = vmul.f32 %v1854_v58, %v1827_v25  ;;  %v4493_v47 = vmul.f32 %v1861_v59, %v1828_v36  ;;  %v4495_v57 = vmul.f32 %v1865_v20, %v1829_v12  ;;  %v2428_v35 = vpop.f32.mrf.mxu1 }
 0x8a8   : > { %v4502_v54 = vmul.f32 %v1872_v13, %v1830_v38  ;;  %v4504_v46 = vmul.f32 %v1876_v9, %v1831_v42  ;;  %v1832_v58 = vmul.f32 %v4412_v49, %v1801_v37  ;;  %v1833_v59 = vmul.f32 %v4419_v22, %v1801_v37 }
 0x8a9   : > { %1981 = vperm.xlu0 %3503, %v4483_v23   ;;  %1984 = vperm.xlu1 %3504, %v4485_v2   ;;  %v1835_v11 = vmul.f32 %v4394_v62, %v1805_v29  ;;  %v1834_v13 = vmul.f32 %v4422_v26, %v1805_v29  ;;  %v1916_v9 = vpop.permute.xlu0 %1915  ;;  %v1813_v49 = vrot.slane %v3611_v27, %v4360_v10 }
 0x8aa   : > { %v4511_v44 = vmul.f32 %v1883_v40, %v1832_v58  ;;  %v4513_v20 = vmul.f32 %v1887_v3, %v1833_v59  ;;  %v1836_v22 = vmul.f32 %v4429_v43, %v1809_v53  ;;  %v1837_v45 = vmul.f32 %v4401_v5, %v1809_v53 }
 0x8ab   : > { %v4522_v40 = vmul.f32 %v1898_v4, %v1835_v11  ;;  %v4524_v3 = vmul.f32 %v1894_v61, %v1834_v13  ;;  %v1817_v62 = vrot.slane %v3611_v27, %v4370_v41  ;;  %v1838_v43 = vmul.f32 %v4432_v32, %v1813_v49  ;;  %v3446_v4 = vpop.f32.mrf.mxu1 }
 0x8ac   : > { %v4529_v25 = vmul.f32 %v1905_v8, %v1836_v22  ;;  %v4531_v33 = vmul.f32 %v1909_v56, %v1837_v45  ;;  %v1839_v5 = vmul.f32 %v4408_v39, %v1813_v49  ;;  %v1927_v39 = vpop.permute.xlu1 %1926 }
 0x8ad   : > { %1987 = vperm.xlu0 %3503, %v4493_v47   ;;  %1990 = vperm.xlu1 %3504, %v4495_v57   ;;  %v1920_v26 = vpop.permute.xlu0 %1919  ;;  %v1840_v61 = vmul.f32 %v4436_v48, %v1817_v62  ;;  %v4538_v36 = vmul.f32 %v1916_v9, %v1838_v43  ;;  %v1841_v27 = vmul.f32 %v4415_v14, %v1817_v62  ;;  %v2431_v37 = vpop.f32.mrf.mxu1 }
 0x8ae   : > { %v4540_v12 = vmul.f32 %v1920_v26, %v1839_v5 }
 0x8af   : > { %v4545_v32 = vmul.f32 %v1927_v39, %v1840_v61  ;;  %v3449_v42 = vpop.f32.mrf.mxu1 }
 0x8b0   : > { %v2460_v48 = vpop.permute.xlu1 %2459 }
 0x8b1   : > { %1993 = vperm.xlu0 %3503, %v4502_v54   ;;  %1996 = vperm.xlu1 %3504, %v4504_v46   ;;  %v1931_v8 = vpop.permute.xlu0 %1930  ;;  %v2444_v56 = vpop.f32.mrf.mxu1  ;;  %v2462_v29 = vadd.f32 %v2460_v48, %v2428_v35  ;;  %v2464_v58 = vadd.f32 %v3445_v50, %v2460_v48  ;;  %v2463_v59 = vadd.f32 %v2460_v48, %v2431_v37  ;;  %v3327_v35 = vld [vmem:[%s4805_s9 + $0x4] ss:$0 sm:$0xff] }
 0x8b2   : > { %v4547_v38 = vmul.f32 %v1931_v8, %v1841_v27  ;;  %v2465_v11 = vadd.f32 %v3446_v4, %v2460_v48  ;;  %v2466_v9 = vadd.f32 %v2460_v48, %v2444_v56  ;;  %v2468_v22 = vadd.f32 %v3449_v42, %v2460_v48 }
 0x8b3   : > { %v3450_v14 = vpop.f32.mrf.mxu1  ;;  %3612 = vtanh.f32 %v2462_v29 }
 0x8b4   : > { %3614 = vtanh.f32 %v2464_v58  ;;  %v2469_v49 = vadd.f32 %v3450_v14, %v2460_v48 }
 0x8b5   : > { %1999 = vperm.xlu0 %3503, %v4511_v44   ;;  %2002 = vperm.xlu1 %3504, %v4513_v20   ;;  %v2447_v53 = vpop.f32.mrf.mxu1  ;;  %3616 = vtanh.f32 %v2463_v59 }
 0x8b6   : > { %v2467_v13 = vadd.f32 %v2460_v48, %v2447_v53  ;;  %3618 = vtanh.f32 %v2465_v11 }
 0x8b8   : > { %3620 = vtanh.f32 %v2467_v13 }
 0x8b9   : > { %2008 = vperm.xlu1 %3504, %v4522_v40   ;;  %2005 = vperm.xlu0 %3503, %v4524_v3   ;;  %3622 = vtanh.f32 %v2466_v9 }
 0x8ba   : > { %3624 = vtanh.f32 %v2469_v49 }
 0x8bb   : > { %3626 = vtanh.f32 %v2468_v22 }
 0x8bd   : > { %2011 = vperm.xlu0 %3503, %v4529_v25   ;;  %2014 = vperm.xlu1 %3504, %v4531_v33  }
 0x8c0   : > { %v3613_v45 = vpop.eup %3612 }
 0x8c1   : > { %2017 = vperm.xlu0 %3503, %v4538_v36   ;;  %2020 = vperm.xlu1 %3504, %v4540_v12   ;;  %v2483_v62 = vmul.f32 %v3613_v45, %v3327_v35  ;;  %v3615_v50 = vpop.eup %3614 }
 0x8c2   : > { %v3617_v26 = vpop.eup %3616  ;;  %v2485_v5 = vmul.f32 %v3615_v50, %v3327_v35 }
 0x8c3   : > { %v2491_v43 = vsel %vm933_vm13, %v2483_v62, 0.0  ;;  %v3619_v4 = vpop.eup %3618  ;;  %v2484_v61 = vmul.f32 %v3617_v26, %v3327_v35 }
 0x8c4   : > { %v2497_v8 = vsel %vm933_vm13, %v2485_v5, 0.0  ;;  %v2486_v37 = vmul.f32 %v3619_v4, %v3327_v35 }
 0x8c5   : > { %2023 = vperm.xlu0 %3503, %v4545_v32   ;;  %2026 = vperm.xlu1 %3504, %v4547_v38   ;;  %v3621_v27 = vpop.eup %3620  ;;  %v2494_v42 = vsel %vm933_vm13, %v2484_v61, 0.0 }
 0x8c6   : > { %v3623_v39 = vpop.eup %3622  ;;  %v2488_v48 = vmul.f32 %v3621_v27, %v3327_v35  ;;  %v2500_v29 = vsel %vm933_vm13, %v2486_v37, 0.0 }
 0x8c7   : > { %v3625_v56 = vpop.eup %3624  ;;  %v2487_v14 = vmul.f32 %v3623_v39, %v3327_v35 }
 0x8c8   : > { %v3627_v58 = vpop.eup %3626  ;;  %v2506_v59 = vsel %vm933_vm13, %v2488_v48, 0.0  ;;  %v2490_v53 = vmul.f32 %v3625_v56, %v3327_v35 }
 0x8c9   : > { %v2503_v11 = vsel %vm933_vm13, %v2487_v14, 0.0  ;;  %v2489_v13 = vmul.f32 %v3627_v58, %v3327_v35 }
 0x8ca   : > { %v2512_v9 = vsel %vm933_vm13, %v2490_v53, 0.0 }
 0x8cb   : > { %v2509_v49 = vsel %vm933_vm13, %v2489_v13, 0.0 }
 0x8e4   : > { %2492 = vadd.xlane.f32.xlu0 %v2491_v43 }
 0x8e8   : > { %2498 = vadd.xlane.f32.xlu0 %v2497_v8 }
 0x8e9   : > { %2495 = vadd.xlane.f32.xlu1 %v2494_v42 }
 0x8ec   : > { %2501 = vadd.xlane.f32.xlu0 %v2500_v29 }
 0x8ed   : > { %2507 = vadd.xlane.f32.xlu1 %v2506_v59 }
 0x8f0   : > { %2504 = vadd.xlane.f32.xlu0 %v2503_v11 }
 0x8f1   : > { %2513 = vadd.xlane.f32.xlu1 %v2512_v9 }
 0x8f4   : > { %2510 = vadd.xlane.f32.xlu0 %v2509_v49 }
 0x924   : > { %v1985_v22 = vpop.permute.xlu1 %1984  ;;  %v1982_v45 = vpop.permute.xlu0 %1981 }
 0x925   : > { %v2035_v56 = vrot.slane %v1985_v22, %v4276_v52  ;;  %v2031_v29 = vrot.slane %v1982_v45, %v4273_v51 }
 0x927   : > { %v2036_v45 = vsel %vm1464_vm0, %v2035_v56, %v2031_v29 }
 0x928   : > { %v1991_v62 = vpop.permute.xlu1 %1990  ;;  %v1988_v50 = vpop.permute.xlu0 %1987 }
 0x929   : > { %v2044_v8 = vrot.slane %v1991_v62, %v4276_v52  ;;  %v2040_v35 = vrot.slane %v1988_v50, %v4273_v51 }
 0x92b   : > { %v2045_v11 = vsel %vm1464_vm0, %v2044_v8, %v2040_v35 }
 0x92c   : > { %v1997_v26 = vpop.permute.xlu1 %1996  ;;  %v1994_v43 = vpop.permute.xlu0 %1993 }
 0x92d   : > { %v2053_v37 = vrot.slane %v1997_v26, %v4276_v52  ;;  %v2049_v39 = vrot.slane %v1994_v43, %v4273_v51 }
 0x92f   : > { %v2054_v49 = vsel %vm1464_vm0, %v2053_v37, %v2049_v39 }
 0x930   : > { %v2003_v5 = vpop.permute.xlu1 %2002  ;;  %v2000_v4 = vpop.permute.xlu0 %1999 }
 0x931   : > { %v2062_v14 = vrot.slane %v2003_v5, %v4276_v52  ;;  %v2058_v58 = vrot.slane %v2000_v4, %v4273_v51  ;;  %v2100_v5 = vsel %vm1529_vm1, %v2045_v11, %v2036_v45 }
 0x933   : > { %v2063_v50 = vsel %vm1464_vm0, %v2062_v14, %v2058_v58 }
 0x934   : > { %v2009_v61 = vpop.permute.xlu1 %2008  ;;  %v2006_v27 = vpop.permute.xlu0 %2005 }
 0x935   : > { %v2071_v59 = vrot.slane %v2009_v61, %v4276_v52  ;;  %v2067_v53 = vrot.slane %v2006_v27, %v4273_v51  ;;  %v2101_v61 = vsel %vm1531_vm2, %v2054_v49, %v2100_v5 }
 0x936   : > { %v2102_v8 = vsel %vm1533_vm3, %v2063_v50, %v2101_v61 }
 0x937   : > { %v2072_v4 = vsel %vm1464_vm0, %v2071_v59, %v2067_v53 }
 0x938   : > { %v2015_v42 = vpop.permute.xlu1 %2014  ;;  %v2012_v48 = vpop.permute.xlu0 %2011 }
 0x939   : > { %v2080_v13 = vrot.slane %v2015_v42, %v4276_v52  ;;  %v2076_v9 = vrot.slane %v2012_v48, %v4273_v51  ;;  %v2103_v42 = vsel %vm1535_vm4, %v2072_v4, %v2102_v8 }
 0x93b   : > { %v2081_v27 = vsel %vm1464_vm0, %v2080_v13, %v2076_v9 }
 0x93c   : > { %v2021_v62 = vpop.permute.xlu1 %2020  ;;  %v2018_v22 = vpop.permute.xlu0 %2017  ;;  %v2104_v29 = vsel %vm1537_vm6, %v2081_v27, %v2103_v42 }
 0x93d   : > { %v2089_v26 = vrot.slane %v2021_v62, %v4276_v52  ;;  %v2085_v43 = vrot.slane %v2018_v22, %v4273_v51 }
 0x93f   : > { %v2090_v35 = vsel %vm1464_vm0, %v2089_v26, %v2085_v43 }
 0x940   : > { %v2027_v37 = vpop.permute.xlu1 %2026  ;;  %v2024_v39 = vpop.permute.xlu0 %2023  ;;  %v2105_v58 = vsel %vm1539_vm7, %v2090_v35, %v2104_v29 }
 0x941   : > { %v2098_v48 = vrot.slane %v2027_v37, %v4276_v52  ;;  %v2094_v56 = vrot.slane %v2024_v39, %v4273_v51 }
 0x943   : > { %v2099_v14 = vsel %vm1464_vm0, %v2098_v48, %v2094_v56  ;;  %v2518_v56 = vstv %s2515_s27 }
 0x944   : > { %v2106_v59 = vsel %vm1541_vm8, %v2099_v14, %v2105_v58  ;;  %vm2519_vm10 = vcmp.lt.s32.totalorder %v4192_v19, %v2518_v56 }
 0x945   : > { %v2108_v53 = vsel %vm1544_vm9, %v2106_v59, 0.0 }
 0x946   : > { %2109 = vadd.xlane.f32.xlu0 %v2108_v53 }
 0x96d   : > { %v2493_v11 = vpop.xlane.xlu0 %2492 }
 0x96e   : > { %v2531_v22 = vrot.slane %v2493_v11, %v4273_v51 }
 0x971   : > { %v2499_v13 = vpop.xlane.xlu0 %2498 }
 0x972   : > { %v2496_v49 = vpop.xlane.xlu1 %2495  ;;  %v2539_v26 = vrot.slane %v2499_v13, %v4273_v51 }
 0x973   : > { %v2535_v62 = vrot.slane %v2496_v49, %v4273_v51 }
 0x975   : > { %v2502_v9 = vpop.xlane.xlu0 %2501  ;;  %v2560_v50 = vsel %vm1529_vm1, %v2535_v62, %v2531_v22 }
 0x976   : > { %v2543_v43 = vrot.slane %v2502_v9, %v4273_v51  ;;  %v2561_v5 = vsel %vm1531_vm2, %v2539_v26, %v2560_v50  ;;  %v2508_v4 = vpop.xlane.xlu1 %2507 }
 0x977   : > { %v2551_v39 = vrot.slane %v2508_v4, %v4273_v51 }
 0x978   : > { %v2562_v8 = vsel %vm1533_vm3, %v2543_v43, %v2561_v5 }
 0x979   : > { %v2505_v45 = vpop.xlane.xlu0 %2504 }
 0x97a   : > { %v2547_v61 = vrot.slane %v2505_v45, %v4273_v51  ;;  %v2514_v42 = vpop.xlane.xlu1 %2513 }
 0x97b   : > { %v2559_v14 = vrot.slane %v2514_v42, %v4273_v51 }
 0x97c   : > { %v2563_v35 = vsel %vm1535_vm4, %v2547_v61, %v2562_v8 }
 0x97d   : > { %v2511_v27 = vpop.xlane.xlu0 %2510  ;;  %v2564_v48 = vsel %vm1537_vm6, %v2551_v39, %v2563_v35 }
 0x97e   : > { %v2555_v37 = vrot.slane %v2511_v27, %v4273_v51 }
 0x980   : > { %v2565_v29 = vsel %vm1539_vm7, %v2555_v37, %v2564_v48 }
 0x981   : > { %v2566_v58 = vsel %vm1541_vm8, %v2559_v14, %v2565_v29 }
 0x982   : > { %v2568_v59 = vsel %vm2519_vm10, %v2566_v58, -1e+30 }
 0x983   : > { %v2570_v53 = vsel %vm2569_vm11, %v2568_v59, -inf }
 0x984   : > { %v2571_v11 = vrot.slane %v2570_v53, 4 }
 0x986   : > { %v2572_v13 = vmax.f32 %v2570_v53, %v2571_v11 }
 0x988   : > { %v2573_v9 = vrot.slane %v2572_v13, 2 }
 0x98a   : > { %v2574_v49 = vmax.f32 %v2572_v13, %v2573_v9 }
 0x98c   : > { %v2575_v62 = vrot.slane %v2574_v49, 1 }
 0x98e   : > { %v2576_v22 = vmax.f32 %v2574_v49, %v2575_v62 }
 0x990   : > { %v2577_v45 = vsub.f32 %v2568_v59, %v2576_v22 }
 0x992   : > { %v2578_v50 = vmul.f32 1.442695, %v2577_v45 }
 0x994   : > { %3628 = vpow2.f32 %v2578_v50 }
 0x9a1   : > { %v3629_v26 = vpop.eup %3628 }
 0x9a2   : > { %v2580_v43 = vsel %vm2569_vm11, %v3629_v26, 0.0 }
 0x9a3   : > { %v2581_v4 = vrot.slane %v2580_v43, 4 }
 0x9a5   : > { %v2582_v61 = vadd.f32 %v2581_v4, %v2580_v43  ;;  %v4815_v4 = vmov 0  }
 0x9a7   : > { %v2583_v27 = vrot.slane %v2582_v61, 2 }
 0x9a9   : > { %v2584_v8 = vadd.f32 %v2583_v27, %v2582_v61  ;;  %v3530_v61 = vld [vmem:[#allocation7 + $0xb8] sm:$0xff]   ;;  %v3531_v27 = vld [vmem:[#allocation7 + $0xb0] sm:$0xff]  }
 0x9ab   : > { %v2585_v39 = vrot.slane %v2584_v8, 1 }
 0x9ad   : > { %v2586_v14 = vadd.f32 %v2585_v39, %v2584_v8  ;;  %v3532_v8 = vld [vmem:[#allocation7 + $0xa8] sm:$0xff]  }
 0x9cf   : > { %v2110_v5 = vpop.xlane.xlu0 %2109 }
 0x9d0   : > { %v2111_v19 = vmax.f32 %v2110_v5, 1e-30 }
 0x9d2   : > { %3630 = vrcp.f32 %v2111_v19  ;;  %v3529_v19 = vld [vmem:[#allocation7 + $0xc0] sm:$0xff]  }
 0x9d3   : > { %3632 = vrcp.f32 %v2586_v14 }
 0x9df   : > { %v3631_v35 = vpop.eup %3630 }
 0x9e0   : > { %v2117_v37 = vrot.slane %v3631_v35, %v4204_v28  ;;  %v2125_v56 = vrot.slane %v3631_v35, %v4352_v63  ;;  %v2121_v29 = vrot.slane %v3631_v35, %v4342_v55  ;;  %v2129_v53 = vrot.slane %v3631_v35, %v4367_v21  ;;  %v3633_v22 = vpop.eup %3632 }
 0x9e1   : > { %v2133_v11 = vrot.slane %v3631_v35, %v4346_v24 }
 0x9e2   : > { %v2155_v42 = vmul.f32 %v2117_v37, %v4485_v2  ;;  %v2154_v48 = vmul.f32 %v2117_v37, %v4483_v23  ;;  %v2159_v58 = vmul.f32 %v2125_v56, %v4504_v46  ;;  %v2156_v59 = vmul.f32 %v2121_v29, %v4493_v47  ;;  %v3534_v37 = vld [vmem:[#allocation7 + $0x98] sm:$0xff]  }
 0x9e3   : > { %v2161_v2 = vmul.f32 %v2129_v53, %v4513_v20  ;;  %v2157_v23 = vmul.f32 %v2121_v29, %v4495_v57  ;;  %v2163_v13 = vmul.f32 %v2133_v11, %v4522_v40  ;;  %v2158_v9 = vmul.f32 %v2125_v56, %v4502_v54 }
 0x9e4   : > { %2193 = vperm.xlu0 %3503, %v2155_v42   ;;  %2188 = vperm.xlu1 %3504, %v2154_v48   ;;  %v2137_v46 = vrot.slane %v3631_v35, %v4355_v1  ;;  %v2160_v49 = vmul.f32 %v2129_v53, %v4511_v44  ;;  %v2141_v20 = vrot.slane %v3631_v35, %v4360_v10  ;;  %v2170_v53 = vld [vmem:[#allocation5] sm:$0xff] }
 0x9e5   : > { %v2162_v62 = vmul.f32 %v2133_v11, %v4524_v3  ;;  %v2145_v40 = vrot.slane %v3631_v35, %v4370_v41  ;;  %v2588_v54 = vmul.f32 %v3633_v22, %v3629_v26  ;;  %v3533_v35 = vld [vmem:[#allocation7 + $0xa0] sm:$0xff]  }
 0x9e6   : > { %v2165_v47 = vmul.f32 %v2137_v46, %v4531_v33  ;;  %v2167_v57 = vmul.f32 %v2141_v20, %v4540_v12  ;;  %v2164_v33 = vmul.f32 %v2137_v46, %v4529_v25  ;;  %v2166_v50 = vmul.f32 %v2141_v20, %v4538_v36 }
 0x9e7   : > { %v2169_v45 = vmul.f32 %v2145_v40, %v4547_v38  ;;  %v2599_v44 = vrot.slane %v2588_v54, %v4342_v55  ;;  %v2613_v3 = vrot.slane %v2588_v54, %v4367_v21  ;;  %v2168_v12 = vmul.f32 %v2145_v40, %v4545_v32  ;;  %v3528_v32 = vld [vmem:[#allocation7 + $0xc8] sm:$0xff]   ;;  %v2174_v40 = vld [vmem:[#allocation5 + $0x20] sm:$0xff] }
 0x9e8   : > { %2213 = vperm.xlu0 %3503, %v2159_v58   ;;  %2198 = vperm.xlu1 %3504, %v2156_v59   ;;  %v2627_v26 = vrot.slane %v2588_v54, %v4355_v1  ;;  %v2592_v38 = vrot.slane %v2588_v54, %v4204_v28  ;;  %v2641_v25 = vrot.slane %v2588_v54, %v4370_v41  ;;  %v2171_v59 = vld [vmem:[#allocation5 + $0x8] sm:$0xff] }
 0x9e9   : > { %v2606_v43 = vrot.slane %v2588_v54, %v4352_v63  ;;  %v2620_v36 = vrot.slane %v2588_v54, %v4346_v24  ;;  %v2634_v5 = vrot.slane %v2588_v54, %v4360_v10  ;;  %2788 = vmatpush1.bf16.msra.mxu1 %v3528_v32  ;;  %v2176_v32 = vld [vmem:[#allocation5 + $0x30] sm:$0xff] }
 0x9ea   : > { %2789 = vmatprep.subr.bf16.mxu1 %v4815_v4 }
 0x9ec   : > { %2223 = vperm.xlu0 %3503, %v2161_v2   ;;  %2203 = vperm.xlu1 %3504, %v2157_v23   ;;  %v2172_v2 = vld [vmem:[#allocation5 + $0x10] sm:$0xff]  ;;  %v2173_v23 = vld [vmem:[#allocation5 + $0x18] sm:$0xff] }
 0x9ed   : > { %2790 = vmatpush1.bf16.msra.mxu1 %v3529_v19 }
 0x9ee   : > { %2791 = vmatprep.subr.bf16.mxu1 %v4815_v4 }
 0x9f0   : > { %2233 = vperm.xlu0 %3503, %v2163_v13   ;;  %2208 = vperm.xlu1 %3504, %v2158_v9   ;;  %v2175_v9 = vld [vmem:[#allocation5 + $0x28] sm:$0xff] }
 0x9f1   : > { %2792 = vmatpush1.bf16.msra.mxu1 %v3530_v61 }
 0x9f2   : > { %2793 = vmatprep.subr.bf16.mxu1 %v4815_v4 }
 0x9f4   : > { %2243 = vperm.xlu0 %3503, %v2165_v47   ;;  %2218 = vperm.xlu1 %3504, %v2160_v49  }
 0x9f5   : > { %2794 = vmatpush1.bf16.msra.mxu1 %v3531_v27 }
 0x9f6   : > { %2795 = vmatprep.subr.bf16.mxu1 %v4815_v4 }
 0x9f8   : > { %2253 = vperm.xlu0 %3503, %v2167_v57   ;;  %2228 = vperm.xlu1 %3504, %v2162_v62  }
 0x9f9   : > { %2796 = vmatpush1.bf16.msra.mxu1 %v3532_v8 }
 0x9fa   : > { %2797 = vmatprep.subr.bf16.mxu1 %v4815_v4 }
 0x9fc   : > { %2263 = vperm.xlu0 %3503, %v2169_v45   ;;  %2238 = vperm.xlu1 %3504, %v2164_v33  }
 0x9fd   : > { %2798 = vmatpush1.bf16.msra.mxu1 %v3533_v35 }
 0x9fe   : > { %2799 = vmatprep.subr.bf16.mxu1 %v4815_v4 }
 0xa00   : > { %2601 = vbcast.lane.b32.xlu0 %v2599_v44, 256  ;;  %2248 = vperm.xlu1 %3504, %v2166_v50   ;;  %v2177_v50 = vld [vmem:[#allocation5 + $0x38] sm:$0xff] }
 0xa01   : > { %2800 = vmatpush1.bf16.msra.mxu1 %v3534_v37  ;;  %v2179_v37 = vld [vmem:[#allocation5 + $0x48] sm:$0xff] }
 0xa02   : > { %2801 = vmatprep.subr.bf16.mxu1 %v4815_v4 }
 0xa04   : > { %2615 = vbcast.lane.b32.xlu0 %v2613_v3, 256  ;;  %2258 = vperm.xlu1 %3504, %v2168_v12  }
 0xa08   : > { %2629 = vbcast.lane.b32.xlu0 %v2627_v26, 256  ;;  %2594 = vbcast.lane.b32.xlu1 %v2592_v38, 256 }
 0xa0c   : > { %2643 = vbcast.lane.b32.xlu0 %v2641_v25, 256  ;;  %2608 = vbcast.lane.b32.xlu1 %v2606_v43, 256 }
 0xa10   : > { %2622 = vbcast.lane.b32.xlu1 %v2620_v36, 256 }
 0xa14   : > { %2636 = vbcast.lane.b32.xlu1 %v2634_v5, 256 }
 0xa5f   : > { %v2194_v39 = vpop.permute.xlu0 %2193  ;;  %v2189_v42 = vpop.permute.xlu1 %2188 }
 0xa60   : > { %v2863_v48 = vrot.slane %v2194_v39, %v4276_v52  ;;  %v2859_v56 = vrot.slane %v2189_v42, %v4273_v51  ;;  %v2267_v11 = vmul.f32 %v2194_v39, %v2171_v59  ;;  %v2266_v13 = vmul.f32 %v2189_v42, %v2170_v53  ;;  %v2178_v53 = vld [vmem:[#allocation5 + $0x40] sm:$0xff] }
 0xa62   : > { %v2864_v29 = vsel %vm1464_vm0, %v2863_v48, %v2859_v56  ;;  %v2283_v33 = vsel %vm933_vm13, %v2267_v11, 0.0  ;;  %v2282_v44 = vsel %vm933_vm13, %v2266_v13, 0.0 }
 0xa63   : > { %v2214_v14 = vpop.permute.xlu0 %2213  ;;  %v2199_v58 = vpop.permute.xlu1 %2198  ;;  %v2284_v35 = vadd.f32 %v2283_v33, %v2282_v44  ;;  %v2180_v44 = vld [vmem:[#allocation5 + $0x50] sm:$0xff] }
 0xa64   : > { %v2268_v49 = vmul.f32 %v2199_v58, %v2172_v2  ;;  %v2868_v20 = vrot.slane %v2199_v58, %v4273_v51  ;;  %v2271_v22 = vmul.f32 %v2214_v14, %v2175_v9  ;;  %v2881_v38 = vrot.slane %v2214_v14, %v4276_v52 }
 0xa65   : > { %v2285_v9 = vrot.slane %v2284_v35, 4 }
 0xa66   : > { %v2291_v25 = vsel %vm933_vm13, %v2268_v49, 0.0  ;;  %v2301_v19 = vsel %vm933_vm13, %v2271_v22, 0.0  ;;  %v2181_v49 = vld [vmem:[#allocation5 + $0x58] sm:$0xff] }
 0xa67   : > { %v2224_v46 = vpop.permute.xlu0 %2223  ;;  %v2204_v47 = vpop.permute.xlu1 %2203 }
 0xa68   : > { %v2269_v57 = vmul.f32 %v2204_v47, %v2173_v23  ;;  %v2872_v62 = vrot.slane %v2204_v47, %v4276_v52  ;;  %v2273_v61 = vmul.f32 %v2224_v46, %v2177_v50 }
 0xa6a   : > { %v2292_v54 = vsel %vm933_vm13, %v2269_v57, 0.0  ;;  %v2873_v45 = vsel %vm1464_vm0, %v2872_v62, %v2868_v20  ;;  %v2310_v2 = vsel %vm933_vm13, %v2273_v61, 0.0 }
 0xa6b   : > { %v2928_v3 = vsel %vm1529_vm1, %v2873_v45, %v2864_v29  ;;  %v2234_v12 = vpop.permute.xlu0 %2233  ;;  %v2209_v26 = vpop.permute.xlu1 %2208  ;;  %v2293_v5 = vadd.f32 %v2292_v54, %v2291_v25  ;;  %v2890_v29 = vrot.slane %v2224_v46, %v4276_v52 }
 0xa6c   : > { %v2270_v43 = vmul.f32 %v2209_v26, %v2174_v40  ;;  %v2877_v36 = vrot.slane %v2209_v26, %v4273_v51  ;;  %v2275_v23 = vmul.f32 %v2234_v12, %v2179_v37  ;;  %v2899_v40 = vrot.slane %v2234_v12, %v4276_v52  ;;  %v2183_v26 = vld [vmem:[#allocation5 + $0x68] sm:$0xff] }
 0xa6d   : > { %v2294_v59 = vrot.slane %v2293_v5, 4 }
 0xa6e   : > { %v2300_v27 = vsel %vm933_vm13, %v2270_v43, 0.0  ;;  %v2882_v8 = vsel %vm1464_vm0, %v2881_v38, %v2877_v36  ;;  %v2319_v50 = vsel %vm933_vm13, %v2275_v23, 0.0  ;;  %v2286_v43 = vadd.f32 %v2285_v9, %v2284_v35 }
 0xa6f   : > { %v2302_v39 = vadd.f32 %v2301_v19, %v2300_v27  ;;  %v2929_v42 = vsel %vm1531_vm2, %v2882_v8, %v2928_v3  ;;  %v2244_v48 = vpop.permute.xlu0 %2243  ;;  %v2219_v56 = vpop.permute.xlu1 %2218  ;;  %v2295_v45 = vadd.f32 %v2294_v59, %v2293_v5 }
 0xa70   : > { %v2272_v14 = vmul.f32 %v2219_v56, %v2176_v32  ;;  %v2886_v58 = vrot.slane %v2219_v56, %v4273_v51  ;;  %v2277_v3 = vmul.f32 %v2244_v48, %v2181_v49  ;;  %v2908_v12 = vrot.slane %v2244_v48, %v4276_v52  ;;  %v2185_v48 = vld [vmem:[#allocation5 + $0x78] sm:$0xff] }
 0xa71   : > { %v2303_v47 = vrot.slane %v2302_v39, 4  ;;  %v2296_v8 = vrot.slane %v2295_v45, 2  ;;  %v2287_v59 = vrot.slane %v2286_v43, 2 }
 0xa72   : > { %v2309_v11 = vsel %vm933_vm13, %v2272_v14, 0.0  ;;  %v2891_v13 = vsel %vm1464_vm0, %v2890_v29, %v2886_v58  ;;  %v2182_v29 = vld [vmem:[#allocation5 + $0x60] sm:$0xff]  ;;  %v2328_v14 = vsel %vm933_vm13, %v2277_v3, 0.0 }
 0xa73   : > { %v2311_v20 = vadd.f32 %v2310_v2, %v2309_v11  ;;  %v2930_v57 = vsel %vm1533_vm3, %v2891_v13, %v2929_v42  ;;  %v2254_v62 = vpop.permute.xlu0 %2253  ;;  %v2229_v46 = vpop.permute.xlu1 %2228  ;;  %v2304_v36 = vadd.f32 %v2303_v47, %v2302_v39 }
 0xa74   : > { %v2274_v22 = vmul.f32 %v2229_v46, %v2178_v53  ;;  %v2895_v54 = vrot.slane %v2229_v46, %v4273_v51  ;;  %v2279_v42 = vmul.f32 %v2254_v62, %v2183_v26  ;;  %v2917_v9 = vrot.slane %v2254_v62, %v4276_v52 }
 0xa75   : > { %v2312_v33 = vrot.slane %v2311_v20, 4  ;;  %v2305_v53 = vrot.slane %v2304_v36, 2  ;;  %v2297_v46 = vadd.f32 %v2296_v8, %v2295_v45  ;;  %v2288_v26 = vadd.f32 %v2287_v59, %v2286_v43 }
 0xa76   : > { %v2318_v38 = vsel %vm933_vm13, %v2274_v22, 0.0  ;;  %v2900_v25 = vsel %vm1464_vm0, %v2899_v40, %v2895_v54  ;;  %v2337_v22 = vsel %vm933_vm13, %v2279_v42, 0.0 }
 0xa77   : > { %v2320_v32 = vadd.f32 %v2319_v50, %v2318_v38  ;;  %v2264_v19 = vpop.permute.xlu0 %2263  ;;  %v2239_v61 = vpop.permute.xlu1 %2238  ;;  %v2313_v37 = vadd.f32 %v2312_v33, %v2311_v20  ;;  %v2931_v39 = vsel %vm1535_vm4, %v2900_v25, %v2930_v57  ;;  %v2184_v57 = vld [vmem:[#allocation5 + $0x70] sm:$0xff]  ;;  %v2306_v38 = vadd.f32 %v2305_v53, %v2304_v36 }
 0xa78   : > { %v2276_v27 = vmul.f32 %v2239_v61, %v2180_v44  ;;  %v2904_v5 = vrot.slane %v2239_v61, %v4273_v51  ;;  %v2281_v44 = vmul.f32 %v2264_v19, %v2185_v48  ;;  %v2926_v61 = vrot.slane %v2264_v19, %v4276_v52 }
 0xa79   : > { %v2321_v56 = vrot.slane %v2320_v32, 4  ;;  %v2314_v40 = vrot.slane %v2313_v37, 2 }
 0xa7a   : > { %v2327_v58 = vsel %vm933_vm13, %v2276_v27, 0.0  ;;  %v2909_v35 = vsel %vm1464_vm0, %v2908_v12, %v2904_v5  ;;  %v2298_v5 = vrot.slane %v2297_v46, 1 }
 0xa7b   : > { %v2322_v2 = vadd.f32 %v2321_v56, %v2320_v32  ;;  %v2329_v23 = vadd.f32 %v2328_v14, %v2327_v58  ;;  %v2602_v11 = vpop.permute.xlu0 %2601  ;;  %v2249_v13 = vpop.permute.xlu1 %2248  ;;  %v2932_v20 = vsel %vm1537_vm6, %v2909_v35, %v2931_v39  ;;  %v2315_v8 = vadd.f32 %v2314_v40, %v2313_v37 }
 0xa7c   : > { %v2278_v47 = vmul.f32 %v2249_v13, %v2182_v29  ;;  %v2913_v49 = vrot.slane %v2249_v13, %v4273_v51  ;;  %v2346_v58 = vsel %vm933_vm13, %v2281_v44, 0.0  ;;  %v2307_v35 = vrot.slane %v2306_v38, 1 }
 0xa7d   : > { %v2330_v54 = vrot.slane %v2329_v23, 4  ;;  %v2323_v33 = vrot.slane %v2322_v2, 2  ;;  %v2646_v53 = vmul.f32 %v2602_v11, %v4089_v16  ;;  %v3536_v16 = vld [vmem:[#allocation7 + $0xd8] sm:$0xff]  }
 0xa7e   : > { %v2336_v50 = vsel %vm933_vm13, %v2278_v47, 0.0  ;;  %v2918_v3 = vsel %vm1464_vm0, %v2917_v9, %v2913_v49  ;;  %v3535_v9 = vld [vmem:[#allocation7 + $0x90] sm:$0xff]   ;;  %v2299_v47 = vadd.f32 %v2298_v5, %v2297_v46  ;;  %v2308_v40 = vadd.f32 %v2307_v35, %v2306_v38 }
 0xa7f   : > { %v2331_v62 = vadd.f32 %v2330_v54, %v2329_v23  ;;  %v2338_v25 = vadd.f32 %v2337_v22, %v2336_v50  ;;  %v2259_v32 = vpop.permute.xlu1 %2258  ;;  %v2933_v27 = vsel %vm1539_vm7, %v2918_v3, %v2932_v20  ;;  %v2616_v29 = vpop.permute.xlu0 %2615  ;;  %v2324_v14 = vadd.f32 %v2323_v33, %v2322_v2  ;;  %2802 = vmatpush1.bf16.msra.mxu1 %v3535_v9 }
 0xa80   : > { %v2280_v12 = vmul.f32 %v2259_v32, %v2184_v57  ;;  %v2922_v45 = vrot.slane %v2259_v32, %v4273_v51  ;;  %v2289_v51 = vrot.slane %v2288_v26, 1  ;;  %v2316_v2 = vrot.slane %v2315_v8, 1  ;;  %2815 = vmatprep.subr.bf16.mxu1 %v4815_v4 }
 0xa81   : > { %v2332_v42 = vrot.slane %v2331_v62, 2  ;;  %v2339_v56 = vrot.slane %v2338_v25, 4  ;;  %v2325_v49 = vrot.slane %v2324_v14, 1  ;;  %v2654_v11 = vsel %vm933_vm13, %v2646_v53, 0.0  ;;  %v3537_v53 = vld [vmem:[#allocation7 + $0xd0] sm:$0xff]  }
 0xa82   : > { %v2345_v43 = vsel %vm933_vm13, %v2280_v12, 0.0  ;;  %v2927_v36 = vsel %vm1464_vm0, %v2926_v61, %v2922_v45  ;;  %v2648_v50 = vmul.f32 %v2616_v29, %v4099_v18  ;;  %v2317_v46 = vadd.f32 %v2316_v2, %v2315_v8 }
 0xa83   : > { %v2333_v39 = vadd.f32 %v2332_v42, %v2331_v62  ;;  %v2340_v52 = vadd.f32 %v2339_v56, %v2338_v25  ;;  %v2347_v19 = vadd.f32 %v2346_v58, %v2345_v43  ;;  %v2595_v59 = vpop.permute.xlu1 %2594  ;;  %v4701_v48 = vsel %vm1541_vm8, %v2927_v36, %v2933_v27  ;;  %v2630_v33 = vpop.permute.xlu0 %2629  ;;  %2816 = vmatpush2.bf16.msra.mxu1 %v3536_v16  ;;  %v3328_v16 = vld [vmem:[%s4805_s9 + $0x5] ss:$0 sm:$0xff] }
 0xa84   : > { %v2645_v37 = vmul.f32 %v2595_v59, %v4084_v15  ;;  %v2290_v15 = vadd.f32 %v2289_v51, %v2288_v26  ;;  %v2326_v61 = vadd.f32 %v2325_v49, %v2324_v14  ;;  %v2650_v18 = vmul.f32 %v2630_v33, %v4128_v31  ;;  %2817 = vmatprep.subr.bf16.mxu1 %v4815_v4 }
 0xa85   : > { %v2341_v23 = vrot.slane %v2340_v52, 2  ;;  %v2348_v13 = vrot.slane %v2347_v19, 4  ;;  %v2334_v22 = vrot.slane %v2333_v39, 1 }
 0xa86   : > { %v2653_v20 = vsel %vm933_vm13, %v2645_v37, 0.0  ;;  %v2676_v32 = vsel %vm1529_vm1, %v2299_v47, %v2290_v15  ;;  %v2662_v31 = vsel %vm933_vm13, %v2650_v18, 0.0 }
 0xa87   : > { %v2342_v54 = vadd.f32 %v2341_v23, %v2340_v52  ;;  %v2349_v57 = vadd.f32 %v2348_v13, %v2347_v19  ;;  %v2609_v44 = vpop.permute.xlu1 %2608  ;;  %v2655_v38 = vadd.f32 %v2654_v11, %v2653_v20  ;;  %v2335_v45 = vadd.f32 %v2334_v22, %v2333_v39  ;;  %v2644_v29 = vpop.permute.xlu0 %2643  ;;  %2818 = vmatpush2.bf16.msra.mxu1 %v3537_v53 }
 0xa88   : > { %v2647_v3 = vmul.f32 %v2609_v44, %v4094_v17  ;;  %v2677_v42 = vsel %vm1531_vm2, %v2308_v40, %v2676_v32  ;;  %v2658_v17 = vsel %vm933_vm13, %v2648_v50, 0.0  ;;  %v3726_v44 = vmov 64  }
 0xa89   : > { %v2343_v62 = vrot.slane %v2342_v54, 1  ;;  %v2350_v25 = vrot.slane %v2349_v57, 2  ;;  %v2678_v43 = vsel %vm1533_vm3, %v2317_v46, %v2677_v42  ;;  %3510 = vset.pattern.permute.xlu0 %v3726_v44  ;;  %3511 = vset.pattern.permute.xlu1 %v3726_v44 }
 0xa8a   : > { %v2656_v12 = vsel %vm933_vm13, %v2647_v3, 0.0  ;;  %v2679_v35 = vsel %vm1535_vm4, %v2326_v61, %v2678_v43  ;;  %v3025_v43 = vld [vmem:[#allocation4] sm:$0xff] }
 0xa8b   : > { %v2351_v27 = vadd.f32 %v2350_v25, %v2349_v57  ;;  %v2657_v26 = vadd.f32 %v2656_v12, %v2655_v38  ;;  %v2623_v5 = vpop.permute.xlu1 %2622  ;;  %v2344_v56 = vadd.f32 %v2343_v62, %v2342_v54  ;;  %v2680_v59 = vsel %vm1537_vm6, %v2335_v45, %v2679_v35 }
 0xa8c   : > { %v2649_v8 = vmul.f32 %v2623_v5, %v4123_v30  ;;  %v2652_v30 = vmul.f32 %v2644_v29, %v4140_v34 }
 0xa8d   : > { %v2659_v14 = vadd.f32 %v2658_v17, %v2657_v26  ;;  %v2352_v58 = vrot.slane %v2351_v27, 1  ;;  %v2681_v51 = vsel %vm1539_vm7, %v2344_v56, %v2680_v59 }
 0xa8e   : > { %v2660_v36 = vsel %vm933_vm13, %v2649_v8, 0.0  ;;  %v2666_v9 = vsel %vm933_vm13, %v2652_v30, 0.0 }
 0xa8f   : > { %v2661_v39 = vadd.f32 %v2660_v36, %v2659_v14  ;;  %v2637_v52 = vpop.permute.xlu1 %2636  ;;  %v2353_v19 = vadd.f32 %v2352_v58, %v2351_v27  ;;  %v3026_v58 = vld [vmem:[#allocation4 + $0x8] sm:$0xff] }
 0xa90   : > { %v2651_v4 = vmul.f32 %v2637_v52, %v4135_v0  ;;  %v3029_v52 = vld [vmem:[#allocation4 + $0x20] sm:$0xff] }
 0xa91   : > { %v2663_v37 = vadd.f32 %v2662_v31, %v2661_v39  ;;  %v4724_v2 = vsel %vm1541_vm8, %v2353_v19, %v2681_v51  ;;  %v3027_v39 = vld [vmem:[#allocation4 + $0x10] sm:$0xff]  ;;  %v3030_v31 = vld [vmem:[#allocation4 + $0x28] sm:$0xff] }
 0xa92   : > { %v2664_v23 = vsel %vm933_vm13, %v2651_v4, 0.0  ;;  %2683 = vrot.lane.b32.xlu1 %v4724_v2, %s3722_s21  ;;  %v3031_v51 = vld [vmem:[#allocation4 + $0x30] sm:$0xff] }
 0xa93   : > { %v2665_v13 = vadd.f32 %v2664_v23, %v2663_v37 }
 0xa95   : > { %v2667_v47 = vadd.f32 %v2666_v9, %v2665_v13 }
 0xa97   : > { %v3505_v34 = vpack.i.bf16 %v4161_v60, %v2667_v47  ;;  %v3032_v47 = vld [vmem:[#allocation4 + $0x38] sm:$0xff] }
 0xa99   : > { %3506 = vrot.lane.b32.xlu0 %v3505_v34, %s3723_s29 }
 0xb04   : > { %v2684_v0 = vpop.permute.xlu1 %2683 }
 0xb05   : > { %v2694_v22 = vsel %vm933_vm13, %v4178_v7, %v2684_v0  ;;  %vm3158_vm13 = vcmask 850944  }
 0xb0b   : > { %v3507_v49 = vpop.permute.xlu0 %3506 }
 0xb0c   : > { %v3509_v20 = vunpack.i.h.bf16 %v3507_v49  ;;  %v3508_v40 = vunpack.i.l.bf16 %v3507_v49 }
 0xb0e   : > { %v2695_v54 = vsel %vm973_vm14, %v2694_v22, %v3508_v40  ;;  %v3033_v22 = vld [vmem:[#allocation4 + $0x40] sm:$0xff] }
 0xb0f   : > { %v2696_v57 = vsel %vm1186_vm15, %v2695_v54, %v3509_v20 }
 0xb10   : > { %v2717_v33 = vpack.c.bf16 %v2696_v57, %v2696_v57 }
 0xb12   : > { %2820 = vmatmul.mubr.bf16.vlgmr.msra.gmra.mxu1 %v2717_v33 }
 0xbd2   : > { %v2821_v15 = vpop.f32.mrf.mxu1 }
 0xbd3   : > { %v2822_v11 = vadd.f32 %v3328_v16, %v2821_v15  ;;  %v3034_v16 = vld [vmem:[#allocation4 + $0x48] sm:$0xff] }
 0xbd4   : > { %v2823_v50 = vpop.f32.mrf.mxu1 }
 0xbd5   : > { %v3340_v3 = vmul.f32 -1.442695, %v2822_v11  ;;  %v2833_v46 = vsel %vm973_vm14, %v2822_v11, -inf }
 0xbd6   : > { %v2824_v7 = vpop.f32.mrf.mxu1  ;;  %2834 = vmax.xlane.f32.xlu1 %v2833_v46  ;;  %v3035_v46 = vld [vmem:[#allocation4 + $0x50] sm:$0xff] }
 0xbd7   : > { %3634 = vpow2.f32 %v3340_v3 }
 0xbd8   : > { %v2825_v62 = vpop.f32.mrf.mxu1 }
 0xbe4   : > { %v3635_v25 = vpop.eup %3634 }
 0xbe5   : > { %v2830_v38 = vadd.f32 1.0, %v3635_v25 }
 0xbe7   : > { %3636 = vrcp.f32 %v2830_v38 }
 0xbf4   : > { %v3637_v32 = vpop.eup %3636 }
 0xbf5   : > { %v2850_v61 = vsub.f32 1.0, %v3637_v32 }
 0xbf7   : > { %2853 = vperm.xlu0 %3510, %v2850_v61  }
 0xc5f   : > { %v2835_v12 = vpop.xlane.xlu1 %2834 }
 0xc60   : > { %v2836_v45 = vsub.f32 %v2822_v11, %v2835_v12 }
 0xc62   : > { %v2837_v27 = vmul.f32 1.442695, %v2836_v45  ;;  %v3036_v45 = vld [vmem:[#allocation4 + $0x58] sm:$0xff] }
 0xc64   : > { %3638 = vpow2.f32 %v2837_v27 }
 0xc71   : > { %v4740_v26 = vpop.eup %3638 }
 0xc72   : > { %v2854_v5 = vpop.permute.xlu0 %2853  ;;  %v2839_v42 = vsel %vm973_vm14, %v4740_v26, 0.0 }
 0xc73   : > { %v2936_v17 = vmul.f32 %v4701_v48, %v2854_v5  ;;  %2840 = vadd.xlane.f32.xlu0 %v2839_v42 }
 0xc75   : > { %v2940_v18 = vrot.slane %v2936_v17, %v4204_v28  ;;  %v2951_v8 = vrot.slane %v2936_v17, %v4342_v55  ;;  %v2962_v56 = vrot.slane %v2936_v17, %v4352_v63  ;;  %v2973_v29 = vrot.slane %v2936_v17, %v4367_v21 }
 0xc76   : > { %v2984_v14 = vrot.slane %v2936_v17, %v4346_v24  ;;  %v2995_v48 = vrot.slane %v2936_v17, %v4355_v1  ;;  %v3006_v28 = vrot.slane %v2936_v17, %v4360_v10  ;;  %v3017_v55 = vrot.slane %v2936_v17, %v4370_v41  ;;  %v3037_v17 = vld [vmem:[#allocation4 + $0x60] sm:$0xff] }
 0xc77   : > { %2942 = vbcast.lane.b32.xlu1 %v2940_v18, 256 }
 0xc7b   : > { %2953 = vbcast.lane.b32.xlu1 %v2951_v8, 256 }
 0xc7f   : > { %2957 = vbcast.lane.b32.xlu1 %v2951_v8, 264 }
 0xc83   : > { %2964 = vbcast.lane.b32.xlu1 %v2962_v56, 256 }
 0xc87   : > { %2975 = vbcast.lane.b32.xlu1 %v2973_v29, 256 }
 0xc89   : > { %2946 = vbcast.lane.b32.xlu0 %v2940_v18, 264 }
 0xc8b   : > { %2986 = vbcast.lane.b32.xlu1 %v2984_v14, 256 }
 0xc8d   : > { %2968 = vbcast.lane.b32.xlu0 %v2962_v56, 264 }
 0xc8f   : > { %2997 = vbcast.lane.b32.xlu1 %v2995_v48, 256 }
 0xc91   : > { %2979 = vbcast.lane.b32.xlu0 %v2973_v29, 264 }
 0xc93   : > { %3008 = vbcast.lane.b32.xlu1 %v3006_v28, 256 }
 0xc95   : > { %2990 = vbcast.lane.b32.xlu0 %v2984_v14, 264 }
 0xc97   : > { %3019 = vbcast.lane.b32.xlu1 %v3017_v55, 256 }
 0xc99   : > { %3001 = vbcast.lane.b32.xlu0 %v2995_v48, 264 }
 0xc9b   : > { %2846 = vperm.xlu1 %3511, %v3637_v32  }
 0xc9d   : > { %3012 = vbcast.lane.b32.xlu0 %v3006_v28, 264 }
 0xc9f   : > { %3151 = vrot.lane.b32.xlu1 %v4161_v60, %s3727_s28  ;;  %v3028_v60 = vld [vmem:[#allocation4 + $0x18] sm:$0xff] }
 0xca1   : > { %3023 = vbcast.lane.b32.xlu0 %v3017_v55, 264 }
 0xca3   : > { %3165 = vrot.lane.b32.xlu1 %v4724_v2, %s3723_s29 }
 0xca5   : > { %3148 = vrot.lane.b32.xlu0 %v4170_v6, %s3728_s30 }
 0xca9   : > { %3154 = vrot.lane.b32.xlu0 %v4724_v2, %s3729_s12 }
 0xce9   : > { %v2943_v24 = vpop.permute.xlu1 %2942 }
 0xcea   : > { %v3041_v59 = vmul.f32 %v3025_v43, %v2943_v24  ;;  %v3039_v43 = vld [vmem:[#allocation4 + $0x70] sm:$0xff] }
 0xcec   : > { %v3058_v23 = vsel %vm3057_vm5, %v3041_v59, 0.0 }
 0xced   : > { %v2954_v63 = vpop.permute.xlu1 %2953 }
 0xcee   : > { %v3043_v30 = vmul.f32 %v3027_v39, %v2954_v63 }
 0xcf0   : > { %v3067_v20 = vsel %vm3057_vm5, %v3043_v30, 0.0 }
 0xcf1   : > { %v2958_v1 = vpop.permute.xlu1 %2957 }
 0xcf2   : > { %v3044_v6 = vmul.f32 %v3028_v60, %v2958_v1  ;;  %v3038_v1 = vld [vmem:[#allocation4 + $0x68] sm:$0xff] }
 0xcf4   : > { %v3068_v13 = vsel %vm3057_vm5, %v3044_v6, 0.0 }
 0xcf5   : > { %v2965_v10 = vpop.permute.xlu1 %2964  ;;  %v3069_v57 = vadd.f32 %v3068_v13, %v3067_v20 }
 0xcf6   : > { %v3045_v4 = vmul.f32 %v3029_v52, %v2965_v10 }
 0xcf7   : > { %v3070_v38 = vrot.slane %v3069_v57, 4 }
 0xcf8   : > { %v3076_v40 = vsel %vm3057_vm5, %v3045_v4, 0.0  ;;  %v3040_v4 = vld [vmem:[#allocation4 + $0x78] sm:$0xff] }
 0xcf9   : > { %v2976_v21 = vpop.permute.xlu1 %2975  ;;  %v3071_v29 = vadd.f32 %v3070_v38, %v3069_v57 }
 0xcfa   : > { %v3047_v34 = vmul.f32 %v3031_v51, %v2976_v21 }
 0xcfb   : > { %v3072_v39 = vrot.slane %v3071_v29, 2 }
 0xcfc   : > { %v4758_v41 = vpop.xlane.xlu0 %2840  ;;  %v3085_v15 = vsel %vm3057_vm5, %v3047_v34, 0.0 }
 0xcfd   : > { %v2987_v36 = vpop.permute.xlu1 %2986  ;;  %3640 = vrcp.f32 %v4758_v41 }
 0xcfe   : > { %v3049_v11 = vmul.f32 %v3033_v22, %v2987_v36 }
 0xd00   : > { %v2947_v35 = vpop.permute.xlu0 %2946  ;;  %v3094_v27 = vsel %vm3057_vm5, %v3049_v11, 0.0 }
 0xd01   : > { %v3042_v19 = vmul.f32 %v3026_v58, %v2947_v35  ;;  %v2998_v9 = vpop.permute.xlu1 %2997 }
 0xd02   : > { %v3051_v42 = vmul.f32 %v3035_v46, %v2998_v9  ;;  %v3073_v9 = vadd.f32 %v3072_v39, %v3071_v29 }
 0xd03   : > { %v3059_v53 = vsel %vm3057_vm5, %v3042_v19, 0.0 }
 0xd04   : > { %v2969_v37 = vpop.permute.xlu0 %2968  ;;  %v3060_v0 = vadd.f32 %v3059_v53, %v3058_v23  ;;  %v3103_v21 = vsel %vm3057_vm5, %v3051_v42, 0.0  ;;  %v3642_v42 = vld [vmem:[#allocation2] sm:$0xff] }
 0xd05   : > { %v3046_v2 = vmul.f32 %v3030_v31, %v2969_v37  ;;  %v3009_v7 = vpop.permute.xlu1 %3008 }
 0xd06   : > { %v3061_v50 = vrot.slane %v3060_v0, 4  ;;  %v3053_v28 = vmul.f32 %v3037_v17, %v3009_v7 }
 0xd07   : > { %v3077_v49 = vsel %vm3057_vm5, %v3046_v2, 0.0 }
 0xd08   : > { %v2980_v54 = vpop.permute.xlu0 %2979  ;;  %v3078_v33 = vadd.f32 %v3077_v49, %v3076_v40  ;;  %v3062_v5 = vadd.f32 %v3061_v50, %v3060_v0  ;;  %v3112_v59 = vsel %vm3057_vm5, %v3053_v28, 0.0  ;;  %v3074_v50 = vrot.slane %v3073_v9, 1 }
 0xd09   : > { %v3048_v44 = vmul.f32 %v3032_v47, %v2980_v54  ;;  %v3020_v24 = vpop.permute.xlu1 %3019 }
 0xd0a   : > { %v3079_v32 = vrot.slane %v3078_v33, 4  ;;  %v3063_v10 = vrot.slane %v3062_v5, 2  ;;  %v3055_v53 = vmul.f32 %v3039_v43, %v3020_v24 }
 0xd0b   : > { %v3086_v3 = vsel %vm3057_vm5, %v3048_v44, 0.0 }
 0xd0c   : > { %v3087_v62 = vadd.f32 %v3086_v3, %v3085_v15  ;;  %v2991_v25 = vpop.permute.xlu0 %2990  ;;  %v3080_v14 = vadd.f32 %v3079_v32, %v3078_v33  ;;  %v3064_v51 = vadd.f32 %v3063_v10, %v3062_v5  ;;  %v3121_v54 = vsel %vm3057_vm5, %v3055_v53, 0.0 }
 0xd0d   : > { %v3050_v61 = vmul.f32 %v3034_v16, %v2991_v25 }
 0xd0e   : > { %v3088_v12 = vrot.slane %v3087_v62, 4  ;;  %v3081_v52 = vrot.slane %v3080_v14, 2  ;;  %v3065_v22 = vrot.slane %v3064_v51, 1 }
 0xd0f   : > { %v3095_v18 = vsel %vm3057_vm5, %v3050_v61, 0.0  ;;  %v4816_v61 = vld [vmem:[#allocation11_spill] sm:$0xff] }
 0xd10   : > { %v3096_v8 = vadd.f32 %v3095_v18, %v3094_v27  ;;  %v3002_v56 = vpop.permute.xlu0 %3001  ;;  %v3089_v55 = vadd.f32 %v3088_v12, %v3087_v62  ;;  %v3082_v47 = vadd.f32 %v3081_v52, %v3080_v14  ;;  %v3066_v38 = vadd.f32 %v3065_v22, %v3064_v51 }
 0xd11   : > { %v3052_v48 = vmul.f32 %v3036_v45, %v3002_v56  ;;  %v3075_v56 = vadd.f32 %v3074_v50, %v3073_v9 }
 0xd12   : > { %v3097_v63 = vrot.slane %v3096_v8, 4  ;;  %v3090_v6 = vrot.slane %v3089_v55, 2  ;;  %v3083_v3 = vrot.slane %v3082_v47, 1 }
 0xd13   : > { %v3104_v58 = vsel %vm3057_vm5, %v3052_v48, 0.0 }
 0xd14   : > { %v3098_v60 = vadd.f32 %v3097_v63, %v3096_v8  ;;  %v3105_v36 = vadd.f32 %v3104_v58, %v3103_v21  ;;  %v3013_v35 = vpop.permute.xlu0 %3012  ;;  %v3091_v0 = vadd.f32 %v3090_v6, %v3089_v55  ;;  %v3641_v8 = vpop.eup %3640  ;;  %v3084_v29 = vadd.f32 %v3083_v3, %v3082_v47 }
 0xd15   : > { %v3054_v19 = vmul.f32 %v3038_v1, %v3013_v35  ;;  %v3139_v1 = vsel %vm1529_vm1, %v3075_v56, %v3066_v38  ;;  %v2843_v21 = vmul.f32 %v3641_v8, %v4740_v26 }
 0xd16   : > { %v3106_v31 = vrot.slane %v3105_v36, 4  ;;  %v2847_v30 = vpop.permute.xlu1 %2846  ;;  %v3099_v37 = vrot.slane %v3098_v60, 2  ;;  %v3092_v46 = vrot.slane %v3091_v0, 1  ;;  %v3140_v43 = vsel %vm1531_vm2, %v3084_v29, %v3139_v1 }
 0xd17   : > { %v3113_v2 = vsel %vm3057_vm5, %v3054_v19, 0.0  ;;  %v2849_v35 = vmul.f32 %v2847_v30, %v2843_v21 }
 0xd18   : > { %v3107_v23 = vadd.f32 %v3106_v31, %v3105_v36  ;;  %v3114_v41 = vadd.f32 %v3113_v2, %v3112_v59  ;;  %v3024_v13 = vpop.permute.xlu0 %3023  ;;  %v3100_v57 = vadd.f32 %v3099_v37, %v3098_v60  ;;  %v3093_v48 = vadd.f32 %v3092_v46, %v3091_v0 }
 0xd19   : > { %v3056_v34 = vmul.f32 %v3040_v4, %v3024_v13  ;;  %v3130_v31 = vsel %vm973_vm14, %v2849_v35, 0.0 }
 0xd1a   : > { %v3108_v49 = vrot.slane %v3107_v23, 2  ;;  %v3115_v20 = vrot.slane %v3114_v41, 4  ;;  %v3152_v40 = vpop.permute.xlu1 %3151  ;;  %v3101_v32 = vrot.slane %v3100_v57, 1  ;;  %v3141_v36 = vsel %vm1533_vm3, %v3093_v48, %v3140_v43 }
 0xd1b   : > { %v3122_v33 = vsel %vm3057_vm5, %v3056_v34, 0.0 }
 0xd1c   : > { %v3109_v44 = vadd.f32 %v3108_v49, %v3107_v23  ;;  %v3116_v16 = vadd.f32 %v3115_v20, %v3114_v41  ;;  %v3123_v15 = vadd.f32 %v3122_v33, %v3121_v54  ;;  %v3149_v11 = vpop.permute.xlu0 %3148  ;;  %v3102_v63 = vadd.f32 %v3101_v32, %v3100_v57 }
 0xd1e   : > { %v3117_v7 = vrot.slane %v3116_v16, 2  ;;  %v3124_v62 = vrot.slane %v3123_v15, 4  ;;  %v3166_v25 = vpop.permute.xlu1 %3165  ;;  %v3110_v45 = vrot.slane %v3109_v44, 1  ;;  %v3142_v52 = vsel %vm1535_vm4, %v3102_v63, %v3141_v36 }
 0xd1f   : > { %v3168_v12 = vsel %vm973_vm14, %v4816_v61, %v3166_v25 }
 0xd20   : > { %v3118_v27 = vadd.f32 %v3117_v7, %v3116_v16  ;;  %v3125_v5 = vadd.f32 %v3124_v62, %v3123_v15  ;;  %v3169_v17 = vsel %vm1186_vm15, %v3168_v12, %v3642_v42  ;;  %v3155_v18 = vpop.permute.xlu0 %3154  ;;  %v3111_v10 = vadd.f32 %v3110_v45, %v3109_v44 }
 0xd21   : > { %3170 = vst [vmem:[#allocation2] sm:$0xff] %v3169_v17  ;;  %v3160_v14 = vsel %vm2569_vm11, %v3152_v40, %v3155_v18 }
 0xd22   : > { %v3119_v28 = vrot.slane %v3118_v27, 1  ;;  %v3126_v55 = vrot.slane %v3125_v5, 2  ;;  %v3162_v24 = vsel %vm3161_vm12, %v3160_v14, 0.0  ;;  %v3143_v59 = vsel %vm1537_vm6, %v3111_v10, %v3142_v52 }
 0xd23   : > { %3164 = vst [vmem:[%s3852_s26 + $0x8] sm:$0xff] %v3162_v24 }
 0xd24   : > { %v3127_v58 = vadd.f32 %v3126_v55, %v3125_v5  ;;  %v3120_v60 = vadd.f32 %v3119_v28, %v3118_v27 }
 0xd26   : > { %v3128_v39 = vrot.slane %v3127_v58, 1  ;;  %v3144_v6 = vsel %vm1539_vm7, %v3120_v60, %v3143_v59 }
 0xd28   : > { %v3129_v19 = vadd.f32 %v3128_v39, %v3127_v58 }
 0xd2a   : > { %v3145_v26 = vsel %vm1541_vm8, %v3129_v19, %v3144_v6 }
 0xd2b   : > { %v3147_v4 = vadd.f32 %v3145_v26, %v3130_v31 }
 0xd2d   : > { %v3157_v51 = vsel %vm3057_vm5, %v3147_v4, %v3149_v11 }
 0xd2e   : > { %v3159_v53 = vsel %vm3158_vm13, %v3157_v51, %v3152_v40 }
 0xd2f   : > { %3163 = vst [vmem:[%s3852_s26] sm:$0xff] %v3159_v53 }
 0xd30 PF: > { %s24_s17 = sadd.s32 1, %s3709_s17  }
 0xd31   : > { %p21_p4 = scmp.ge.s32.totalorder %s24_s17, 6  }
 0xd33   :  { %23 = sbr.rel (!%p21_p4) target bundleno = 2 (0x2), region = 112 }
 0xd38   :  { %3201 = vsyncpa [#allocation6], 1 }
 0xd39   :  { %3203 = vsyncpa [#allocation6 + $0x1], 1 }
 0xd3a   :  { %3204 = vsyncpa [#allocation8], 1 }

</bundles_post_ra>
